<compile_context>
chip_gen: v7x
topology: tpu7x:2x2x1
jax: 0.10.0
libtpu: 0.0.40
codegen_flags: <defaults>
</compile_context>

<pallas_src>
import jax
import jax.numpy as jnp
import numpy as np
from jax.experimental import pallas as pl
from jax.experimental.pallas import tpu as pltpu

SELU_ALPHA = 1.6732632423543772
SELU_SCALE = 1.0507009873554805
_HI = jax.lax.Precision.HIGHEST


def _selu(x):
    return SELU_SCALE * jnp.where(x > 0, x, SELU_ALPHA * (jnp.exp(x) - 1.0))


# ---------------------------------------------------------------------------
# Fused generator kernel: a chain of matmuls over folded weights.
#   x0 = z                                   [bt, nz]
#   x1 = selu(x0 @ M0)      (latent proj -> 4x4xC0, lanes ordered (h, w, c))
#   xi = selu(x_{i-1} @ Mi) (folded ConvTranspose2d(4,2,1)+SELU, lanes (h, w, c))
#   y  = tanh(x_{n-1} @ Mn) (folded ConvTranspose2d(4,2,1)+Tanh, lanes (c, h, w) == NCHW)
# ---------------------------------------------------------------------------
def _make_generator_kernel(n_mats):
    def kernel(*refs):
        z_ref = refs[0]
        w_refs = refs[1:1 + n_mats]
        o_ref = refs[1 + n_mats]
        x = z_ref[...].astype(jnp.bfloat16)                 # bf16 operands, f32 accumulate
        for li in range(n_mats):
            y = jnp.dot(x, w_refs[li][...], preferred_element_type=jnp.float32)
            if li == n_mats - 1:
                o_ref[...] = jnp.tanh(y)                    # single lane-dense f32 store
            else:
                x = _selu(y).astype(jnp.bfloat16)           # f32 epilogue, bf16 next operand
    return kernel


def _pick_batch_tile(batch):
    for bt in (256, 128, 64, 32, 16, 8):
        if batch % bt == 0:
            return bt
    return batch  # tiny batch: one program covers everything


def generator_forward(z_nchw, packed):
    """z_nchw: [B, nz, 1, 1] f32;  packed: output of pack_generator_params."""
    mats = packed["mats"]
    nc, oh, ow = packed["out_chw"]
    B, nz = z_nchw.shape[0], z_nchw.shape[1]
    out_cols = nc * oh * ow
    z2d = z_nchw.reshape(B, nz)

    bt = _pick_batch_tile(B)
    grid = (B // bt,)
    in_specs = [pl.BlockSpec((bt, nz), lambda i: (i, 0))]
    for m in mats:
        in_specs.append(pl.BlockSpec(m.shape, lambda i: (0, 0)))
    out_spec = pl.BlockSpec((bt, out_cols), lambda i: (i, 0))

    out2d = pl.pallas_call(
        _make_generator_kernel(len(mats)),
        out_shape=jax.ShapeDtypeStruct((B, out_cols), jnp.float32),
        grid_spec=pltpu.PrefetchScalarGridSpec(
            num_scalar_prefetch=0,
            grid=grid,
            in_specs=in_specs,
            out_specs=out_spec,
        ),
        compiler_params=pltpu.CompilerParams(
            dimension_semantics=("parallel",),       # batch tiles -> both TCs on v7x
            vmem_limit_bytes=32 * 1024 * 1024,       # safe on v5e/v6e (128 MiB) and v7x (64 MiB)
        ),
    )(z2d, *mats)
    # Lanes of the last layer are packed (c, h, w): this reshape is a free bitcast to NCHW.
    return out2d.reshape(B, nc, oh, ow)


# ---------------------------------------------------------------------------
# Parameter setup / weight packing (done once, outside the hot path)
# ---------------------------------------------------------------------------
def calc_layers(img_size, current_size=4):
    n_layers = 0
    while current_size < img_size:
        current_size *= 2
        n_layers += 1
    return n_layers, 2 ** (n_layers - 1)


def init_generator_params(key, final_img_size, nz):
    """PyTorch-layout ConvTranspose2d weights [Cin, Cout, 4, 4] (bias=False everywhere)."""
    nc, ngf = final_img_size[0], final_img_size[-1]
    n_layers, feat_mult = calc_layers(ngf)
    c0 = ngf * feat_mult
    k, key = jax.random.split(key)
    w_proj = 0.02 * jax.random.normal(k, (nz, c0, 4, 4), jnp.float32)
    w_mid = []
    in_ch = c0
    fm = feat_mult
    for _ in range(n_layers - 1):
        out_ch = ngf * fm // 2
        k, key = jax.random.split(key)
        w_mid.append(0.02 * jax.random.normal(k, (in_ch, out_ch, 4, 4), jnp.float32))
        in_ch = out_ch
        fm //= 2
    k, key = jax.random.split(key)
    w_last = 0.02 * jax.random.normal(k, (ngf, nc, 4, 4), jnp.float32)
    return {"w_proj": w_proj, "w_mid": w_mid, "w_last": w_last}


def _pack_proj(w0):
    """ConvTranspose2d(nz, C0, 4, 1, 0) on a 1x1 input == matmul; lanes ordered (h, w, c)."""
    nz, c0 = w0.shape[0], w0.shape[1]
    return np.transpose(np.asarray(w0, np.float32), (0, 2, 3, 1)).reshape(nz, 16 * c0)


def _fold_convt_s2p1(w, h_in, w_in, out_order):
    """Unroll ConvTranspose2d(Cin, Cout, 4, 2, 1, bias=False) into one dense matrix.

    Input lanes ordered (ih, iw, ci); output lanes (oh, ow, co) for 'hwc', or (co, oh, ow)
    (== NCHW) for 'chw'.  The stride-2 scatter, tap accumulation and padding=1 crop are
    all baked in: out[b, :] = x[b, :] @ wf.
    """
    w = np.asarray(w, np.float32)
    cin, cout, kh_sz, kw_sz = w.shape
    h_out, w_out = 2 * h_in, 2 * w_in
    wf = np.zeros((h_in * w_in * cin, h_out * w_out * cout), np.float32)
    for ih in range(h_in):
        for iw in range(w_in):
            rbase = (ih * w_in + iw) * cin
            for kh in range(kh_sz):
                oh = 2 * ih + kh - 1
                if oh < 0 or oh >= h_out:
                    continue
                for kw in range(kw_sz):
                    ow = 2 * iw + kw - 1
                    if ow < 0 or ow >= w_out:
                        continue
                    if out_order == "hwc":
                        cbase = (oh * w_out + ow) * cout
                        wf[rbase:rbase + cin, cbase:cbase + cout] = w[:, :, kh, kw]
                    else:  # 'chw' -> NCHW-packed lanes for the final layer
                        for co in range(cout):
                            wf[rbase:rbase + cin, (co * h_out + oh) * w_out + ow] = w[:, co, kh, kw]
    return wf


def pack_generator_params(params, dtype=jnp.bfloat16):
    mats_np = [_pack_proj(params["w_proj"])]
    h = w = 4
    for wm in params["w_mid"]:
        mats_np.append(_fold_convt_s2p1(wm, h, w, "hwc"))
        h, w = 2 * h, 2 * w
    w_last = params["w_last"]
    mats_np.append(_fold_convt_s2p1(w_last, h, w, "chw"))
    nc = w_last.shape[1]
    mats = [jnp.asarray(m, dtype) for m in mats_np]
    return {"mats": mats, "out_chw": (nc, 2 * h, 2 * w)}


# ---------------------------------------------------------------------------
# Pure-JAX references (no Pallas) for validation
# ---------------------------------------------------------------------------
def _convt_stride2_ref(x, w):  # x NHWC [B,H,W,Cin], w [Cin, Cout, 4, 4]
    B, H, W, _ = x.shape
    cout = w.shape[1]
    out = jnp.zeros((B, 2 * H + 2, 2 * W + 2, cout), jnp.float32)
    for kh in range(4):
        for kw in range(4):
            y = jnp.einsum("bhwi,io->bhwo", x, w[:, :, kh, kw], precision=_HI)
            out = out.at[:, kh:kh + 2 * H:2, kw:kw + 2 * W:2, :].add(y)
    return out[:, 1:2 * H + 1, 1:2 * W + 1, :]


def generator_forward_ref(z_nchw, params):
    """f32 reference matching the PyTorch module (condition=False, selu=True)."""
    B, nz = z_nchw.shape[0], z_nchw.shape[1]
    w0 = params["w_proj"]
    c0 = w0.shape[1]
    w0_2d = jnp.transpose(w0, (0, 2, 3, 1)).reshape(nz, 16 * c0)
    y = _selu(jnp.dot(z_nchw.reshape(B, nz), w0_2d, precision=_HI)).reshape(B, 4, 4, c0)
    for w in params["w_mid"]:
        y = _selu(_convt_stride2_ref(y, w))
    y = jnp.tanh(_convt_stride2_ref(y, params["w_last"]))
    return jnp.transpose(y, (0, 3, 1, 2))


def generator_forward_folded_ref(z_nchw, packed):
    """Same folded-matmul chain as the kernel, in plain JAX (validates the packing math)."""
    B, nz = z_nchw.shape[0], z_nchw.shape[1]
    x = z_nchw.reshape(B, nz).astype(jnp.float32)
    mats = packed["mats"]
    for i, m in enumerate(mats):
        y = jnp.dot(x, m.astype(jnp.float32), precision=_HI)
        x = jnp.tanh(y) if i == len(mats) - 1 else _selu(y)
    nc, oh, ow = packed["out_chw"]
    return x.reshape(B, nc, oh, ow)


if __name__ == "__main__":
    final_img_size = [3, 16, 16]   # nc=3, ngf=16 -> n_layers=2, feat_mult=2
    nz = 32
    batch = 2

    key = jax.random.PRNGKey(0)
    kz, kp = jax.random.split(key)
    params = init_generator_params(kp, final_img_size, nz)
    z = jax.random.normal(kz, (batch, nz, 1, 1), jnp.float32)

    # 1) validate the folded-weight construction itself (f32, tight tolerance, pure JAX)
    ref = jax.block_until_ready(generator_forward_ref(z, params))
    packed_f32 = pack_generator_params(params, dtype=jnp.float32)
    folded = jax.block_until_ready(generator_forward_folded_ref(z, packed_f32))
    assert bool(jnp.allclose(folded, ref, atol=1e-5, rtol=1e-4)), float(
        jnp.max(jnp.abs(folded - ref)))

    # 2) run the fused Pallas kernel (bf16 operands, f32 accumulation) and check vs reference
    packed = pack_generator_params(params, dtype=jnp.bfloat16)
    out = jax.block_until_ready(generator_forward(z, packed))

    assert out.shape == (batch, final_img_size[0], final_img_size[1], final_img_size[2]), out.shape
    assert bool(jnp.all(jnp.isfinite(out)))
    err = float(jnp.max(jnp.abs(out - ref)))
    assert bool(jnp.allclose(out, ref, atol=5e-4, rtol=5e-2)), err

    print("KERNEL_OK")
</pallas_src>

<mosaic_0001>
module attributes {stable_mosaic.version = 11 : i64} {
  func.func @kernel(%arg0: i32, %arg1: memref<2x32xf32, #tpu.memory_space<vmem>>, %arg2: memref<32x512xbf16, #tpu.memory_space<vmem>>, %arg3: memref<512x1024xbf16, #tpu.memory_space<vmem>>, %arg4: memref<1024x768xbf16, #tpu.memory_space<vmem>>, %arg5: memref<2x768xf32, #tpu.memory_space<vmem>>) attributes {dimension_semantics = [#tpu.dimension_semantics<parallel>], iteration_bounds = array<i64: 1>, scalar_prefetch = 0 : i64, scratch_operands = 0 : i64, tpu.core_type = #tpu.core_type<tc>, window_params = [{transform_indices = @transform_0, window_bounds = array<i64: 2, 32>}, {pipeline_mode = #tpu.pipeline_mode<synchronous>, transform_indices = @transform_1, window_bounds = array<i64: 32, 512>}, {pipeline_mode = #tpu.pipeline_mode<synchronous>, transform_indices = @transform_2, window_bounds = array<i64: 512, 1024>}, {pipeline_mode = #tpu.pipeline_mode<synchronous>, transform_indices = @transform_3, window_bounds = array<i64: 1024, 768>}, {transform_indices = @transform_4, window_bounds = array<i64: 2, 768>}]} {
    %c0 = arith.constant 0 : index
    %c0_0 = arith.constant 0 : index
    %0 = vector.load %arg1[%c0, %c0_0] : memref<2x32xf32, #tpu.memory_space<vmem>>, vector<2x32xf32>
    %1 = arith.truncf %0 : vector<2x32xf32> to vector<2x32xbf16>
    %c0_1 = arith.constant 0 : index
    %c0_2 = arith.constant 0 : index
    %2 = vector.load %arg2[%c0_1, %c0_2] : memref<32x512xbf16, #tpu.memory_space<vmem>>, vector<32x512xbf16>
    %cst = arith.constant dense<0.000000e+00> : vector<2x512xf32>
    %3 = tpu.matmul %1, %2, %cst {dimension_numbers = #tpu.dot_dimension_numbers<[1], [0], [0], [1], [0, 0, 1, 1], [], []>} : vector<2x32xbf16>, vector<32x512xbf16>, vector<2x512xf32> -> vector<2x512xf32>
    %cst_3 = arith.constant 0.000000e+00 : f32
    %4 = vector.broadcast %cst_3 : f32 to vector<2x512xf32>
    %5 = arith.cmpf ogt, %3, %4 : vector<2x512xf32>
    %6 = math.exp %3 : vector<2x512xf32>
    %cst_4 = arith.constant 1.000000e+00 : f32
    %7 = vector.broadcast %cst_4 : f32 to vector<2x512xf32>
    %8 = arith.subf %6, %7 : vector<2x512xf32>
    %cst_5 = arith.constant 1.67326319 : f32
    %9 = vector.broadcast %cst_5 : f32 to vector<2x512xf32>
    %10 = arith.mulf %9, %8 : vector<2x512xf32>
    %11 = arith.select %5, %3, %10 : vector<2x512xi1>, vector<2x512xf32>
    %cst_6 = arith.constant 1.05070102 : f32
    %12 = vector.broadcast %cst_6 : f32 to vector<2x512xf32>
    %13 = arith.mulf %12, %11 : vector<2x512xf32>
    %14 = arith.truncf %13 : vector<2x512xf32> to vector<2x512xbf16>
    %c0_7 = arith.constant 0 : index
    %c0_8 = arith.constant 0 : index
    %15 = vector.load %arg3[%c0_7, %c0_8] : memref<512x1024xbf16, #tpu.memory_space<vmem>>, vector<512x1024xbf16>
    %cst_9 = arith.constant dense<0.000000e+00> : vector<2x1024xf32>
    %16 = tpu.matmul %14, %15, %cst_9 {dimension_numbers = #tpu.dot_dimension_numbers<[1], [0], [0], [1], [0, 0, 1, 1], [], []>} : vector<2x512xbf16>, vector<512x1024xbf16>, vector<2x1024xf32> -> vector<2x1024xf32>
    %cst_10 = arith.constant 0.000000e+00 : f32
    %17 = vector.broadcast %cst_10 : f32 to vector<2x1024xf32>
    %18 = arith.cmpf ogt, %16, %17 : vector<2x1024xf32>
    %19 = math.exp %16 : vector<2x1024xf32>
    %cst_11 = arith.constant 1.000000e+00 : f32
    %20 = vector.broadcast %cst_11 : f32 to vector<2x1024xf32>
    %21 = arith.subf %19, %20 : vector<2x1024xf32>
    %cst_12 = arith.constant 1.67326319 : f32
    %22 = vector.broadcast %cst_12 : f32 to vector<2x1024xf32>
    %23 = arith.mulf %22, %21 : vector<2x1024xf32>
    %24 = arith.select %18, %16, %23 : vector<2x1024xi1>, vector<2x1024xf32>
    %cst_13 = arith.constant 1.05070102 : f32
    %25 = vector.broadcast %cst_13 : f32 to vector<2x1024xf32>
    %26 = arith.mulf %25, %24 : vector<2x1024xf32>
    %27 = arith.truncf %26 : vector<2x1024xf32> to vector<2x1024xbf16>
    %c0_14 = arith.constant 0 : index
    %c0_15 = arith.constant 0 : index
    %28 = vector.load %arg4[%c0_14, %c0_15] : memref<1024x768xbf16, #tpu.memory_space<vmem>>, vector<1024x768xbf16>
    %cst_16 = arith.constant dense<0.000000e+00> : vector<2x768xf32>
    %29 = tpu.matmul %27, %28, %cst_16 {dimension_numbers = #tpu.dot_dimension_numbers<[1], [0], [0], [1], [0, 0, 1, 1], [], []>} : vector<2x1024xbf16>, vector<1024x768xbf16>, vector<2x768xf32> -> vector<2x768xf32>
    %30 = math.tanh %29 : vector<2x768xf32>
    %c0_17 = arith.constant 0 : index
    %c0_18 = arith.constant 0 : index
    %31 = vector.load %arg5[%c0_17, %c0_18] : memref<2x768xf32, #tpu.memory_space<vmem>>, vector<2x768xf32>
    tpu.vector_store %arg5[%c0_17, %c0_18], %30 {strides = array<i32>} : memref<2x768xf32, #tpu.memory_space<vmem>>, vector<2x768xf32>,
    return
  }
  func.func @transform_0(%arg0: i32) -> (i32, i32) {
    %c0_i32 = arith.constant 0 : i32
    %c0_i32_0 = arith.constant 0 : i32
    return %arg0, %c0_i32 : i32, i32
  }
  func.func @transform_1(%arg0: i32) -> (i32, i32) {
    %c0_i32 = arith.constant 0 : i32
    %c0_i32_0 = arith.constant 0 : i32
    %c0_i32_1 = arith.constant 0 : i32
    return %c0_i32, %c0_i32_0 : i32, i32
  }
  func.func @transform_2(%arg0: i32) -> (i32, i32) {
    %c0_i32 = arith.constant 0 : i32
    %c0_i32_0 = arith.constant 0 : i32
    %c0_i32_1 = arith.constant 0 : i32
    return %c0_i32, %c0_i32_0 : i32, i32
  }
  func.func @transform_3(%arg0: i32) -> (i32, i32) {
    %c0_i32 = arith.constant 0 : i32
    %c0_i32_0 = arith.constant 0 : i32
    %c0_i32_1 = arith.constant 0 : i32
    return %c0_i32, %c0_i32_0 : i32, i32
  }
  func.func @transform_4(%arg0: i32) -> (i32, i32) {
    %c0_i32 = arith.constant 0 : i32
    %c0_i32_0 = arith.constant 0 : i32
    return %arg0, %c0_i32 : i32, i32
  }
}

</mosaic_0001>

<bundles_post_ra>
// kernel: tpu_custom_call.1
= control target key start
LH: loop header
LB: loop body
LE: loop exit
PB: predicated region body
PF: predicated region fallthrough
CT: control target
= control target key end

     0   :  { %9 = vsyncpa [#allocation3], 0  ;;  %s6671_s0 = inlined_call_operand.hbm [shape: f32[2,32], index: 0, kind: input, shape index: {}]   ;;  %s6672_s1 = inlined_call_operand.hbm [shape: bf16[32,512], index: 1, kind: input, shape index: {}]   ;;  %s6673_s2 = inlined_call_operand.hbm [shape: bf16[512,1024], index: 2, kind: input, shape index: {}]   ;;  %s6674_s3 = inlined_call_operand.hbm [shape: bf16[1024,768], index: 3, kind: input, shape index: {}]   ;;  %s6675_s4 = inlined_call_operand.hbm [shape: f32[2,768], index: 4, kind: output, shape index: {}]  }
   0x1   :  { %10 = vsyncpa [#allocation6], 0 }
   0x2   :  { %11 = vsyncpa [#allocation9], 0 }
   0x3   :  { %12 = vsyncpa [#allocation4], 0  ;;  %s6492_s15 = smov [#allocation5]   ;;  %s6374_s19 = scalar_lea.hbm %s6672_s1, 1024 }
   0x4   :  { %s28_s16 = sshll.u32 %s6492_s15, 4  ;;  %p6375_p0 = scmp.ne.s32.totalorder %s6672_s1, %s6374_s19  ;;  %s29_s16 = int_to_ptr.vmem [resolvable:$true] %s28_s16 }
   0x5   :  { %p6378_p1 = scmp.lt.u32.totalorder %s6374_s19, %s6672_s1 }
   0x7   :  { %p6380_p2 = pnand %p6378_p1, %p6375_p0 }
   0x9   :  { %6383 = shalt.err (!%p6380_p2)
}
   0xa   :  { %s6384_s24 = scalar_lea.vmem %s29_s16, 1024  ;;  %p6389_p4 = scmp.lt.s32.totalorder %s29_s16, %s29_s16 }
   0xb   :  { %p6385_p3 = scmp.ne.s32.totalorder %s29_s16, %s6384_s24  ;;  %p6390_p5 = scmp.lt.s32.totalorder %s6384_s24, %s6384_s24 }
   0xd   :  { %p6391_p6 = por %p6390_p5, %p6389_p4 }
   0xf   :  { %p6392_p7 = pnand %p6391_p6, %p6385_p3 }
  0x11   :  { %6395 = shalt.err (!%p6392_p7)
}
  0x12   :  { %s6493_s25 = smov 256   ;;  %s6494_s26 = smov 16  }
  0x13   :  { %34 = dma.hbm_to_vmem [thread:$0]  %s6672_s1, 1024, %s29_s16, [#allocation6], %s6493_s25, %s6493_s25, %s6494_s26  }
  0x14   :  { %s6495_s29 = smov [#allocation2]   ;;  %s6496_s5 = smov [#allocation7]  }
  0x15   :  { %s19_s30 = sshll.u32 %s6495_s29, 4  ;;  %s40_s6 = sshll.u32 %s6496_s5, 4  ;;  %s20_s30 = int_to_ptr.vmem [resolvable:$true] %s19_s30  ;;  %s41_s6 = int_to_ptr.vmem [resolvable:$true] %s40_s6 }
  0x16   :  { %s6396_s9 = scalar_lea.hbm %s6671_s0, 32 }
  0x17   :  { %p6397_p8 = scmp.ne.s32.totalorder %s6671_s0, %s6396_s9  ;;  %p6400_p9 = scmp.lt.u32.totalorder %s6396_s9, %s6671_s0 }
  0x19   :  { %p6402_p10 = pnand %p6400_p9, %p6397_p8 }
  0x1b   :  { %6405 = shalt.err (!%p6402_p10)
}
  0x1c   :  { %s6406_s1 = scalar_lea.vmem %s20_s30, 32  ;;  %p6411_p12 = scmp.lt.s32.totalorder %s20_s30, %s20_s30 }
  0x1d   :  { %p6407_p11 = scmp.ne.s32.totalorder %s20_s30, %s6406_s1  ;;  %p6412_p13 = scmp.lt.s32.totalorder %s6406_s1, %s6406_s1 }
  0x1f   :  { %p6413_p0 = por %p6412_p13, %p6411_p12 }
  0x21   :  { %p6414_p1 = pnand %p6413_p0, %p6407_p11 }
  0x23   :  { %6417 = shalt.err (!%p6414_p1)
}
  0x24   :  { %22 = dma.hbm_to_vmem [thread:$0]  %s6671_s0, 32, %s20_s30, [#allocation3]  }
  0x25   :  { %s6418_s18 = scalar_lea.hbm %s6673_s2, 32768 }
  0x26   :  { %p6419_p2 = scmp.ne.s32.totalorder %s6673_s2, %s6418_s18  ;;  %p6422_p3 = scmp.lt.u32.totalorder %s6418_s18, %s6673_s2 }
  0x28   :  { %p6424_p4 = pnand %p6422_p3, %p6419_p2 }
  0x2a   :  { %6427 = shalt.err (!%p6424_p4)
}
  0x2b   :  { %s6428_s23 = scalar_lea.vmem %s41_s6, 32768  ;;  %p6433_p6 = scmp.lt.s32.totalorder %s41_s6, %s41_s6 }
  0x2c   :  { %p6429_p5 = scmp.ne.s32.totalorder %s41_s6, %s6428_s23  ;;  %p6434_p7 = scmp.lt.s32.totalorder %s6428_s23, %s6428_s23 }
  0x2e   :  { %p6435_p8 = por %p6434_p7, %p6433_p6 }
  0x30   :  { %p6436_p9 = pnand %p6435_p8, %p6429_p5 }
  0x32   :  { %6439 = shalt.err (!%p6436_p9)
}
  0x33   :  { %s6497_s0 = smov 512   ;;  %s6498_s24 = smov 32  }
  0x34   :  { %46 = dma.hbm_to_vmem [thread:$0]  %s6673_s2, 32768, %s41_s6, [#allocation6], %s6497_s0, %s6497_s0, %s6498_s24  }
  0x35   :  { %s6499_s27 = smov [#allocation8]   ;;  %s6440_s5 = scalar_lea.hbm %s6674_s3, 49152 }
  0x36   :  { %s52_s28 = sshll.u32 %s6499_s27, 4  ;;  %p6441_p10 = scmp.ne.s32.totalorder %s6674_s3, %s6440_s5  ;;  %s53_s28 = int_to_ptr.vmem [resolvable:$true] %s52_s28 }
  0x37   :  { %p6444_p11 = scmp.lt.u32.totalorder %s6440_s5, %s6674_s3 }
  0x39   :  { %p6446_p12 = pnand %p6444_p11, %p6441_p10 }
  0x3b   :  { %6449 = shalt.err (!%p6446_p12)
}
  0x3c   :  { %s6450_s11 = scalar_lea.vmem %s53_s28, 49152  ;;  %p6455_p0 = scmp.lt.s32.totalorder %s53_s28, %s53_s28 }
  0x3d   :  { %p6451_p13 = scmp.ne.s32.totalorder %s53_s28, %s6450_s11  ;;  %p6456_p1 = scmp.lt.s32.totalorder %s6450_s11, %s6450_s11 }
  0x3f   :  { %p6457_p2 = por %p6456_p1, %p6455_p0 }
  0x41   :  { %p6458_p3 = pnand %p6457_p2, %p6451_p13 }
  0x43   :  { %6461 = shalt.err (!%p6458_p3)
}
  0x44   :  { %s6500_s2 = smov 384   ;;  %s6501_s6 = smov 24  }
  0x45   :  { %58 = dma.hbm_to_vmem [thread:$0]  %s6674_s3, 49152, %s53_s28, [#allocation9], %s6500_s2, %s6500_s2, %s6501_s6  }
  0x46   :  { %6484 = dma.done.wait [#allocation3], 32  }
  0x47   :  { %6485 = vsyncadd [#allocation3], 4294967264 }
  0x48   :  { %6486 = dma.done.wait [#allocation6], 33792  }
  0x49   :  { %6487 = vsyncadd [#allocation6], 4294933504 }
  0x4a   :  { %6488 = dma.done.wait [#allocation9], 49152  }
  0x4b   :  { %6489 = vsyncadd [#allocation9], 4294918144  ;;  %v6502_v0 = vmov 0   ;;  %v5750_v1 = vld [vmem:[#allocation5 + $0x4] ss:$16 sps:$4 sm:$0xff]   ;;  %vm122_vm0 = vcmask 261120  }
  0x4c   :  { %158 = vmatprep.mubr.bf16.mxu0 %v6502_v0  ;;  %199 = vmatprep.mubr.bf16.mxu1 %v6502_v0  ;;  %v5752_v2 = vld [vmem:[#allocation5] ss:$16 sps:$4 sm:$0xff]   ;;  %v5753_v3 = vld [vmem:[#allocation5 + $0x24] ss:$16 sps:$4 sm:$0xff]   ;;  %v72_v5 = vld [vmem:[#allocation2] sm:$0x3] }
  0x4d   :  { %126 = vmatprep.subr.bf16.mxu0 %v5750_v1  ;;  %v5755_v4 = vld [vmem:[#allocation5 + $0x20] ss:$16 sps:$4 sm:$0xff]   ;;  %v5756_v6 = vld [vmem:[#allocation5 + $0xc] ss:$16 sps:$4 sm:$0xff]   ;;  %v5758_v7 = vld [vmem:[#allocation5 + $0x8] ss:$16 sps:$4 sm:$0xff]   ;;  %v73_v11 = vpack.c.bf16 %v72_v5, %v72_v5 }
  0x4e   :  { %127 = vmatpush1.bf16.msra.mxu0 %v5752_v2  ;;  %167 = vmatprep.subr.bf16.mxu1 %v5756_v6  ;;  %v5759_v8 = vld [vmem:[#allocation5 + $0x2c] ss:$16 sps:$4 sm:$0xff]   ;;  %v5761_v9 = vld [vmem:[#allocation5 + $0x28] ss:$16 sps:$4 sm:$0xff]   ;;  %v240_v10 = vld [vmem:[#allocation7] sm:$0xff]  ;;  %s6504_s3 = smov [#allocation10]  }
  0x4f   :  { %128 = vmatprep.subr.bf16.mxu0 %v5753_v3  ;;  %168 = vmatpush1.bf16.msra.mxu1 %v5758_v7  ;;  %v244_v12 = vld [vmem:[#allocation7 + $0x20] sm:$0xff]  ;;  %v242_v13 = vld [vmem:[#allocation7 + $0x10] sm:$0xff]  ;;  %s5011_s1 = sshll.u32 %s6504_s3, 4  ;;  %s5012_s1 = int_to_ptr.vmem [resolvable:$true] %s5011_s1 }
  0x50   :  { %v246_v14 = vld [vmem:[#allocation7 + $0x30] sm:$0xff]  ;;  %169 = vmatprep.subr.bf16.mxu1 %v5759_v8  ;;  %v5037_v15 = vcombine.high %v240_v10, %v244_v12  ;;  %v248_v19 = vld [vmem:[#allocation7 + $0x40] sm:$0xff]  ;;  %v5036_v23 = vcombine.low %v240_v10, %v244_v12  ;;  %s6462_s14 = scalar_lea.vmem %s5012_s1, 192  ;;  %p6467_p5 = scmp.lt.s32.totalorder %s5012_s1, %s5012_s1 }
  0x51   :  { %v250_v16 = vld [vmem:[#allocation7 + $0x50] sm:$0xff]  ;;  %v5040_v17 = vcombine.low %v242_v13, %v246_v14  ;;  %v5041_v18 = vcombine.high %v242_v13, %v246_v14  ;;  %v252_v20 = vld [vmem:[#allocation7 + $0x60] sm:$0xff]  ;;  %p6463_p4 = scmp.ne.s32.totalorder %s5012_s1, %s6462_s14  ;;  %p6468_p6 = scmp.lt.s32.totalorder %s6462_s14, %s6462_s14 }
  0x52   :  { %129 = vmatpush1.bf16.msra.mxu0 %v5755_v4  ;;  %v254_v21 = vld [vmem:[#allocation7 + $0x70] sm:$0xff]  ;;  %v5045_v26 = vcombine.high %v248_v19, %v252_v20  ;;  %v256_v28 = vld [vmem:[#allocation7 + $0x80] sm:$0xff]  ;;  %v5044_v31 = vcombine.low %v248_v19, %v252_v20 }
  0x53   :  { %v5049_v22 = vcombine.high %v250_v16, %v254_v21  ;;  %170 = vmatpush1.bf16.msra.mxu1 %v5761_v9  ;;  %v258_v24 = vld [vmem:[#allocation7 + $0x90] sm:$0xff]  ;;  %1940 = vmatprep.subr.bf16.mxu0 %v5041_v18  ;;  %v5048_v27 = vcombine.low %v250_v16, %v254_v21  ;;  %v260_v29 = vld [vmem:[#allocation7 + $0xa0] sm:$0xff]  ;;  %p6469_p7 = por %p6468_p6, %p6467_p5 }
  0x54   :  { %v262_v25 = vld [vmem:[#allocation7 + $0xb0] sm:$0xff]  ;;  %1776 = vmatprep.subr.bf16.mxu1 %v5037_v15  ;;  %v5053_v34 = vcombine.high %v256_v28, %v260_v29  ;;  %v264_v36 = vld [vmem:[#allocation7 + $0xc0] sm:$0xff]  ;;  %v5052_v39 = vcombine.low %v256_v28, %v260_v29 }
  0x55   :  { %5030 = vmatmul.mubr.msk.bf16.vlgmr.msra.gmra.mrb[0].mxu0 %vm122_vm0, %v73_v11  ;;  %v5057_v30 = vcombine.high %v258_v24, %v262_v25  ;;  %v266_v32 = vld [vmem:[#allocation7 + $0xd0] sm:$0xff]  ;;  %v5056_v35 = vcombine.low %v258_v24, %v262_v25  ;;  %v268_v37 = vld [vmem:[#allocation7 + $0xe0] sm:$0xff]  ;;  %p6470_p8 = pnand %p6469_p7, %p6463_p4 }
  0x56   :  { %1941 = vmatpush1.bf16.msra.mxu0 %v5040_v17  ;;  %5031 = vmatmul.mubr.msk.bf16.vlgmr.msra.gmra.mrb[0].mxu1 %vm122_vm0, %v73_v11  ;;  %v270_v33 = vld [vmem:[#allocation7 + $0xf0] sm:$0xff]  ;;  %v272_v40 = vld [vmem:[#allocation7 + $0x100] sm:$0xff]  ;;  %v5061_v44 = vcombine.high %v264_v36, %v268_v37  ;;  %v5060_v49 = vcombine.low %v264_v36, %v268_v37 }
  0x57   :  { %1942 = vmatprep.subr.bf16.mxu0 %v5049_v22  ;;  %1777 = vmatpush1.bf16.msra.mxu1 %v5036_v23  ;;  %v5065_v38 = vcombine.high %v266_v32, %v270_v33  ;;  %v276_v41 = vld [vmem:[#allocation7 + $0x120] sm:$0xff]  ;;  %v274_v42 = vld [vmem:[#allocation7 + $0x110] sm:$0xff]  ;;  %v5064_v45 = vcombine.low %v266_v32, %v270_v33 }
  0x58   :  { %1778 = vmatprep.subr.bf16.mxu1 %v5045_v26  ;;  %v278_v43 = vld [vmem:[#allocation7 + $0x130] sm:$0xff]  ;;  %v280_v50 = vld [vmem:[#allocation7 + $0x140] sm:$0xff]  ;;  %v5069_v52 = vcombine.high %v272_v40, %v276_v41  ;;  %v5068_v57 = vcombine.low %v272_v40, %v276_v41 }
  0x59   :  { %v282_v46 = vld [vmem:[#allocation7 + $0x150] sm:$0xff]  ;;  %v5073_v48 = vcombine.high %v274_v42, %v278_v43  ;;  %v284_v51 = vld [vmem:[#allocation7 + $0x160] sm:$0xff]  ;;  %v5072_v53 = vcombine.low %v274_v42, %v278_v43 }
  0x5a   :  { %1943 = vmatpush1.bf16.msra.mxu0 %v5048_v27  ;;  %v286_v47 = vld [vmem:[#allocation7 + $0x170] sm:$0xff]  ;;  %v288_v58 = vld [vmem:[#allocation7 + $0x180] sm:$0xff]  ;;  %v5077_v60 = vcombine.high %v280_v50, %v284_v51  ;;  %v5076_v1 = vcombine.low %v280_v50, %v284_v51 }
  0x5b   :  { %1944 = vmatprep.subr.bf16.mxu0 %v5057_v30  ;;  %1779 = vmatpush1.bf16.msra.mxu1 %v5044_v31  ;;  %v290_v54 = vld [vmem:[#allocation7 + $0x190] sm:$0xff]  ;;  %v5081_v56 = vcombine.high %v282_v46, %v286_v47  ;;  %v292_v59 = vld [vmem:[#allocation7 + $0x1a0] sm:$0xff]  ;;  %v5080_v61 = vcombine.low %v282_v46, %v286_v47 }
  0x5c   :  { %1780 = vmatprep.subr.bf16.mxu1 %v5053_v34  ;;  %v294_v55 = vld [vmem:[#allocation7 + $0x1b0] sm:$0xff]  ;;  %v296_v2 = vld [vmem:[#allocation7 + $0x1c0] sm:$0xff]  ;;  %v5085_v4 = vcombine.high %v288_v58, %v292_v59  ;;  %v5084_v9 = vcombine.low %v288_v58, %v292_v59 }
  0x5d   :  { %v298_v62 = vld [vmem:[#allocation7 + $0x1d0] sm:$0xff]  ;;  %v5089_v0 = vcombine.high %v290_v54, %v294_v55  ;;  %v300_v3 = vld [vmem:[#allocation7 + $0x1e0] sm:$0xff]  ;;  %v5088_v5 = vcombine.low %v290_v54, %v294_v55 }
  0x5e   :  { %1945 = vmatpush1.bf16.msra.mxu0 %v5056_v35  ;;  %v302_v63 = vld [vmem:[#allocation7 + $0x1f0] sm:$0xff]  ;;  %v304_v10 = vld [vmem:[#allocation7 + $0x200] sm:$0xff]  ;;  %v5093_v12 = vcombine.high %v296_v2, %v300_v3  ;;  %v5092_v17 = vcombine.low %v296_v2, %v300_v3 }
  0x5f   :  { %1946 = vmatprep.subr.bf16.mxu0 %v5065_v38  ;;  %1781 = vmatpush1.bf16.msra.mxu1 %v5052_v39  ;;  %v306_v6 = vld [vmem:[#allocation7 + $0x210] sm:$0xff]  ;;  %v5097_v8 = vcombine.high %v298_v62, %v302_v63  ;;  %v308_v11 = vld [vmem:[#allocation7 + $0x220] sm:$0xff]  ;;  %v5096_v13 = vcombine.low %v298_v62, %v302_v63 }
  0x60   :  { %1782 = vmatprep.subr.bf16.mxu1 %v5061_v44  ;;  %v310_v7 = vld [vmem:[#allocation7 + $0x230] sm:$0xff]  ;;  %v312_v18 = vld [vmem:[#allocation7 + $0x240] sm:$0xff]  ;;  %v5101_v20 = vcombine.high %v304_v10, %v308_v11  ;;  %v5100_v23 = vcombine.low %v304_v10, %v308_v11 }
  0x61   :  { %v314_v14 = vld [vmem:[#allocation7 + $0x250] sm:$0xff]  ;;  %v5105_v16 = vcombine.high %v306_v6, %v310_v7  ;;  %v316_v19 = vld [vmem:[#allocation7 + $0x260] sm:$0xff]  ;;  %v5104_v21 = vcombine.low %v306_v6, %v310_v7 }
  0x62   :  { %1947 = vmatpush1.bf16.msra.mxu0 %v5064_v45  ;;  %v318_v15 = vld [vmem:[#allocation7 + $0x270] sm:$0xff]  ;;  %v5109_v24 = vcombine.high %v312_v18, %v316_v19  ;;  %v5108_v26 = vcombine.low %v312_v18, %v316_v19  ;;  %v320_v27 = vld [vmem:[#allocation7 + $0x280] sm:$0xff] }
  0x63   :  { %1948 = vmatprep.subr.bf16.mxu0 %v5073_v48  ;;  %1783 = vmatpush1.bf16.msra.mxu1 %v5060_v49  ;;  %v5113_v22 = vcombine.high %v314_v14, %v318_v15  ;;  %v5112_v25 = vcombine.low %v314_v14, %v318_v15  ;;  %v324_v28 = vld [vmem:[#allocation7 + $0x2a0] sm:$0xff]  ;;  %v322_v29 = vld [vmem:[#allocation7 + $0x290] sm:$0xff] }
  0x64   :  { %1784 = vmatprep.subr.bf16.mxu1 %v5069_v52  ;;  %v5117_v30 = vcombine.high %v320_v27, %v324_v28  ;;  %v326_v31 = vld [vmem:[#allocation7 + $0x2b0] sm:$0xff]  ;;  %v5116_v32 = vcombine.low %v320_v27, %v324_v28  ;;  %v328_v35 = vld [vmem:[#allocation7 + $0x2c0] sm:$0xff] }
  0x65   :  { %v5120_v33 = vcombine.low %v322_v29, %v326_v31  ;;  %v5121_v34 = vcombine.high %v322_v29, %v326_v31  ;;  %v332_v36 = vld [vmem:[#allocation7 + $0x2e0] sm:$0xff]  ;;  %v330_v37 = vld [vmem:[#allocation7 + $0x2d0] sm:$0xff] }
  0x66   :  { %1949 = vmatpush1.bf16.msra.mxu0 %v5072_v53  ;;  %v5125_v38 = vcombine.high %v328_v35, %v332_v36  ;;  %v334_v39 = vld [vmem:[#allocation7 + $0x2f0] sm:$0xff]  ;;  %v5124_v40 = vcombine.low %v328_v35, %v332_v36  ;;  %v336_v43 = vld [vmem:[#allocation7 + $0x300] sm:$0xff] }
  0x67   :  { %1950 = vmatprep.subr.bf16.mxu0 %v5081_v56  ;;  %1785 = vmatpush1.bf16.msra.mxu1 %v5068_v57  ;;  %v5128_v41 = vcombine.low %v330_v37, %v334_v39  ;;  %v5129_v42 = vcombine.high %v330_v37, %v334_v39  ;;  %v340_v44 = vld [vmem:[#allocation7 + $0x320] sm:$0xff]  ;;  %v338_v45 = vld [vmem:[#allocation7 + $0x310] sm:$0xff] }
  0x68   :  { %1786 = vmatprep.subr.bf16.mxu1 %v5077_v60  ;;  %v5133_v46 = vcombine.high %v336_v43, %v340_v44  ;;  %v342_v47 = vld [vmem:[#allocation7 + $0x330] sm:$0xff]  ;;  %v5132_v48 = vcombine.low %v336_v43, %v340_v44  ;;  %v344_v51 = vld [vmem:[#allocation7 + $0x340] sm:$0xff] }
  0x69   :  { %v5136_v49 = vcombine.low %v338_v45, %v342_v47  ;;  %v5137_v50 = vcombine.high %v338_v45, %v342_v47  ;;  %v348_v52 = vld [vmem:[#allocation7 + $0x360] sm:$0xff]  ;;  %v346_v53 = vld [vmem:[#allocation7 + $0x350] sm:$0xff] }
  0x6a   :  { %1951 = vmatpush1.bf16.msra.mxu0 %v5080_v61  ;;  %v5141_v54 = vcombine.high %v344_v51, %v348_v52  ;;  %v350_v55 = vld [vmem:[#allocation7 + $0x370] sm:$0xff]  ;;  %v5140_v56 = vcombine.low %v344_v51, %v348_v52  ;;  %v352_v59 = vld [vmem:[#allocation7 + $0x380] sm:$0xff] }
  0x6b   :  { %1952 = vmatprep.subr.bf16.mxu0 %v5089_v0  ;;  %1787 = vmatpush1.bf16.msra.mxu1 %v5076_v1  ;;  %v5144_v57 = vcombine.low %v346_v53, %v350_v55  ;;  %v5145_v58 = vcombine.high %v346_v53, %v350_v55  ;;  %v356_v60 = vld [vmem:[#allocation7 + $0x3a0] sm:$0xff]  ;;  %v354_v61 = vld [vmem:[#allocation7 + $0x390] sm:$0xff] }
  0x6c   :  { %1788 = vmatprep.subr.bf16.mxu1 %v5085_v4  ;;  %v5149_v62 = vcombine.high %v352_v59, %v356_v60  ;;  %v358_v63 = vld [vmem:[#allocation7 + $0x3b0] sm:$0xff]  ;;  %v5148_v0 = vcombine.low %v352_v59, %v356_v60  ;;  %v360_v3 = vld [vmem:[#allocation7 + $0x3c0] sm:$0xff] }
  0x6d   :  { %v5152_v1 = vcombine.low %v354_v61, %v358_v63  ;;  %v5153_v2 = vcombine.high %v354_v61, %v358_v63  ;;  %v364_v4 = vld [vmem:[#allocation7 + $0x3e0] sm:$0xff]  ;;  %v366_v7 = vld [vmem:[#allocation7 + $0x3f0] sm:$0xff] }
  0x6e   :  { %1953 = vmatpush1.bf16.msra.mxu0 %v5088_v5  ;;  %v362_v5 = vld [vmem:[#allocation7 + $0x3d0] sm:$0xff]  ;;  %v5157_v6 = vcombine.high %v360_v3, %v364_v4  ;;  %v368_v11 = vld [vmem:[#allocation7 + $0x400] sm:$0xff] }
  0x6f   :  { %1954 = vmatprep.subr.bf16.mxu0 %v5097_v8  ;;  %1789 = vmatpush1.bf16.msra.mxu1 %v5084_v9  ;;  %v5156_v8 = vcombine.low %v360_v3, %v364_v4  ;;  %v5160_v9 = vcombine.low %v362_v5, %v366_v7  ;;  %v5161_v10 = vcombine.high %v362_v5, %v366_v7  ;;  %v374_v15 = vld [vmem:[#allocation7 + $0x430] sm:$0xff]  ;;  %v384_v52 = vld [vmem:[#allocation7 + $0x480] sm:$0xff] }
  0x70   :  { %1790 = vmatprep.subr.bf16.mxu1 %v5093_v12  ;;  %v372_v12 = vld [vmem:[#allocation7 + $0x420] sm:$0xff]  ;;  %v378_v44 = vld [vmem:[#allocation7 + $0x450] sm:$0xff] }
  0x71   :  { %v5165_v14 = vcombine.high %v368_v11, %v372_v12  ;;  %v382_v45 = vld [vmem:[#allocation7 + $0x470] sm:$0xff]  ;;  %v396_v63 = vld [vmem:[#allocation7 + $0x4e0] sm:$0xff] }
  0x72   :  { %1955 = vmatpush1.bf16.msra.mxu0 %v5096_v13  ;;  %v370_v13 = vld [vmem:[#allocation7 + $0x410] sm:$0xff]  ;;  %v5177_v51 = vcombine.high %v378_v44, %v382_v45  ;;  %v5176_v59 = vcombine.low %v378_v44, %v382_v45  ;;  %v404_v7 = vld [vmem:[#allocation7 + $0x520] sm:$0xff] }
  0x73   :  { %1956 = vmatprep.subr.bf16.mxu0 %v5105_v16  ;;  %1791 = vmatpush1.bf16.msra.mxu1 %v5092_v17  ;;  %v5164_v16 = vcombine.low %v368_v11, %v372_v12  ;;  %v5168_v17 = vcombine.low %v370_v13, %v374_v15  ;;  %v5169_v18 = vcombine.high %v370_v13, %v374_v15  ;;  %v386_v55 = vld [vmem:[#allocation7 + $0x490] sm:$0xff]  ;;  %v412_v15 = vld [vmem:[#allocation7 + $0x560] sm:$0xff] }
  0x74   :  { %1792 = vmatprep.subr.bf16.mxu1 %v5101_v20 }
  0x76   :  { %1957 = vmatpush1.bf16.msra.mxu0 %v5104_v21 }
  0x77   :  { %1958 = vmatprep.subr.bf16.mxu0 %v5113_v22  ;;  %1793 = vmatpush1.bf16.msra.mxu1 %v5100_v23 }
  0x78   :  { %1794 = vmatprep.subr.bf16.mxu1 %v5109_v24 }
  0x7a   :  { %1959 = vmatpush1.bf16.msra.mxu0 %v5112_v25 }
  0x7b   :  { %1795 = vmatpush1.bf16.msra.mxu1 %v5108_v26  ;;  %1960 = vmatprep.subr.bf16.mxu0 %v5121_v34 }
  0x7c   :  { %1796 = vmatprep.subr.bf16.mxu1 %v5117_v30 }
  0x7e   :  { %1961 = vmatpush1.bf16.msra.mxu0 %v5120_v33 }
  0x7f   :  { %1797 = vmatpush1.bf16.msra.mxu1 %v5116_v32  ;;  %1962 = vmatprep.subr.bf16.mxu0 %v5129_v42  ;;  %v380_v42 = vld [vmem:[#allocation7 + $0x460] sm:$0xff] }
  0x80   :  { %1798 = vmatprep.subr.bf16.mxu1 %v5125_v38 }
  0x82   :  { %1963 = vmatpush1.bf16.msra.mxu0 %v5128_v41  ;;  %v376_v41 = vld [vmem:[#allocation7 + $0x440] sm:$0xff] }
  0x83   :  { %1799 = vmatpush1.bf16.msra.mxu1 %v5124_v40  ;;  %1964 = vmatprep.subr.bf16.mxu0 %v5137_v50  ;;  %v5173_v50 = vcombine.high %v376_v41, %v380_v42 }
  0x84   :  { %1800 = vmatprep.subr.bf16.mxu1 %v5133_v46 }
  0x86   :  { %1965 = vmatpush1.bf16.msra.mxu0 %v5136_v49 }
  0x87   :  { %1801 = vmatpush1.bf16.msra.mxu1 %v5132_v48  ;;  %1966 = vmatprep.subr.bf16.mxu0 %v5145_v58  ;;  %v5172_v58 = vcombine.low %v376_v41, %v380_v42  ;;  %v434_v41 = vld [vmem:[#allocation7 + $0x610] sm:$0xff] }
  0x88   :  { %1802 = vmatprep.subr.bf16.mxu1 %v5141_v54  ;;  %v388_v54 = vld [vmem:[#allocation7 + $0x4a0] sm:$0xff]  ;;  %v438_v42 = vld [vmem:[#allocation7 + $0x630] sm:$0xff] }
  0x89   :  { %v5181_v60 = vcombine.high %v384_v52, %v388_v54 }
  0x8a   :  { %1967 = vmatpush1.bf16.msra.mxu0 %v5144_v57 }
  0x8b   :  { %1803 = vmatpush1.bf16.msra.mxu1 %v5140_v56  ;;  %1968 = vmatprep.subr.bf16.mxu0 %v5153_v2  ;;  %v390_v56 = vld [vmem:[#allocation7 + $0x4b0] sm:$0xff]  ;;  %v5180_v2 = vcombine.low %v384_v52, %v388_v54  ;;  %v5232_v54 = vcombine.low %v434_v41, %v438_v42 }
  0x8c   :  { %1804 = vmatprep.subr.bf16.mxu1 %v5149_v62  ;;  %v5185_v61 = vcombine.high %v386_v55, %v390_v56  ;;  %v392_v62 = vld [vmem:[#allocation7 + $0x4c0] sm:$0xff]  ;;  %v5184_v3 = vcombine.low %v386_v55, %v390_v56  ;;  %v446_v52 = vld [vmem:[#allocation7 + $0x670] sm:$0xff] }
  0x8d   :  { %v5189_v4 = vcombine.high %v392_v62, %v396_v63 }
  0x8e   :  { %1969 = vmatpush1.bf16.msra.mxu0 %v5152_v1  ;;  %v398_v1 = vld [vmem:[#allocation7 + $0x4f0] sm:$0xff] }
  0x8f   :  { %1805 = vmatpush1.bf16.msra.mxu1 %v5148_v0  ;;  %1970 = vmatprep.subr.bf16.mxu0 %v5161_v10  ;;  %v394_v0 = vld [vmem:[#allocation7 + $0x4d0] sm:$0xff]  ;;  %v5188_v10 = vcombine.low %v392_v62, %v396_v63 }
  0x90   :  { %1806 = vmatprep.subr.bf16.mxu1 %v5157_v6  ;;  %v5193_v5 = vcombine.high %v394_v0, %v398_v1  ;;  %v400_v6 = vld [vmem:[#allocation7 + $0x500] sm:$0xff]  ;;  %v5192_v11 = vcombine.low %v394_v0, %v398_v1  ;;  %v454_v62 = vld [vmem:[#allocation7 + $0x6b0] sm:$0xff] }
  0x91   :  { %v5197_v12 = vcombine.high %v400_v6, %v404_v7 }
  0x92   :  { %1971 = vmatpush1.bf16.msra.mxu0 %v5160_v9  ;;  %v406_v9 = vld [vmem:[#allocation7 + $0x530] sm:$0xff] }
  0x93   :  { %1807 = vmatpush1.bf16.msra.mxu1 %v5156_v8  ;;  %1981 = vmatprep.subr.bf16.mxu0 %v5169_v18  ;;  %v402_v8 = vld [vmem:[#allocation7 + $0x510] sm:$0xff]  ;;  %v5196_v18 = vcombine.low %v400_v6, %v404_v7 }
  0x94   :  { %1817 = vmatprep.subr.bf16.mxu1 %v5165_v14  ;;  %v5201_v13 = vcombine.high %v402_v8, %v406_v9  ;;  %v408_v14 = vld [vmem:[#allocation7 + $0x540] sm:$0xff]  ;;  %v462_v6 = vld [vmem:[#allocation7 + $0x6f0] sm:$0xff] }
 0x128   :  { %v160_v19 = vpop.f32.mrb[0].mxu0 }
 0x129   :  { %v212_v20 = vmul.f32 1.442695, %v160_v19  ;;  %v162_v21 = vpop.f32.mrb[1].mxu0  ;;  %v6580_v25 = vpop.f32.mrb[0].mxu1  ;;  %vm208_vm1 = vcmp.gt.f32.partialorder %v160_v19, 0.0 }
 0x12a   :  { %v214_v22 = vmul.f32 1.442695, %v162_v21  ;;  %v164_v23 = vpop.f32.mrb[2].mxu0  ;;  %v203_v26 = vpop.f32.mrb[1].mxu1  ;;  %vm209_vm2 = vcmp.gt.f32.partialorder %v162_v21, 0.0  ;;  %vm210_vm4 = vcmp.gt.f32.partialorder %v6580_v25, 0.0 }
 0x12b   :  { %6338 = vpow2.f32 %v212_v20  ;;  %v165_v24 = vpop.f32.mrb[3].mxu0  ;;  %v218_v27 = vmul.f32 1.442695, %v203_v26  ;;  %v205_v28 = vpop.f32.mrb[2].mxu1  ;;  %vm211_vm3 = vcmp.gt.f32.partialorder %v203_v26, 0.0  ;;  %v5205_v20 = vcombine.high %v408_v14, %v412_v15  ;;  %v420_v23 = vld [vmem:[#allocation7 + $0x5a0] sm:$0xff] }
 0x12c   :  { %6340 = vpow2.f32 %v214_v22  ;;  %v206_v29 = vpop.f32.mrb[3].mxu1  ;;  %v416_v22 = vld [vmem:[#allocation7 + $0x580] sm:$0xff]  ;;  %v418_v24 = vld [vmem:[#allocation7 + $0x590] sm:$0xff]  ;;  %v216_v55 = vmul.f32 1.442695, %v6580_v25 }
 0x12d   :  { %6342 = vpow2.f32 %v218_v27  ;;  %v5204_v27 = vcombine.low %v408_v14, %v412_v15  ;;  %v5213_v29 = vcombine.high %v416_v22, %v420_v23  ;;  %v470_v14 = vld [vmem:[#allocation7 + $0x730] sm:$0xff] }
 0x12e   :  { %6344 = vpow2.f32 %v216_v55 }
 0x135   :  { %v6339_v30 = vpop.eup %6338 }
 0x136   :  { %v6341_v31 = vpop.eup %6340  ;;  %v5032_v32 = vadd.f32 -1.0, %v6339_v30 }
 0x137   :  { %v5033_v33 = vadd.f32 -1.0, %v6341_v31  ;;  %v6343_v35 = vpop.eup %6342  ;;  %v424_v31 = vld [vmem:[#allocation7 + $0x5c0] sm:$0xff] }
 0x138   :  { %v224_v34 = vmul.f32 1.6732632, %v5032_v32  ;;  %v5035_v38 = vadd.f32 -1.0, %v6343_v35  ;;  %v428_v32 = vld [vmem:[#allocation7 + $0x5e0] sm:$0xff]  ;;  %v5212_v35 = vcombine.low %v416_v22, %v420_v23  ;;  %v478_v22 = vld [vmem:[#allocation7 + $0x770] sm:$0xff]  ;;  %v6345_v23 = vpop.eup %6344 }
 0x139   :  { %v225_v36 = vmul.f32 1.6732632, %v5033_v33  ;;  %v426_v33 = vld [vmem:[#allocation7 + $0x5d0] sm:$0xff] }
 0x13a   :  { %v228_v37 = vsel %vm208_vm1, %v160_v19, %v224_v34  ;;  %v227_v46 = vmul.f32 1.6732632, %v5035_v38  ;;  %v5200_v19 = vcombine.low %v402_v8, %v406_v9  ;;  %v430_v34 = vld [vmem:[#allocation7 + $0x5f0] sm:$0xff] }
 0x13b   :  { %v232_v39 = vmul.f32 1.050701, %v228_v37  ;;  %v229_v40 = vsel %vm209_vm2, %v162_v21, %v225_v36  ;;  %v5221_v37 = vcombine.high %v424_v31, %v428_v32  ;;  %v5225_v38 = vcombine.high %v426_v33, %v430_v34 }
 0x13c   :  { %v233_v43 = vmul.f32 1.050701, %v229_v40  ;;  %v231_v48 = vsel %vm211_vm3, %v203_v26, %v227_v46  ;;  %v422_v26 = vld [vmem:[#allocation7 + $0x5b0] sm:$0xff]  ;;  %v436_v40 = vld [vmem:[#allocation7 + $0x620] sm:$0xff]  ;;  %v5224_v44 = vcombine.low %v426_v33, %v430_v34  ;;  %v5233_v46 = vcombine.high %v434_v41, %v438_v42 }
 0x13d   :  { %v6584_v49 = vpack.c.bf16 %v232_v39, %v232_v39  ;;  %v235_v53 = vmul.f32 1.050701, %v231_v48  ;;  %v5217_v30 = vcombine.high %v418_v24, %v422_v26  ;;  %v5216_v36 = vcombine.low %v418_v24, %v422_v26  ;;  %v432_v39 = vld [vmem:[#allocation7 + $0x600] sm:$0xff]  ;;  %v486_v33 = vld [vmem:[#allocation7 + $0x7b0] sm:$0xff] }
 0x13e   :  { %v6582_v47 = vpack.c.bf16 %v233_v43, %v233_v43  ;;  %v5220_v43 = vcombine.low %v424_v31, %v428_v32  ;;  %v5229_v45 = vcombine.high %v432_v39, %v436_v40  ;;  %v440_v48 = vld [vmem:[#allocation7 + $0x640] sm:$0xff]  ;;  %v482_v32 = vld [vmem:[#allocation7 + $0x790] sm:$0xff] }
 0x13f   :  { %v6590_v57 = vpack.c.bf16 %v235_v53, %v235_v53  ;;  %v5228_v53 = vcombine.low %v432_v39, %v436_v40  ;;  %v484_v31 = vld [vmem:[#allocation7 + $0x7a0] sm:$0xff]  ;;  %v490_v41 = vld [vmem:[#allocation7 + $0x7d0] sm:$0xff] }
 0x140   :  { %1808 = vmatprep.mubr.bf16.mxu1 %v6582_v47  ;;  %1972 = vmatprep.mubr.bf16.mxu0 %v6582_v47  ;;  %v492_v40 = vld [vmem:[#allocation7 + $0x7e0] sm:$0xff]  ;;  %v494_v42 = vld [vmem:[#allocation7 + $0x7f0] sm:$0xff] }
 0x141   :  { %1809 = vmatmul.mubr.bf16.vlgmr.msra.gmra.mrb[4].mxu1 %v6584_v49  ;;  %1973 = vmatmul.mubr.bf16.vlgmr.msra.gmra.mrb[4].mxu0 %v6584_v49 }
 0x142   :  { %1818 = vmatpush1.bf16.msra.mxu1 %v5164_v16  ;;  %1982 = vmatpush1.bf16.msra.mxu0 %v5168_v17  ;;  %v410_v16 = vld [vmem:[#allocation7 + $0x550] sm:$0xff] }
 0x143   :  { %1819 = vmatprep.subr.bf16.mxu1 %v5173_v50  ;;  %1983 = vmatprep.subr.bf16.mxu0 %v5177_v51  ;;  %v414_v17 = vld [vmem:[#allocation7 + $0x570] sm:$0xff]  ;;  %v444_v50 = vld [vmem:[#allocation7 + $0x660] sm:$0xff] }
 0x144   :  { %1849 = vmatprep.mubr.bf16.mxu1 %v6590_v57  ;;  %2013 = vmatprep.mubr.bf16.mxu0 %v6590_v57  ;;  %v5209_v21 = vcombine.high %v410_v16, %v414_v17  ;;  %v5208_v28 = vcombine.low %v410_v16, %v414_v17  ;;  %v442_v51 = vld [vmem:[#allocation7 + $0x650] sm:$0xff]  ;;  %v5237_v56 = vcombine.high %v440_v48, %v444_v50 }
 0x145   :  { %v5236_v63 = vcombine.low %v440_v48, %v444_v50  ;;  %v5240_v0 = vcombine.low %v442_v51, %v446_v52  ;;  %v241_v50 = vld [vmem:[#allocation7 + $0x8] sm:$0xff] }
 0x146   :  { %1820 = vmatpush1.bf16.msra.mxu1 %v5172_v58  ;;  %1984 = vmatpush1.bf16.msra.mxu0 %v5176_v59  ;;  %v5241_v58 = vcombine.high %v442_v51, %v446_v52  ;;  %v448_v59 = vld [vmem:[#allocation7 + $0x680] sm:$0xff]  ;;  %v245_v51 = vld [vmem:[#allocation7 + $0x28] sm:$0xff] }
 0x147   :  { %1821 = vmatprep.subr.bf16.mxu1 %v5181_v60  ;;  %1985 = vmatprep.subr.bf16.mxu0 %v5185_v61  ;;  %v452_v60 = vld [vmem:[#allocation7 + $0x6a0] sm:$0xff]  ;;  %v450_v61 = vld [vmem:[#allocation7 + $0x690] sm:$0xff]  ;;  %v5039_v55 = vcombine.high %v241_v50, %v245_v51 }
 0x148   :  { %v5245_v1 = vcombine.high %v448_v59, %v452_v60  ;;  %v5244_v7 = vcombine.low %v448_v59, %v452_v60  ;;  %v5248_v8 = vcombine.low %v450_v61, %v454_v62  ;;  %v5038_v59 = vcombine.low %v241_v50, %v245_v51  ;;  %v5765_v50 = vld [vmem:[#allocation8 + $0x30] ss:$24 sps:$4 sm:$0xff]   ;;  %v5767_v51 = vld [vmem:[#allocation8 + $0x34] ss:$24 sps:$4 sm:$0xff]  }
 0x14a   :  { %1822 = vmatpush1.bf16.msra.mxu1 %v5180_v2  ;;  %1986 = vmatpush1.bf16.msra.mxu0 %v5184_v3  ;;  %v5249_v2 = vcombine.high %v450_v61, %v454_v62  ;;  %v456_v3 = vld [vmem:[#allocation7 + $0x6c0] sm:$0xff]  ;;  %v261_v62 = vld [vmem:[#allocation7 + $0xa8] sm:$0xff] }
 0x14b   :  { %1823 = vmatprep.subr.bf16.mxu1 %v5189_v4  ;;  %1987 = vmatprep.subr.bf16.mxu0 %v5193_v5  ;;  %v460_v4 = vld [vmem:[#allocation7 + $0x6e0] sm:$0xff]  ;;  %v458_v5 = vld [vmem:[#allocation7 + $0x6d0] sm:$0xff] }
 0x14c   :  { %v5253_v9 = vcombine.high %v456_v3, %v460_v4  ;;  %v5252_v15 = vcombine.low %v456_v3, %v460_v4  ;;  %v5256_v16 = vcombine.low %v458_v5, %v462_v6 }
 0x14e   :  { %1824 = vmatpush1.bf16.msra.mxu1 %v5188_v10  ;;  %1988 = vmatpush1.bf16.msra.mxu0 %v5192_v11  ;;  %v5257_v10 = vcombine.high %v458_v5, %v462_v6  ;;  %v464_v11 = vld [vmem:[#allocation7 + $0x700] sm:$0xff]  ;;  %v273_v5 = vld [vmem:[#allocation7 + $0x108] sm:$0xff] }
 0x14f   :  { %1825 = vmatprep.subr.bf16.mxu1 %v5197_v12  ;;  %1989 = vmatprep.subr.bf16.mxu0 %v5201_v13  ;;  %v468_v12 = vld [vmem:[#allocation7 + $0x720] sm:$0xff]  ;;  %v466_v13 = vld [vmem:[#allocation7 + $0x710] sm:$0xff]  ;;  %v277_v6 = vld [vmem:[#allocation7 + $0x128] sm:$0xff] }
 0x150   :  { %v5261_v17 = vcombine.high %v464_v11, %v468_v12  ;;  %v5260_v24 = vcombine.low %v464_v11, %v468_v12  ;;  %v5264_v26 = vcombine.low %v466_v13, %v470_v14  ;;  %v5070_v11 = vcombine.low %v273_v5, %v277_v6 }
 0x152   :  { %1826 = vmatpush1.bf16.msra.mxu1 %v5196_v18  ;;  %1990 = vmatpush1.bf16.msra.mxu0 %v5200_v19  ;;  %v5265_v18 = vcombine.high %v466_v13, %v470_v14  ;;  %v472_v19 = vld [vmem:[#allocation7 + $0x740] sm:$0xff]  ;;  %v289_v13 = vld [vmem:[#allocation7 + $0x188] sm:$0xff] }
 0x153   :  { %1827 = vmatprep.subr.bf16.mxu1 %v5205_v20  ;;  %1991 = vmatprep.subr.bf16.mxu0 %v5209_v21  ;;  %v476_v20 = vld [vmem:[#allocation7 + $0x760] sm:$0xff]  ;;  %v474_v21 = vld [vmem:[#allocation7 + $0x750] sm:$0xff]  ;;  %v293_v14 = vld [vmem:[#allocation7 + $0x1a8] sm:$0xff] }
 0x154   :  { %v5268_v34 = vcombine.low %v472_v19, %v476_v20 }
 0x156   :  { %1828 = vmatpush1.bf16.msra.mxu1 %v5204_v27  ;;  %1992 = vmatpush1.bf16.msra.mxu0 %v5208_v28  ;;  %v5269_v27 = vcombine.high %v472_v19, %v476_v20  ;;  %v5273_v28 = vcombine.high %v474_v21, %v478_v22  ;;  %v5086_v19 = vcombine.low %v289_v13, %v293_v14 }
 0x157   :  { %1829 = vmatprep.subr.bf16.mxu1 %v5213_v29  ;;  %1993 = vmatprep.subr.bf16.mxu0 %v5217_v30  ;;  %v480_v29 = vld [vmem:[#allocation7 + $0x780] sm:$0xff]  ;;  %v5034_v30 = vadd.f32 -1.0, %v6345_v23 }
 0x159   :  { %v226_v39 = vmul.f32 1.6732632, %v5034_v30  ;;  %v321_v30 = vld [vmem:[#allocation7 + $0x288] sm:$0xff] }
 0x15a   :  { %1830 = vmatpush1.bf16.msra.mxu1 %v5212_v35  ;;  %1994 = vmatpush1.bf16.msra.mxu0 %v5216_v36  ;;  %v5272_v35 = vcombine.low %v474_v21, %v478_v22  ;;  %v5277_v36 = vcombine.high %v480_v29, %v484_v31  ;;  %v305_v21 = vld [vmem:[#allocation7 + $0x208] sm:$0xff] }
 0x15b   :  { %1831 = vmatprep.subr.bf16.mxu1 %v5221_v37  ;;  %1995 = vmatprep.subr.bf16.mxu0 %v5225_v38  ;;  %v5281_v37 = vcombine.high %v482_v32, %v486_v33  ;;  %v488_v38 = vld [vmem:[#allocation7 + $0x7c0] sm:$0xff]  ;;  %v230_v48 = vsel %vm210_vm4, %v6580_v25, %v226_v39  ;;  %v257_v25 = vld [vmem:[#allocation7 + $0x88] sm:$0xff] }
 0x15c   :  { %v5284_v52 = vcombine.low %v488_v38, %v492_v40  ;;  %v5054_v3 = vcombine.low %v257_v25, %v261_v62  ;;  %v309_v22 = vld [vmem:[#allocation7 + $0x228] sm:$0xff] }
 0x15d   :  { %v341_v39 = vld [vmem:[#allocation7 + $0x328] sm:$0xff] }
 0x15e   :  { %1832 = vmatpush1.bf16.msra.mxu1 %v5220_v43  ;;  %1996 = vmatpush1.bf16.msra.mxu0 %v5224_v44  ;;  %v5276_v43 = vcombine.low %v480_v29, %v484_v31  ;;  %v5280_v44 = vcombine.low %v482_v32, %v486_v33  ;;  %v325_v31 = vld [vmem:[#allocation7 + $0x2a8] sm:$0xff] }
 0x15f   :  { %1833 = vmatprep.subr.bf16.mxu1 %v5229_v45  ;;  %1997 = vmatprep.subr.bf16.mxu0 %v5233_v46  ;;  %v5285_v45 = vcombine.high %v488_v38, %v492_v40  ;;  %v5289_v46 = vcombine.high %v490_v41, %v494_v42  ;;  %v5119_v33 = vcombine.high %v321_v30, %v325_v31  ;;  %v337_v38 = vld [vmem:[#allocation7 + $0x308] sm:$0xff] }
 0x162   :  { %1834 = vmatpush1.bf16.msra.mxu1 %v5228_v53  ;;  %1998 = vmatpush1.bf16.msra.mxu0 %v5232_v54  ;;  %v5288_v53 = vcombine.low %v490_v41, %v494_v42  ;;  %v234_v54 = vmul.f32 1.050701, %v230_v48  ;;  %v5135_v41 = vcombine.high %v337_v38, %v341_v39  ;;  %v5762_v42 = vld [vmem:[#allocation8] ss:$24 sps:$4 sm:$0xff]  }
 0x163   :  { %1835 = vmatprep.subr.bf16.mxu1 %v5237_v56  ;;  %1999 = vmatprep.subr.bf16.mxu0 %v5241_v58  ;;  %v249_v56 = vld [vmem:[#allocation7 + $0x48] sm:$0xff] }
 0x164   :  { %v253_v58 = vld [vmem:[#allocation7 + $0x68] sm:$0xff]  ;;  %v6597_v60 = vpack.c.bf16 %v234_v54, %v234_v54 }
 0x165   :  { %v5047_v61 = vcombine.high %v249_v56, %v253_v58 }
 0x166   :  { %1836 = vmatpush1.bf16.msra.mxu1 %v5236_v63  ;;  %2000 = vmatpush1.bf16.msra.mxu0 %v5240_v0  ;;  %v5046_v63 = vcombine.low %v249_v56, %v253_v58  ;;  %v5055_v0 = vcombine.high %v257_v25, %v261_v62  ;;  %v5768_v56 = vld [vmem:[#allocation8 + $0x60] ss:$24 sps:$4 sm:$0xff]   ;;  %v5770_v58 = vld [vmem:[#allocation8 + $0x64] ss:$24 sps:$4 sm:$0xff]  }
 0x167   :  { %1837 = vmatprep.subr.bf16.mxu1 %v5245_v1  ;;  %2001 = vmatprep.subr.bf16.mxu0 %v5249_v2  ;;  %v265_v1 = vld [vmem:[#allocation7 + $0xc8] sm:$0xff] }
 0x168   :  { %v269_v2 = vld [vmem:[#allocation7 + $0xe8] sm:$0xff] }
 0x169   :  { %v5063_v4 = vcombine.high %v265_v1, %v269_v2 }
 0x16a   :  { %1838 = vmatpush1.bf16.msra.mxu1 %v5244_v7  ;;  %2002 = vmatpush1.bf16.msra.mxu0 %v5248_v8  ;;  %v5062_v7 = vcombine.low %v265_v1, %v269_v2  ;;  %v5071_v8 = vcombine.high %v273_v5, %v277_v6  ;;  %v369_v1 = vld [vmem:[#allocation7 + $0x408] sm:$0xff]  ;;  %v5774_v5 = vld [vmem:[#allocation8 + $0xc0] ss:$24 sps:$4 sm:$0xff]   ;;  %v5776_v6 = vld [vmem:[#allocation8 + $0xc4] ss:$24 sps:$4 sm:$0xff]  }
 0x16b   :  { %1839 = vmatprep.subr.bf16.mxu1 %v5253_v9  ;;  %2003 = vmatprep.subr.bf16.mxu0 %v5257_v10  ;;  %v281_v9 = vld [vmem:[#allocation7 + $0x148] sm:$0xff] }
 0x16c   :  { %v285_v10 = vld [vmem:[#allocation7 + $0x168] sm:$0xff] }
 0x16d   :  { %v5079_v12 = vcombine.high %v281_v9, %v285_v10  ;;  %v373_v2 = vld [vmem:[#allocation7 + $0x428] sm:$0xff] }
 0x16e   :  { %1840 = vmatpush1.bf16.msra.mxu1 %v5252_v15  ;;  %2004 = vmatpush1.bf16.msra.mxu0 %v5256_v16  ;;  %v5078_v15 = vcombine.low %v281_v9, %v285_v10  ;;  %v5087_v16 = vcombine.high %v289_v13, %v293_v14  ;;  %v5166_v9 = vcombine.low %v369_v1, %v373_v2  ;;  %v389_v13 = vld [vmem:[#allocation7 + $0x4a8] sm:$0xff] }
 0x16f   :  { %1841 = vmatprep.subr.bf16.mxu1 %v5261_v17  ;;  %2005 = vmatprep.subr.bf16.mxu0 %v5265_v18  ;;  %v297_v17 = vld [vmem:[#allocation7 + $0x1c8] sm:$0xff] }
 0x170   :  { %v301_v18 = vld [vmem:[#allocation7 + $0x1e8] sm:$0xff] }
 0x171   :  { %v5095_v20 = vcombine.high %v297_v17, %v301_v18  ;;  %v5094_v23 = vcombine.low %v297_v17, %v301_v18  ;;  %v5777_v14 = vld [vmem:[#allocation8 + $0xf0] ss:$24 sps:$4 sm:$0xff]   ;;  %v5780_v17 = vld [vmem:[#allocation8 + $0x120] ss:$24 sps:$4 sm:$0xff]   ;;  %v5782_v18 = vld [vmem:[#allocation8 + $0x124] ss:$24 sps:$4 sm:$0xff]  }
 0x172   :  { %1842 = vmatpush1.bf16.msra.mxu1 %v5260_v24  ;;  %2006 = vmatpush1.bf16.msra.mxu0 %v5264_v26  ;;  %v5103_v24 = vcombine.high %v305_v21, %v309_v22  ;;  %v313_v26 = vld [vmem:[#allocation7 + $0x248] sm:$0xff] }
 0x173   :  { %1843 = vmatprep.subr.bf16.mxu1 %v5269_v27  ;;  %2007 = vmatprep.subr.bf16.mxu0 %v5273_v28  ;;  %v317_v27 = vld [vmem:[#allocation7 + $0x268] sm:$0xff]  ;;  %v5102_v28 = vcombine.low %v305_v21, %v309_v22 }
 0x174   :  { %v5111_v29 = vcombine.high %v313_v26, %v317_v27  ;;  %v5110_v32 = vcombine.low %v313_v26, %v317_v27  ;;  %v401_v26 = vld [vmem:[#allocation7 + $0x508] sm:$0xff] }
 0x175   :  { %v405_v27 = vld [vmem:[#allocation7 + $0x528] sm:$0xff] }
 0x176   :  { %1844 = vmatpush1.bf16.msra.mxu1 %v5268_v34  ;;  %2008 = vmatpush1.bf16.msra.mxu0 %v5272_v35  ;;  %v329_v34 = vld [vmem:[#allocation7 + $0x2c8] sm:$0xff] }
 0x177   :  { %1845 = vmatprep.subr.bf16.mxu1 %v5277_v36  ;;  %2009 = vmatprep.subr.bf16.mxu0 %v5281_v37  ;;  %v333_v35 = vld [vmem:[#allocation7 + $0x2e8] sm:$0xff]  ;;  %v5118_v36 = vcombine.low %v321_v30, %v325_v31  ;;  %v5786_v30 = vld [vmem:[#allocation8 + $0x180] ss:$24 sps:$4 sm:$0xff]   ;;  %v5788_v31 = vld [vmem:[#allocation8 + $0x184] ss:$24 sps:$4 sm:$0xff]  }
 0x178   :  { %v5127_v37 = vcombine.high %v329_v34, %v333_v35  ;;  %v5126_v40 = vcombine.low %v329_v34, %v333_v35  ;;  %v5198_v34 = vcombine.low %v401_v26, %v405_v27 }
 0x17a   :  { %1846 = vmatpush1.bf16.msra.mxu1 %v5276_v43  ;;  %2010 = vmatpush1.bf16.msra.mxu0 %v5280_v44  ;;  %v5764_v43 = vld [vmem:[#allocation8 + $0x4] ss:$24 sps:$4 sm:$0xff]   ;;  %v345_v44 = vld [vmem:[#allocation7 + $0x348] sm:$0xff] }
 0x17b   :  { %1847 = vmatprep.subr.bf16.mxu1 %v5285_v45  ;;  %2011 = vmatprep.subr.bf16.mxu0 %v5289_v46  ;;  %v349_v45 = vld [vmem:[#allocation7 + $0x368] sm:$0xff]  ;;  %v5134_v46 = vcombine.low %v337_v38, %v341_v39 }
 0x17c   :  { %v5143_v48 = vcombine.high %v345_v44, %v349_v45  ;;  %v5142_v54 = vcombine.low %v345_v44, %v349_v45  ;;  %v417_v38 = vld [vmem:[#allocation7 + $0x588] sm:$0xff]  ;;  %v5794_v44 = vld [vmem:[#allocation8 + $0x1e4] ss:$24 sps:$4 sm:$0xff]  }
 0x17d   :  { %v421_v39 = vld [vmem:[#allocation7 + $0x5a8] sm:$0xff] }
 0x17e   :  { %1848 = vmatpush1.bf16.msra.mxu1 %v5284_v52  ;;  %2012 = vmatpush1.bf16.msra.mxu0 %v5288_v53  ;;  %v353_v52 = vld [vmem:[#allocation7 + $0x388] sm:$0xff]  ;;  %v5214_v45 = vcombine.low %v417_v38, %v421_v39 }
 0x17f   :  { %1858 = vmatprep.subr.bf16.mxu1 %v5039_v55  ;;  %4472 = vmatprep.subr.bf16.mxu0 %v5764_v43  ;;  %v357_v53 = vld [vmem:[#allocation7 + $0x3a8] sm:$0xff] }
 0x180   :  { %v5151_v55 = vcombine.high %v353_v52, %v357_v53  ;;  %v5150_v25 = vcombine.low %v353_v52, %v357_v53  ;;  %v429_v43 = vld [vmem:[#allocation7 + $0x5e8] sm:$0xff] }
 0x181   :  { %1850 = vmatmul.mubr.bf16.vlgmr.msra.gmra.mrb[4].mxu1 %v6597_v60  ;;  %2014 = vmatmul.mubr.bf16.vlgmr.msra.gmra.mrb[4].mxu0 %v6597_v60  ;;  %v5797_v52 = vld [vmem:[#allocation8 + $0x214] ss:$24 sps:$4 sm:$0xff]  }
 0x182   :  { %1859 = vmatpush1.bf16.msra.mxu1 %v5038_v59  ;;  %1890 = vmatprep.mubr.bf16.mxu1 %v6582_v47  ;;  %v361_v59 = vld [vmem:[#allocation7 + $0x3c8] sm:$0xff] }
 0x183   :  { %1860 = vmatprep.subr.bf16.mxu1 %v5047_v61  ;;  %4473 = vmatpush1.bf16.msra.mxu0 %v5762_v42  ;;  %v365_v61 = vld [vmem:[#allocation7 + $0x3e8] sm:$0xff] }
 0x184   :  { %4474 = vmatprep.subr.bf16.mxu0 %v5767_v51  ;;  %v5159_v62 = vcombine.high %v361_v59, %v365_v61  ;;  %v425_v42 = vld [vmem:[#allocation7 + $0x5c8] sm:$0xff] }
 0x185   :  { %v437_v51 = vld [vmem:[#allocation7 + $0x628] sm:$0xff]  ;;  %v5222_v53 = vcombine.low %v425_v42, %v429_v43 }
 0x186   :  { %1861 = vmatpush1.bf16.msra.mxu1 %v5046_v63  ;;  %v5771_v63 = vld [vmem:[#allocation8 + $0x90] ss:$24 sps:$4 sm:$0xff]  }
 0x187   :  { %1862 = vmatprep.subr.bf16.mxu1 %v5055_v0  ;;  %4475 = vmatpush1.bf16.msra.mxu0 %v5765_v50  ;;  %v5773_v0 = vld [vmem:[#allocation8 + $0x94] ss:$24 sps:$4 sm:$0xff]  }
 0x188   :  { %4476 = vmatprep.subr.bf16.mxu0 %v5770_v58  ;;  %v433_v50 = vld [vmem:[#allocation7 + $0x608] sm:$0xff] }
 0x189   :  { %v445_v58 = vld [vmem:[#allocation7 + $0x668] sm:$0xff] }
 0x18a   :  { %1863 = vmatpush1.bf16.msra.mxu1 %v5054_v3  ;;  %v5158_v3 = vcombine.low %v361_v59, %v365_v61  ;;  %v5800_v59 = vld [vmem:[#allocation8 + $0x244] ss:$24 sps:$4 sm:$0xff]   ;;  %v5230_v61 = vcombine.low %v433_v50, %v437_v51 }
 0x18b   :  { %1864 = vmatprep.subr.bf16.mxu1 %v5063_v4  ;;  %4477 = vmatpush1.bf16.msra.mxu0 %v5768_v56  ;;  %v5167_v4 = vcombine.high %v369_v1, %v373_v2  ;;  %v441_v56 = vld [vmem:[#allocation7 + $0x648] sm:$0xff] }
 0x18c   :  { %4478 = vmatprep.subr.bf16.mxu0 %v5773_v0  ;;  %v453_v0 = vld [vmem:[#allocation7 + $0x6a8] sm:$0xff]  ;;  %v5238_v2 = vcombine.low %v441_v56, %v445_v58 }
 0x18d   :  { %v5803_v1 = vld [vmem:[#allocation8 + $0x274] ss:$24 sps:$4 sm:$0xff]  }
 0x18e   :  { %1865 = vmatpush1.bf16.msra.mxu1 %v5062_v7  ;;  %v377_v7 = vld [vmem:[#allocation7 + $0x448] sm:$0xff] }
 0x18f   :  { %1866 = vmatprep.subr.bf16.mxu1 %v5071_v8  ;;  %4479 = vmatpush1.bf16.msra.mxu0 %v5771_v63  ;;  %v381_v8 = vld [vmem:[#allocation7 + $0x468] sm:$0xff] }
 0x190   :  { %4480 = vmatprep.subr.bf16.mxu0 %v5776_v6  ;;  %v5175_v10 = vcombine.high %v377_v7, %v381_v8  ;;  %v449_v63 = vld [vmem:[#allocation7 + $0x688] sm:$0xff] }
 0x191   :  { %v461_v6 = vld [vmem:[#allocation7 + $0x6e8] sm:$0xff] }
 0x192   :  { %1867 = vmatpush1.bf16.msra.mxu1 %v5070_v11  ;;  %v5779_v11 = vld [vmem:[#allocation8 + $0xf4] ss:$24 sps:$4 sm:$0xff]  }
 0x193   :  { %1868 = vmatprep.subr.bf16.mxu1 %v5079_v12  ;;  %4481 = vmatpush1.bf16.msra.mxu0 %v5774_v5  ;;  %v385_v12 = vld [vmem:[#allocation7 + $0x488] sm:$0xff] }
 0x194   :  { %4482 = vmatprep.subr.bf16.mxu0 %v5779_v11  ;;  %v5182_v21 = vcombine.low %v385_v12, %v389_v13  ;;  %v457_v5 = vld [vmem:[#allocation7 + $0x6c8] sm:$0xff] }
 0x195   :  { %v465_v11 = vld [vmem:[#allocation7 + $0x708] sm:$0xff] }
 0x196   :  { %1869 = vmatpush1.bf16.msra.mxu1 %v5078_v15  ;;  %v5174_v15 = vcombine.low %v377_v7, %v381_v8  ;;  %v5806_v7 = vld [vmem:[#allocation8 + $0x2a4] ss:$24 sps:$4 sm:$0xff]   ;;  %v5246_v8 = vcombine.low %v449_v63, %v453_v0 }
 0x197   :  { %1870 = vmatprep.subr.bf16.mxu1 %v5087_v16  ;;  %v5183_v16 = vcombine.high %v385_v12, %v389_v13  ;;  %4483 = vmatpush1.bf16.msra.mxu0 %v5777_v14  ;;  %v469_v12 = vld [vmem:[#allocation7 + $0x728] sm:$0xff]  ;;  %v5254_v14 = vcombine.low %v457_v5, %v461_v6 }
 0x198   :  { %4484 = vmatprep.subr.bf16.mxu0 %v5782_v18  ;;  %v5809_v13 = vld [vmem:[#allocation8 + $0x2d4] ss:$24 sps:$4 sm:$0xff]  }
 0x199   :  { %v477_v18 = vld [vmem:[#allocation7 + $0x768] sm:$0xff] }
 0x19a   :  { %1871 = vmatpush1.bf16.msra.mxu1 %v5086_v19  ;;  %v393_v19 = vld [vmem:[#allocation7 + $0x4c8] sm:$0xff] }
 0x19b   :  { %1872 = vmatprep.subr.bf16.mxu1 %v5095_v20  ;;  %v397_v20 = vld [vmem:[#allocation7 + $0x4e8] sm:$0xff]  ;;  %4485 = vmatpush1.bf16.msra.mxu0 %v5780_v17 }
 0x19c   :  { %v5191_v22 = vcombine.high %v393_v19, %v397_v20  ;;  %v473_v17 = vld [vmem:[#allocation7 + $0x748] sm:$0xff] }
 0x19e   :  { %1873 = vmatpush1.bf16.msra.mxu1 %v5094_v23  ;;  %v5783_v23 = vld [vmem:[#allocation8 + $0x150] ss:$24 sps:$4 sm:$0xff]  }
 0x19f   :  { %1874 = vmatprep.subr.bf16.mxu1 %v5103_v24  ;;  %v5785_v24 = vld [vmem:[#allocation8 + $0x154] ss:$24 sps:$4 sm:$0xff]  }
 0x1a0   :  { %4486 = vmatprep.subr.bf16.mxu0 %v5785_v24 }
 0x1a1   :  { %4487 = vmatpush1.bf16.msra.mxu0 %v5783_v23  ;;  %v5270_v23 = vcombine.low %v473_v17, %v477_v18 }
 0x1a2   :  { %1875 = vmatpush1.bf16.msra.mxu1 %v5102_v28  ;;  %v5190_v28 = vcombine.low %v393_v19, %v397_v20  ;;  %4488 = vmatprep.subr.bf16.mxu0 %v5788_v31  ;;  %v5262_v19 = vcombine.low %v465_v11, %v469_v12  ;;  %v5271_v20 = vcombine.high %v473_v17, %v477_v18  ;;  %v247_v31 = vld [vmem:[#allocation7 + $0x38] sm:$0xff] }
 0x1a3   :  { %1876 = vmatprep.subr.bf16.mxu1 %v5111_v29  ;;  %v5199_v29 = vcombine.high %v401_v26, %v405_v27  ;;  %v489_v26 = vld [vmem:[#allocation7 + $0x7c8] sm:$0xff]  ;;  %v343_v17 = vld [vmem:[#allocation7 + $0x338] sm:$0xff] }
 0x1a4   :  { %v493_v27 = vld [vmem:[#allocation7 + $0x7e8] sm:$0xff] }
 0x1a5   :  { %4489 = vmatpush1.bf16.msra.mxu0 %v5786_v30  ;;  %v243_v30 = vld [vmem:[#allocation7 + $0x18] sm:$0xff] }
 0x1a6   :  { %1877 = vmatpush1.bf16.msra.mxu1 %v5110_v32  ;;  %v409_v32 = vld [vmem:[#allocation7 + $0x548] sm:$0xff] }
 0x1a7   :  { %1878 = vmatprep.subr.bf16.mxu1 %v5119_v33  ;;  %v413_v33 = vld [vmem:[#allocation7 + $0x568] sm:$0xff] }
 0x1a8   :  { %v5207_v35 = vcombine.high %v409_v32, %v413_v33 }
 0x1aa   :  { %1879 = vmatpush1.bf16.msra.mxu1 %v5118_v36  ;;  %v5789_v36 = vld [vmem:[#allocation8 + $0x1b0] ss:$24 sps:$4 sm:$0xff]  }
 0x1ab   :  { %1880 = vmatprep.subr.bf16.mxu1 %v5127_v37  ;;  %v5791_v37 = vld [vmem:[#allocation8 + $0x1b4] ss:$24 sps:$4 sm:$0xff]  }
 0x1ac   :  { %4490 = vmatprep.subr.bf16.mxu0 %v5791_v37 }
 0x1ad   :  { %4491 = vmatpush1.bf16.msra.mxu0 %v5789_v36  ;;  %v5042_v36 = vcombine.low %v243_v30, %v247_v31 }
 0x1ae   :  { %1881 = vmatpush1.bf16.msra.mxu1 %v5126_v40  ;;  %v5206_v40 = vcombine.low %v409_v32, %v413_v33  ;;  %4492 = vmatprep.subr.bf16.mxu0 %v5794_v44  ;;  %v5286_v32 = vcombine.low %v489_v26, %v493_v27  ;;  %v5043_v33 = vcombine.high %v243_v30, %v247_v31  ;;  %v363_v30 = vld [vmem:[#allocation7 + $0x3d8] sm:$0xff] }
 0x1af   :  { %1882 = vmatprep.subr.bf16.mxu1 %v5135_v41  ;;  %v5215_v41 = vcombine.high %v417_v38, %v421_v39  ;;  %v259_v38 = vld [vmem:[#allocation7 + $0x98] sm:$0xff] }
 0x1b0   :  { %v263_v39 = vld [vmem:[#allocation7 + $0xb8] sm:$0xff] }
 0x1b1   :  { %v5058_v44 = vcombine.low %v259_v38, %v263_v39  ;;  %v367_v31 = vld [vmem:[#allocation7 + $0x3f8] sm:$0xff] }
 0x1b2   :  { %1883 = vmatpush1.bf16.msra.mxu1 %v5134_v46  ;;  %v5792_v46 = vld [vmem:[#allocation8 + $0x1e0] ss:$24 sps:$4 sm:$0xff]  }
 0x1b3   :  { %1884 = vmatprep.subr.bf16.mxu1 %v5143_v48  ;;  %v5223_v48 = vcombine.high %v425_v42, %v429_v43  ;;  %4493 = vmatpush1.bf16.msra.mxu0 %v5792_v46  ;;  %v267_v42 = vld [vmem:[#allocation7 + $0xd8] sm:$0xff] }
 0x1b4   :  { %4494 = vmatprep.subr.bf16.mxu0 %v5797_v52  ;;  %v271_v43 = vld [vmem:[#allocation7 + $0xf8] sm:$0xff] }
 0x1b5   :  { %v275_v46 = vld [vmem:[#allocation7 + $0x118] sm:$0xff] }
 0x1b6   :  { %1885 = vmatpush1.bf16.msra.mxu1 %v5142_v54  ;;  %v5795_v54 = vld [vmem:[#allocation8 + $0x210] ss:$24 sps:$4 sm:$0xff]   ;;  %v283_v52 = vld [vmem:[#allocation7 + $0x158] sm:$0xff] }
 0x1b7   :  { %1886 = vmatprep.subr.bf16.mxu1 %v5151_v55  ;;  %v5231_v55 = vcombine.high %v433_v50, %v437_v51  ;;  %4495 = vmatpush1.bf16.msra.mxu0 %v5795_v54  ;;  %v5066_v50 = vcombine.low %v267_v42, %v271_v43 }
 0x1b8   :  { %4496 = vmatprep.subr.bf16.mxu0 %v5800_v59 }
 0x1ba   :  { %1887 = vmatpush1.bf16.msra.mxu1 %v5150_v25  ;;  %v5798_v25 = vld [vmem:[#allocation8 + $0x240] ss:$24 sps:$4 sm:$0xff]  }
 0x1bb   :  { %1888 = vmatprep.subr.bf16.mxu1 %v5159_v62  ;;  %v5239_v62 = vcombine.high %v441_v56, %v445_v58  ;;  %4497 = vmatpush1.bf16.msra.mxu0 %v5798_v25  ;;  %v295_v56 = vld [vmem:[#allocation7 + $0x1b8] sm:$0xff] }
 0x1bc   :  { %4498 = vmatprep.subr.bf16.mxu0 %v5803_v1  ;;  %v303_v25 = vld [vmem:[#allocation7 + $0x1f8] sm:$0xff] }
 0x1bd   :  { %v311_v1 = vld [vmem:[#allocation7 + $0x238] sm:$0xff] }
 0x1be   :  { %1889 = vmatpush1.bf16.msra.mxu1 %v5158_v3  ;;  %v5801_v3 = vld [vmem:[#allocation8 + $0x270] ss:$24 sps:$4 sm:$0xff]  }
 0x1bf   :  { %1899 = vmatprep.subr.bf16.mxu1 %v5167_v4  ;;  %v5247_v4 = vcombine.high %v449_v63, %v453_v0  ;;  %4499 = vmatpush1.bf16.msra.mxu0 %v5801_v3  ;;  %v307_v0 = vld [vmem:[#allocation7 + $0x218] sm:$0xff] }
 0x1c0   :  { %4500 = vmatprep.subr.bf16.mxu0 %v5806_v7  ;;  %v5107_v3 = vcombine.high %v307_v0, %v311_v1 }
 0x1c1   :  { %1891 = vmatmul.mubr.bf16.vlgmr.msra.gmra.mrb[8].mxu1 %v6584_v49 }
 0x1c2   :  { %1900 = vmatpush1.bf16.msra.mxu1 %v5166_v9  ;;  %1931 = vmatprep.mubr.bf16.mxu1 %v6590_v57  ;;  %v5804_v9 = vld [vmem:[#allocation8 + $0x2a0] ss:$24 sps:$4 sm:$0xff]  }
 0x1c3   :  { %1901 = vmatprep.subr.bf16.mxu1 %v5175_v10  ;;  %v5255_v10 = vcombine.high %v457_v5, %v461_v6  ;;  %4501 = vmatpush1.bf16.msra.mxu0 %v5804_v9  ;;  %v319_v5 = vld [vmem:[#allocation7 + $0x278] sm:$0xff]  ;;  %v5106_v6 = vcombine.low %v307_v0, %v311_v1 }
 0x1c4   :  { %4502 = vmatprep.subr.bf16.mxu0 %v5809_v13  ;;  %v327_v9 = vld [vmem:[#allocation7 + $0x2b8] sm:$0xff] }
 0x1c5   :  { %v335_v13 = vld [vmem:[#allocation7 + $0x2f8] sm:$0xff] }
 0x1c6   :  { %1902 = vmatpush1.bf16.msra.mxu1 %v5174_v15  ;;  %v5807_v15 = vld [vmem:[#allocation8 + $0x2d0] ss:$24 sps:$4 sm:$0xff]   ;;  %v427_v0 = vld [vmem:[#allocation7 + $0x5d8] sm:$0xff] }
 0x1c7   :  { %1903 = vmatprep.subr.bf16.mxu1 %v5183_v16  ;;  %v5263_v16 = vcombine.high %v465_v11, %v469_v12  ;;  %4503 = vmatpush1.bf16.msra.mxu0 %v5807_v15  ;;  %v331_v12 = vld [vmem:[#allocation7 + $0x2d8] sm:$0xff] }
 0x1c8   :  { %v5131_v15 = vcombine.high %v331_v12, %v335_v13  ;;  %v5130_v18 = vcombine.low %v331_v12, %v335_v13  ;;  %v431_v1 = vld [vmem:[#allocation7 + $0x5f8] sm:$0xff] }
 0x1c9   :  { %v435_v12 = vld [vmem:[#allocation7 + $0x618] sm:$0xff] }
 0x1ca   :  { %1904 = vmatpush1.bf16.msra.mxu1 %v5182_v21  ;;  %v481_v21 = vld [vmem:[#allocation7 + $0x788] sm:$0xff]  ;;  %v439_v13 = vld [vmem:[#allocation7 + $0x638] sm:$0xff] }
 0x1cb   :  { %1905 = vmatprep.subr.bf16.mxu1 %v5191_v22  ;;  %v485_v22 = vld [vmem:[#allocation7 + $0x7a8] sm:$0xff] }
 0x1cc   :  { %v5279_v24 = vcombine.high %v481_v21, %v485_v22 }
 0x1ce   :  { %1906 = vmatpush1.bf16.msra.mxu1 %v5190_v28  ;;  %v5278_v28 = vcombine.low %v481_v21, %v485_v22  ;;  %v347_v21 = vld [vmem:[#allocation7 + $0x358] sm:$0xff] }
 0x1cf   :  { %1907 = vmatprep.subr.bf16.mxu1 %v5199_v29  ;;  %v5287_v29 = vcombine.high %v489_v26, %v493_v27  ;;  %v351_v22 = vld [vmem:[#allocation7 + $0x378] sm:$0xff] }
 0x1d0   :  { %v355_v26 = vld [vmem:[#allocation7 + $0x398] sm:$0xff] }
 0x1d1   :  { %v359_v27 = vld [vmem:[#allocation7 + $0x3b8] sm:$0xff] }
 0x1d2   :  { %1908 = vmatpush1.bf16.msra.mxu1 %v5198_v34  ;;  %v251_v34 = vld [vmem:[#allocation7 + $0x58] sm:$0xff] }
 0x1d3   :  { %1909 = vmatprep.subr.bf16.mxu1 %v5207_v35  ;;  %v255_v35 = vld [vmem:[#allocation7 + $0x78] sm:$0xff] }
 0x1d4   :  { %v5051_v37 = vcombine.high %v251_v34, %v255_v35 }
 0x1d6   :  { %1910 = vmatpush1.bf16.msra.mxu1 %v5206_v40  ;;  %v5050_v40 = vcombine.low %v251_v34, %v255_v35  ;;  %v371_v34 = vld [vmem:[#allocation7 + $0x418] sm:$0xff] }
 0x1d7   :  { %1911 = vmatprep.subr.bf16.mxu1 %v5215_v41  ;;  %v5059_v41 = vcombine.high %v259_v38, %v263_v39  ;;  %v375_v35 = vld [vmem:[#allocation7 + $0x438] sm:$0xff] }
 0x1d8   :  { %v379_v38 = vld [vmem:[#allocation7 + $0x458] sm:$0xff] }
 0x1d9   :  { %v383_v39 = vld [vmem:[#allocation7 + $0x478] sm:$0xff] }
 0x1da   :  { %1912 = vmatpush1.bf16.msra.mxu1 %v5214_v45  ;;  %v5067_v45 = vcombine.high %v267_v42, %v271_v43  ;;  %v387_v42 = vld [vmem:[#allocation7 + $0x498] sm:$0xff] }
 0x1db   :  { %1913 = vmatprep.subr.bf16.mxu1 %v5223_v48  ;;  %v279_v48 = vld [vmem:[#allocation7 + $0x138] sm:$0xff] }
 0x1dc   :  { %v5075_v51 = vcombine.high %v275_v46, %v279_v48  ;;  %v5074_v54 = vcombine.low %v275_v46, %v279_v48  ;;  %v391_v43 = vld [vmem:[#allocation7 + $0x4b8] sm:$0xff] }
 0x1dd   :  { %v395_v46 = vld [vmem:[#allocation7 + $0x4d8] sm:$0xff] }
 0x1de   :  { %1914 = vmatpush1.bf16.msra.mxu1 %v5222_v53  ;;  %v287_v53 = vld [vmem:[#allocation7 + $0x178] sm:$0xff] }
 0x1df   :  { %1915 = vmatprep.subr.bf16.mxu1 %v5231_v55  ;;  %v291_v55 = vld [vmem:[#allocation7 + $0x198] sm:$0xff]  ;;  %v5082_v58 = vcombine.low %v283_v52, %v287_v53 }
 0x1e0   :  { %v5091_v59 = vcombine.high %v291_v55, %v295_v56  ;;  %v399_v48 = vld [vmem:[#allocation7 + $0x4f8] sm:$0xff] }
 0x1e2   :  { %1916 = vmatpush1.bf16.msra.mxu1 %v5230_v61  ;;  %v299_v61 = vld [vmem:[#allocation7 + $0x1d8] sm:$0xff] }
 0x1e3   :  { %1917 = vmatprep.subr.bf16.mxu1 %v5239_v62  ;;  %v5090_v62 = vcombine.low %v291_v55, %v295_v56  ;;  %v5099_v63 = vcombine.high %v299_v61, %v303_v25  ;;  %v411_v55 = vld [vmem:[#allocation7 + $0x558] sm:$0xff] }
 0x1e6   :  { %1918 = vmatpush1.bf16.msra.mxu1 %v5238_v2  ;;  %v5098_v2 = vcombine.low %v299_v61, %v303_v25 }
 0x1e7   :  { %1919 = vmatprep.subr.bf16.mxu1 %v5247_v4  ;;  %v315_v4 = vld [vmem:[#allocation7 + $0x258] sm:$0xff] }
 0x1e8   :  { %v5115_v7 = vcombine.high %v315_v4, %v319_v5 }
 0x1ea   :  { %1920 = vmatpush1.bf16.msra.mxu1 %v5246_v8  ;;  %v323_v8 = vld [vmem:[#allocation7 + $0x298] sm:$0xff] }
 0x1eb   :  { %1921 = vmatprep.subr.bf16.mxu1 %v5255_v10  ;;  %v5114_v10 = vcombine.low %v315_v4, %v319_v5  ;;  %v5123_v11 = vcombine.high %v323_v8, %v327_v9 }
 0x1ee   :  { %1922 = vmatpush1.bf16.msra.mxu1 %v5254_v14  ;;  %v5122_v14 = vcombine.low %v323_v8, %v327_v9  ;;  %v5227_v9 = vcombine.high %v427_v0, %v431_v1 }
 0x1ef   :  { %1923 = vmatprep.subr.bf16.mxu1 %v5263_v16  ;;  %v339_v16 = vld [vmem:[#allocation7 + $0x318] sm:$0xff] }
 0x1f2   :  { %1924 = vmatpush1.bf16.msra.mxu1 %v5262_v19  ;;  %v5845_v19 = vld [vmem:[#allocation8 + $0x304] ss:$24 sps:$4 sm:$0xff]  }
 0x1f3   :  { %1925 = vmatprep.subr.bf16.mxu1 %v5271_v20  ;;  %v5139_v20 = vcombine.high %v339_v16, %v343_v17  ;;  %4513 = vmatprep.subr.bf16.mxu0 %v5845_v19 }
 0x1f6   :  { %1926 = vmatpush1.bf16.msra.mxu1 %v5270_v23  ;;  %v5138_v23 = vcombine.low %v339_v16, %v343_v17  ;;  %v443_v16 = vld [vmem:[#allocation7 + $0x658] sm:$0xff] }
 0x1f7   :  { %1927 = vmatprep.subr.bf16.mxu1 %v5279_v24  ;;  %v5147_v24 = vcombine.high %v347_v21, %v351_v22  ;;  %v447_v17 = vld [vmem:[#allocation7 + $0x678] sm:$0xff] }
 0x1f8   :  { %v5243_v19 = vcombine.high %v443_v16, %v447_v17 }
 0x1fa   :  { %1928 = vmatpush1.bf16.msra.mxu1 %v5278_v28  ;;  %v5146_v28 = vcombine.low %v347_v21, %v351_v22  ;;  %v455_v21 = vld [vmem:[#allocation7 + $0x6b8] sm:$0xff] }
 0x1fb   :  { %1929 = vmatprep.subr.bf16.mxu1 %v5287_v29  ;;  %v5155_v29 = vcombine.high %v355_v26, %v359_v27 }
 0x1fe   :  { %1930 = vmatpush1.bf16.msra.mxu1 %v5286_v32  ;;  %v5154_v32 = vcombine.low %v355_v26, %v359_v27 }
 0x1ff   :  { %2022 = vmatprep.subr.bf16.mxu1 %v5043_v33  ;;  %v5163_v33 = vcombine.high %v363_v30, %v367_v31 }
 0x201   :  { %1932 = vmatmul.mubr.bf16.vlgmr.msra.gmra.mrb[8].mxu1 %v6597_v60 }
 0x202   :  { %2023 = vmatpush1.bf16.msra.mxu1 %v5042_v36  ;;  %2054 = vmatprep.mubr.bf16.mxu1 %v6582_v47  ;;  %v5083_v47 = vcombine.high %v283_v52, %v287_v53  ;;  %v5162_v36 = vcombine.low %v363_v30, %v367_v31  ;;  %v403_v52 = vld [vmem:[#allocation7 + $0x518] sm:$0xff] }
 0x203   :  { %2024 = vmatprep.subr.bf16.mxu1 %v5051_v37  ;;  %v5171_v37 = vcombine.high %v371_v34, %v375_v35  ;;  %v407_v53 = vld [vmem:[#allocation7 + $0x538] sm:$0xff] }
 0x204   :  { %v5202_v56 = vcombine.low %v403_v52, %v407_v53  ;;  %v459_v30 = vld [vmem:[#allocation7 + $0x6d8] sm:$0xff] }
 0x205   :  { %v463_v31 = vld [vmem:[#allocation7 + $0x6f8] sm:$0xff] }
 0x206   :  { %2025 = vmatpush1.bf16.msra.mxu1 %v5050_v40  ;;  %v5170_v40 = vcombine.low %v371_v34, %v375_v35  ;;  %v5259_v35 = vcombine.high %v459_v30, %v463_v31 }
 0x207   :  { %2026 = vmatprep.subr.bf16.mxu1 %v5059_v41  ;;  %v5179_v41 = vcombine.high %v379_v38, %v383_v39 }
 0x20a   :  { %2027 = vmatpush1.bf16.msra.mxu1 %v5058_v44  ;;  %v5178_v44 = vcombine.low %v379_v38, %v383_v39  ;;  %v467_v38 = vld [vmem:[#allocation7 + $0x718] sm:$0xff] }
 0x20b   :  { %2028 = vmatprep.subr.bf16.mxu1 %v5067_v45  ;;  %v5187_v45 = vcombine.high %v387_v42, %v391_v43  ;;  %v471_v39 = vld [vmem:[#allocation7 + $0x738] sm:$0xff] }
 0x20e   :  { %2029 = vmatpush1.bf16.msra.mxu1 %v5066_v50  ;;  %v5186_v50 = vcombine.low %v387_v42, %v391_v43  ;;  %v5267_v43 = vcombine.high %v467_v38, %v471_v39 }
 0x20f   :  { %2030 = vmatprep.subr.bf16.mxu1 %v5075_v51  ;;  %v5195_v51 = vcombine.high %v395_v46, %v399_v48 }
 0x212   :  { %2031 = vmatpush1.bf16.msra.mxu1 %v5074_v54  ;;  %v5194_v54 = vcombine.low %v395_v46, %v399_v48  ;;  %v475_v46 = vld [vmem:[#allocation7 + $0x758] sm:$0xff] }
 0x213   :  { %2032 = vmatprep.subr.bf16.mxu1 %v5083_v47  ;;  %v5203_v47 = vcombine.high %v403_v52, %v407_v53  ;;  %v479_v48 = vld [vmem:[#allocation7 + $0x778] sm:$0xff]  ;;  %v5849_v53 = vld [vmem:[#allocation8 + $0x330] ss:$24 sps:$4 sm:$0xff]  }
 0x214   :  { %v5275_v52 = vcombine.high %v475_v46, %v479_v48 }
 0x216   :  { %2033 = vmatpush1.bf16.msra.mxu1 %v5082_v58  ;;  %v419_v58 = vld [vmem:[#allocation7 + $0x598] sm:$0xff] }
 0x217   :  { %2034 = vmatprep.subr.bf16.mxu1 %v5091_v59  ;;  %v423_v59 = vld [vmem:[#allocation7 + $0x5b8] sm:$0xff] }
 0x218   :  { %v5219_v25 = vcombine.high %v419_v58, %v423_v59  ;;  %v5218_v5 = vcombine.low %v419_v58, %v423_v59  ;;  %v491_v58 = vld [vmem:[#allocation7 + $0x7d8] sm:$0xff] }
 0x219   :  { %v495_v59 = vld [vmem:[#allocation7 + $0x7f8] sm:$0xff] }
 0x21a   :  { %2035 = vmatpush1.bf16.msra.mxu1 %v5090_v62 }
 0x21b   :  { %2036 = vmatprep.subr.bf16.mxu1 %v5099_v63 }
 0x21e   :  { %2037 = vmatpush1.bf16.msra.mxu1 %v5098_v2 }
 0x21f   :  { %2038 = vmatprep.subr.bf16.mxu1 %v5107_v3 }
 0x222   :  { %2039 = vmatpush1.bf16.msra.mxu1 %v5106_v6 }
 0x223   :  { %2040 = vmatprep.subr.bf16.mxu1 %v5115_v7 }
 0x226   :  { %2041 = vmatpush1.bf16.msra.mxu1 %v5114_v10 }
 0x227   :  { %2042 = vmatprep.subr.bf16.mxu1 %v5123_v11 }
 0x22a   :  { %2043 = vmatpush1.bf16.msra.mxu1 %v5122_v14  ;;  %v5226_v14 = vcombine.low %v427_v0, %v431_v1  ;;  %v5861_v0 = vld [vmem:[#allocation8 + $0x390] ss:$24 sps:$4 sm:$0xff]   ;;  %v5869_v1 = vld [vmem:[#allocation8 + $0x3c4] ss:$24 sps:$4 sm:$0xff]  }
 0x22b   :  { %2044 = vmatprep.subr.bf16.mxu1 %v5131_v15  ;;  %v5235_v15 = vcombine.high %v435_v12, %v439_v13 }
 0x22e   :  { %2045 = vmatpush1.bf16.msra.mxu1 %v5130_v18  ;;  %v5234_v18 = vcombine.low %v435_v12, %v439_v13  ;;  %v5818_v12 = vld [vmem:[#allocation8 + $0x6c] ss:$24 sps:$4 sm:$0xff]   ;;  %v5879_v13 = vld [vmem:[#allocation8 + $0x420] ss:$24 sps:$4 sm:$0xff]  }
 0x22f   :  { %2046 = vmatprep.subr.bf16.mxu1 %v5139_v20  ;;  %v451_v20 = vld [vmem:[#allocation7 + $0x698] sm:$0xff] }
 0x230   :  { %v5251_v27 = vcombine.high %v451_v20, %v455_v21  ;;  %v5250_v34 = vcombine.low %v451_v20, %v455_v21  ;;  %v5891_v20 = vld [vmem:[#allocation8 + $0x480] ss:$24 sps:$4 sm:$0xff]   ;;  %v5899_v21 = vld [vmem:[#allocation8 + $0x4b4] ss:$24 sps:$4 sm:$0xff]  }
 0x232   :  { %2047 = vmatpush1.bf16.msra.mxu1 %v5138_v23 }
 0x233   :  { %2048 = vmatprep.subr.bf16.mxu1 %v5147_v24  ;;  %v5242_v24 = vcombine.low %v443_v16, %v447_v17  ;;  %v5821_v16 = vld [vmem:[#allocation8 + $0x9c] ss:$24 sps:$4 sm:$0xff]   ;;  %v5885_v17 = vld [vmem:[#allocation8 + $0x450] ss:$24 sps:$4 sm:$0xff]  }
 0x236   :  { %2049 = vmatpush1.bf16.msra.mxu1 %v5146_v28 }
 0x237   :  { %2050 = vmatprep.subr.bf16.mxu1 %v5155_v29 }
 0x23a   :  { %2051 = vmatpush1.bf16.msra.mxu1 %v5154_v32 }
 0x23b   :  { %2052 = vmatprep.subr.bf16.mxu1 %v5163_v33 }
 0x23e   :  { %2053 = vmatpush1.bf16.msra.mxu1 %v5162_v36 }
 0x23f   :  { %2063 = vmatprep.subr.bf16.mxu1 %v5171_v37 }
 0x241   :  { %2055 = vmatmul.mubr.bf16.vlgmr.msra.gmra.mrb[12].mxu1 %v6584_v49  ;;  %v415_v49 = vld [vmem:[#allocation7 + $0x578] sm:$0xff] }
 0x242   :  { %2064 = vmatpush1.bf16.msra.mxu1 %v5170_v40  ;;  %2095 = vmatprep.mubr.bf16.mxu1 %v6590_v57  ;;  %v5211_v57 = vcombine.high %v411_v55, %v415_v49  ;;  %v5210_v61 = vcombine.low %v411_v55, %v415_v49  ;;  %v5857_v55 = vld [vmem:[#allocation8 + $0x364] ss:$24 sps:$4 sm:$0xff]   ;;  %v5274_v49 = vcombine.low %v475_v46, %v479_v48  ;;  %v5927_v48 = vld [vmem:[#allocation8 + $0x5a0] ss:$24 sps:$4 sm:$0xff]  }
 0x243   :  { %2065 = vmatprep.subr.bf16.mxu1 %v5179_v41  ;;  %v5258_v41 = vcombine.low %v459_v30, %v463_v31  ;;  %v5911_v30 = vld [vmem:[#allocation8 + $0x514] ss:$24 sps:$4 sm:$0xff]   ;;  %v5828_v31 = vld [vmem:[#allocation8 + $0x128] ss:$24 sps:$4 sm:$0xff]  }
 0x244   :  { %v5842_v46 = vld [vmem:[#allocation8 + $0x1ec] ss:$24 sps:$4 sm:$0xff]  }
 0x246   :  { %2066 = vmatpush1.bf16.msra.mxu1 %v5178_v44  ;;  %v5843_v44 = vld [vmem:[#allocation8 + $0x300] ss:$24 sps:$4 sm:$0xff]  }
 0x247   :  { %2067 = vmatprep.subr.bf16.mxu1 %v5187_v45 }
 0x24a   :  { %2068 = vmatpush1.bf16.msra.mxu1 %v5186_v50  ;;  %v5851_v50 = vld [vmem:[#allocation8 + $0x334] ss:$24 sps:$4 sm:$0xff]  }
 0x24b   :  { %2069 = vmatprep.subr.bf16.mxu1 %v5195_v51  ;;  %v5266_v51 = vcombine.low %v467_v38, %v471_v39  ;;  %v5923_v38 = vld [vmem:[#allocation8 + $0x574] ss:$24 sps:$4 sm:$0xff]   ;;  %v5834_v39 = vld [vmem:[#allocation8 + $0x188] ss:$24 sps:$4 sm:$0xff]  }
 0x24e   :  { %2070 = vmatpush1.bf16.msra.mxu1 %v5194_v54  ;;  %v483_v54 = vld [vmem:[#allocation7 + $0x798] sm:$0xff] }
 0x24f   :  { %2071 = vmatprep.subr.bf16.mxu1 %v5203_v47  ;;  %v487_v47 = vld [vmem:[#allocation7 + $0x7b8] sm:$0xff] }
 0x252   :  { %2072 = vmatpush1.bf16.msra.mxu1 %v5202_v56  ;;  %v5283_v56 = vcombine.high %v483_v54, %v487_v47 }
 0x253   :  { %2073 = vmatprep.subr.bf16.mxu1 %v5211_v57  ;;  %v5855_v57 = vld [vmem:[#allocation8 + $0x360] ss:$24 sps:$4 sm:$0xff]  }
 0x254   :  { %v1851_v62 = vpop.f32.mrb[4].mxu1  ;;  %v6608_v63 = vpop.f32.mrb[4].mxu0 }
 0x255   :  { %v2112_v2 = vmul.f32 1.442695, %v1851_v62  ;;  %v1853_v3 = vpop.f32.mrb[5].mxu1  ;;  %v6610_v4 = vpop.f32.mrb[5].mxu0  ;;  %vm2104_vm5 = vcmp.gt.f32.partialorder %v1851_v62, 0.0  ;;  %vm2108_vm10 = vcmp.gt.f32.partialorder %v6608_v63, 0.0 }
 0x256   :  { %2074 = vmatpush1.bf16.msra.mxu1 %v5210_v61  ;;  %v2114_v6 = vmul.f32 1.442695, %v1853_v3  ;;  %v1855_v7 = vpop.f32.mrb[6].mxu1  ;;  %v2019_v8 = vpop.f32.mrb[6].mxu0  ;;  %vm2105_vm6 = vcmp.gt.f32.partialorder %v1853_v3, 0.0  ;;  %vm2109_vm7 = vcmp.gt.f32.partialorder %v6610_v4, 0.0 }
 0x257   :  { %6346 = vpow2.f32 %v2112_v2  ;;  %2075 = vmatprep.subr.bf16.mxu1 %v5219_v25  ;;  %v1856_v10 = vpop.f32.mrb[7].mxu1  ;;  %v2020_v11 = vpop.f32.mrb[7].mxu0  ;;  %v5863_v61 = vld [vmem:[#allocation8 + $0x394] ss:$24 sps:$4 sm:$0xff]   ;;  %v5282_v25 = vcombine.low %v483_v54, %v487_v47  ;;  %v5290_v2 = vcombine.low %v491_v58, %v495_v59  ;;  %v5810_v7 = vld [vmem:[#allocation8 + $0x8] ss:$24 sps:$4 sm:$0xff]  }
 0x258   :  { %6348 = vpow2.f32 %v2114_v6  ;;  %v5875_v6 = vld [vmem:[#allocation8 + $0x3f4] ss:$24 sps:$4 sm:$0xff]   ;;  %v5881_v10 = vld [vmem:[#allocation8 + $0x424] ss:$24 sps:$4 sm:$0xff]   ;;  %v5813_v11 = vld [vmem:[#allocation8 + $0x38] ss:$24 sps:$4 sm:$0xff]  }
 0x259   :  { %v5815_v8 = vld [vmem:[#allocation8 + $0x3c] ss:$24 sps:$4 sm:$0xff]   ;;  %v5846_v47 = vld [vmem:[#allocation8 + $0x218] ss:$24 sps:$4 sm:$0xff]  }
 0x25a   :  { %2076 = vmatpush1.bf16.msra.mxu1 %v5218_v5  ;;  %v5867_v5 = vld [vmem:[#allocation8 + $0x3c0] ss:$24 sps:$4 sm:$0xff]   ;;  %v5941_v54 = vld [vmem:[#allocation8 + $0x604] ss:$24 sps:$4 sm:$0xff]  }
 0x25b   :  { %2077 = vmatprep.subr.bf16.mxu1 %v5227_v9  ;;  %v5873_v9 = vld [vmem:[#allocation8 + $0x3f0] ss:$24 sps:$4 sm:$0xff]  }
 0x25e   :  { %2078 = vmatpush1.bf16.msra.mxu1 %v5226_v14  ;;  %v5887_v14 = vld [vmem:[#allocation8 + $0x454] ss:$24 sps:$4 sm:$0xff]  }
 0x25f   :  { %2079 = vmatprep.subr.bf16.mxu1 %v5235_v15  ;;  %v5816_v15 = vld [vmem:[#allocation8 + $0x68] ss:$24 sps:$4 sm:$0xff]  }
 0x261   :  { %v6347_v22 = vpop.eup %6346 }
 0x262   :  { %v5292_v23 = vadd.f32 -1.0, %v6347_v22  ;;  %2080 = vmatpush1.bf16.msra.mxu1 %v5234_v18  ;;  %v6349_v26 = vpop.eup %6348  ;;  %v5893_v18 = vld [vmem:[#allocation8 + $0x484] ss:$24 sps:$4 sm:$0xff]   ;;  %v5822_v22 = vld [vmem:[#allocation8 + $0xc8] ss:$24 sps:$4 sm:$0xff]  }
 0x263   :  { %2081 = vmatprep.subr.bf16.mxu1 %v5243_v19  ;;  %v5293_v29 = vadd.f32 -1.0, %v6349_v26  ;;  %v5824_v19 = vld [vmem:[#allocation8 + $0xcc] ss:$24 sps:$4 sm:$0xff]  }
 0x264   :  { %v2136_v28 = vmul.f32 1.6732632, %v5292_v23  ;;  %v5827_v23 = vld [vmem:[#allocation8 + $0xfc] ss:$24 sps:$4 sm:$0xff]  }
 0x265   :  { %v2137_v33 = vmul.f32 1.6732632, %v5293_v29  ;;  %v5905_v26 = vld [vmem:[#allocation8 + $0x4e4] ss:$24 sps:$4 sm:$0xff]   ;;  %v5903_v29 = vld [vmem:[#allocation8 + $0x4e0] ss:$24 sps:$4 sm:$0xff]  }
 0x266   :  { %v2144_v32 = vsel %vm2104_vm5, %v1851_v62, %v2136_v28  ;;  %2082 = vmatpush1.bf16.msra.mxu1 %v5242_v24  ;;  %v5291_v62 = vcombine.high %v491_v58, %v495_v59  ;;  %v5897_v24 = vld [vmem:[#allocation8 + $0x4b0] ss:$24 sps:$4 sm:$0xff]   ;;  %v5830_v28 = vld [vmem:[#allocation8 + $0x12c] ss:$24 sps:$4 sm:$0xff]  }
 0x267   :  { %2083 = vmatprep.subr.bf16.mxu1 %v5251_v27  ;;  %v2152_v36 = vmul.f32 1.050701, %v2144_v32  ;;  %v2145_v37 = vsel %vm2105_vm6, %v1853_v3, %v2137_v33  ;;  %v5812_v3 = vld [vmem:[#allocation8 + $0xc] ss:$24 sps:$4 sm:$0xff]   ;;  %v5825_v27 = vld [vmem:[#allocation8 + $0xf8] ss:$24 sps:$4 sm:$0xff]  }
 0x268   :  { %v2153_v40 = vmul.f32 1.050701, %v2145_v37  ;;  %v5833_v32 = vld [vmem:[#allocation8 + $0x15c] ss:$24 sps:$4 sm:$0xff]   ;;  %v5909_v33 = vld [vmem:[#allocation8 + $0x510] ss:$24 sps:$4 sm:$0xff]  }
 0x269   :  { %v6614_v45 = vpack.c.bf16 %v2152_v36, %v2152_v36  ;;  %v5836_v36 = vld [vmem:[#allocation8 + $0x18c] ss:$24 sps:$4 sm:$0xff]   ;;  %v5915_v37 = vld [vmem:[#allocation8 + $0x540] ss:$24 sps:$4 sm:$0xff]  }
 0x26a   :  { %2084 = vmatpush1.bf16.msra.mxu1 %v5250_v34  ;;  %v6612_v42 = vpack.c.bf16 %v2153_v40, %v2153_v40  ;;  %v5917_v34 = vld [vmem:[#allocation8 + $0x544] ss:$24 sps:$4 sm:$0xff]   ;;  %v5864_v59 = vld [vmem:[#allocation8 + $0x2a8] ss:$24 sps:$4 sm:$0xff]  }
 0x26b   :  { %2085 = vmatprep.subr.bf16.mxu1 %v5259_v35  ;;  %v5831_v35 = vld [vmem:[#allocation8 + $0x158] ss:$24 sps:$4 sm:$0xff]   ;;  %v5839_v40 = vld [vmem:[#allocation8 + $0x1bc] ss:$24 sps:$4 sm:$0xff]   ;;  %v5866_v58 = vld [vmem:[#allocation8 + $0x2ac] ss:$24 sps:$4 sm:$0xff]  }
 0x26c   :  { %4504 = vmatprep.mubr.bf16.mxu0 %v6612_v42 }
 0x26d   :  { %4505 = vmatmul.mubr.bf16.vlgmr.msra.gmra.mrb[8].mxu0 %v6614_v45 }
 0x26e   :  { %2086 = vmatpush1.bf16.msra.mxu1 %v5258_v41  ;;  %4514 = vmatpush1.bf16.msra.mxu0 %v5843_v44  ;;  %v5921_v41 = vld [vmem:[#allocation8 + $0x570] ss:$24 sps:$4 sm:$0xff]  }
 0x26f   :  { %2087 = vmatprep.subr.bf16.mxu1 %v5267_v43  ;;  %4515 = vmatprep.subr.bf16.mxu0 %v5851_v50  ;;  %v5929_v43 = vld [vmem:[#allocation8 + $0x5a4] ss:$24 sps:$4 sm:$0xff]   ;;  %v5837_v44 = vld [vmem:[#allocation8 + $0x1b8] ss:$24 sps:$4 sm:$0xff]   ;;  %v5935_v50 = vld [vmem:[#allocation8 + $0x5d4] ss:$24 sps:$4 sm:$0xff]  }
 0x272   :  { %2088 = vmatpush1.bf16.msra.mxu1 %v5266_v51  ;;  %4516 = vmatpush1.bf16.msra.mxu0 %v5849_v53  ;;  %v5840_v51 = vld [vmem:[#allocation8 + $0x1e8] ss:$24 sps:$4 sm:$0xff]  }
 0x273   :  { %2089 = vmatprep.subr.bf16.mxu1 %v5275_v52  ;;  %4517 = vmatprep.subr.bf16.mxu0 %v5857_v55  ;;  %v5848_v52 = vld [vmem:[#allocation8 + $0x21c] ss:$24 sps:$4 sm:$0xff]   ;;  %v5933_v53 = vld [vmem:[#allocation8 + $0x5d0] ss:$24 sps:$4 sm:$0xff]   ;;  %v5854_v55 = vld [vmem:[#allocation8 + $0x24c] ss:$24 sps:$4 sm:$0xff]  }
 0x276   :  { %2090 = vmatpush1.bf16.msra.mxu1 %v5274_v49  ;;  %4518 = vmatpush1.bf16.msra.mxu0 %v5855_v57  ;;  %v5852_v49 = vld [vmem:[#allocation8 + $0x248] ss:$24 sps:$4 sm:$0xff]   ;;  %v5858_v57 = vld [vmem:[#allocation8 + $0x278] ss:$24 sps:$4 sm:$0xff]  }
 0x277   :  { %2091 = vmatprep.subr.bf16.mxu1 %v5283_v56  ;;  %4519 = vmatprep.subr.bf16.mxu0 %v5863_v61  ;;  %v5860_v56 = vld [vmem:[#allocation8 + $0x27c] ss:$24 sps:$4 sm:$0xff]  }
 0x278   :  { %v5872_v61 = vld [vmem:[#allocation8 + $0x2dc] ss:$24 sps:$4 sm:$0xff]  }
 0x27a   :  { %2092 = vmatpush1.bf16.msra.mxu1 %v5282_v25  ;;  %4520 = vmatpush1.bf16.msra.mxu0 %v5861_v0  ;;  %v5870_v25 = vld [vmem:[#allocation8 + $0x2d8] ss:$24 sps:$4 sm:$0xff]   ;;  %v5876_v0 = vld [vmem:[#allocation8 + $0x308] ss:$24 sps:$4 sm:$0xff]  }
 0x27b   :  { %2093 = vmatprep.subr.bf16.mxu1 %v5291_v62  ;;  %4521 = vmatprep.subr.bf16.mxu0 %v5869_v1  ;;  %v5878_v62 = vld [vmem:[#allocation8 + $0x30c] ss:$24 sps:$4 sm:$0xff]   ;;  %v5884_v1 = vld [vmem:[#allocation8 + $0x33c] ss:$24 sps:$4 sm:$0xff]  }
 0x27e   :  { %2094 = vmatpush1.bf16.msra.mxu1 %v5290_v2  ;;  %4522 = vmatpush1.bf16.msra.mxu0 %v5867_v5  ;;  %v5882_v2 = vld [vmem:[#allocation8 + $0x338] ss:$24 sps:$4 sm:$0xff]   ;;  %v5888_v5 = vld [vmem:[#allocation8 + $0x368] ss:$24 sps:$4 sm:$0xff]  }
 0x27f   :  { %4636 = vmatprep.subr.bf16.mxu1 %v5812_v3  ;;  %4523 = vmatprep.subr.bf16.mxu0 %v5875_v6  ;;  %v5890_v3 = vld [vmem:[#allocation8 + $0x36c] ss:$24 sps:$4 sm:$0xff]   ;;  %v5896_v6 = vld [vmem:[#allocation8 + $0x39c] ss:$24 sps:$4 sm:$0xff]  }
 0x281   :  { %2096 = vmatmul.mubr.bf16.vlgmr.msra.gmra.mrb[12].mxu1 %v6597_v60  ;;  %v5819_v60 = vld [vmem:[#allocation8 + $0x98] ss:$24 sps:$4 sm:$0xff]  }
 0x282   :  { %4637 = vmatpush1.bf16.msra.mxu1 %v5810_v7  ;;  %4668 = vmatprep.mubr.bf16.mxu1 %v6612_v42  ;;  %v5894_v7 = vld [vmem:[#allocation8 + $0x398] ss:$24 sps:$4 sm:$0xff]  }
 0x283   :  { %4638 = vmatprep.subr.bf16.mxu1 %v5815_v8  ;;  %4524 = vmatpush1.bf16.msra.mxu0 %v5873_v9  ;;  %v5902_v8 = vld [vmem:[#allocation8 + $0x3cc] ss:$24 sps:$4 sm:$0xff]   ;;  %v2122_v9 = vmul.f32 1.442695, %v6610_v4 }
 0x284   :  { %4525 = vmatprep.subr.bf16.mxu0 %v5881_v10  ;;  %v5900_v10 = vld [vmem:[#allocation8 + $0x3c8] ss:$24 sps:$4 sm:$0xff]  }
 0x285   :  { %6350 = vpow2.f32 %v2122_v9  ;;  %v5977_v9 = vld [vmem:[#allocation8 + $0x724] ss:$24 sps:$4 sm:$0xff]  }
 0x286   :  { %4639 = vmatpush1.bf16.msra.mxu1 %v5813_v11  ;;  %v5908_v11 = vld [vmem:[#allocation8 + $0x3fc] ss:$24 sps:$4 sm:$0xff]  }
 0x287   :  { %4640 = vmatprep.subr.bf16.mxu1 %v5818_v12  ;;  %4526 = vmatpush1.bf16.msra.mxu0 %v5879_v13  ;;  %v5906_v12 = vld [vmem:[#allocation8 + $0x3f8] ss:$24 sps:$4 sm:$0xff]   ;;  %v5914_v13 = vld [vmem:[#allocation8 + $0x42c] ss:$24 sps:$4 sm:$0xff]  }
 0x288   :  { %4527 = vmatprep.subr.bf16.mxu0 %v5887_v14 }
 0x28a   :  { %4641 = vmatpush1.bf16.msra.mxu1 %v5816_v15 }
 0x28b   :  { %4642 = vmatprep.subr.bf16.mxu1 %v5821_v16  ;;  %4528 = vmatpush1.bf16.msra.mxu0 %v5885_v17 }
 0x28c   :  { %4529 = vmatprep.subr.bf16.mxu0 %v5893_v18 }
 0x28e   :  { %4643 = vmatpush1.bf16.msra.mxu1 %v5819_v60  ;;  %v5912_v60 = vld [vmem:[#allocation8 + $0x428] ss:$24 sps:$4 sm:$0xff]  }
 0x28f   :  { %4644 = vmatprep.subr.bf16.mxu1 %v5824_v19  ;;  %4530 = vmatpush1.bf16.msra.mxu0 %v5891_v20  ;;  %v5920_v20 = vld [vmem:[#allocation8 + $0x45c] ss:$24 sps:$4 sm:$0xff]  }
 0x290   :  { %4531 = vmatprep.subr.bf16.mxu0 %v5899_v21  ;;  %v6351_v21 = vpop.eup %6350 }
 0x292   :  { %4645 = vmatpush1.bf16.msra.mxu1 %v5822_v22  ;;  %v5918_v22 = vld [vmem:[#allocation8 + $0x458] ss:$24 sps:$4 sm:$0xff]  }
 0x293   :  { %4646 = vmatprep.subr.bf16.mxu1 %v5827_v23  ;;  %4532 = vmatpush1.bf16.msra.mxu0 %v5897_v24  ;;  %v5926_v23 = vld [vmem:[#allocation8 + $0x48c] ss:$24 sps:$4 sm:$0xff]   ;;  %v5297_v24 = vadd.f32 -1.0, %v6351_v21 }
 0x294   :  { %4533 = vmatprep.subr.bf16.mxu0 %v5905_v26  ;;  %v5924_v26 = vld [vmem:[#allocation8 + $0x488] ss:$24 sps:$4 sm:$0xff]   ;;  %v5995_v21 = vld [vmem:[#allocation8 + $0x7b4] ss:$24 sps:$4 sm:$0xff]  }
 0x296   :  { %4647 = vmatpush1.bf16.msra.mxu1 %v5825_v27  ;;  %v5932_v27 = vld [vmem:[#allocation8 + $0x4bc] ss:$24 sps:$4 sm:$0xff]  }
 0x297   :  { %4648 = vmatprep.subr.bf16.mxu1 %v5830_v28  ;;  %4534 = vmatpush1.bf16.msra.mxu0 %v5903_v29  ;;  %v2141_v29 = vmul.f32 1.6732632, %v5297_v24  ;;  %v5996_v24 = vld [vmem:[#allocation8 + $0x6c8] ss:$24 sps:$4 sm:$0xff]  }
 0x298   :  { %4535 = vmatprep.subr.bf16.mxu0 %v5911_v30 }
 0x29a   :  { %4649 = vmatpush1.bf16.msra.mxu1 %v5828_v31 }
 0x29b   :  { %4650 = vmatprep.subr.bf16.mxu1 %v5833_v32  ;;  %4536 = vmatpush1.bf16.msra.mxu0 %v5909_v33  ;;  %v5930_v32 = vld [vmem:[#allocation8 + $0x4b8] ss:$24 sps:$4 sm:$0xff]  }
 0x29c   :  { %4537 = vmatprep.subr.bf16.mxu0 %v5917_v34  ;;  %v5938_v34 = vld [vmem:[#allocation8 + $0x4ec] ss:$24 sps:$4 sm:$0xff]  }
 0x29e   :  { %4651 = vmatpush1.bf16.msra.mxu1 %v5831_v35 }
 0x29f   :  { %4652 = vmatprep.subr.bf16.mxu1 %v5836_v36  ;;  %4538 = vmatpush1.bf16.msra.mxu0 %v5915_v37  ;;  %v2149_v36 = vsel %vm2109_vm7, %v6610_v4, %v2141_v29  ;;  %v5947_v4 = vld [vmem:[#allocation8 + $0x634] ss:$24 sps:$4 sm:$0xff]   ;;  %v6002_v29 = vld [vmem:[#allocation8 + $0x6f8] ss:$24 sps:$4 sm:$0xff]  }
 0x2a0   :  { %4539 = vmatprep.subr.bf16.mxu0 %v5923_v38 }
 0x2a2   :  { %4653 = vmatpush1.bf16.msra.mxu1 %v5834_v39  ;;  %v5936_v39 = vld [vmem:[#allocation8 + $0x4e8] ss:$24 sps:$4 sm:$0xff]  }
 0x2a3   :  { %4654 = vmatprep.subr.bf16.mxu1 %v5839_v40  ;;  %4540 = vmatpush1.bf16.msra.mxu0 %v5921_v41 }
 0x2a4   :  { %4541 = vmatprep.subr.bf16.mxu0 %v5929_v43  ;;  %v5944_v43 = vld [vmem:[#allocation8 + $0x51c] ss:$24 sps:$4 sm:$0xff]  }
 0x2a6   :  { %4655 = vmatpush1.bf16.msra.mxu1 %v5837_v44  ;;  %v2157_v44 = vmul.f32 1.050701, %v2149_v36 }
 0x2a7   :  { %4656 = vmatprep.subr.bf16.mxu1 %v5842_v46  ;;  %4542 = vmatpush1.bf16.msra.mxu0 %v5927_v48 }
 0x2a8   :  { %4543 = vmatprep.subr.bf16.mxu0 %v5935_v50  ;;  %v5939_v50 = vld [vmem:[#allocation8 + $0x600] ss:$24 sps:$4 sm:$0xff]  }
 0x2aa   :  { %4657 = vmatpush1.bf16.msra.mxu1 %v5840_v51 }
 0x2ab   :  { %4658 = vmatprep.subr.bf16.mxu1 %v5848_v52  ;;  %4544 = vmatpush1.bf16.msra.mxu0 %v5933_v53  ;;  %v5942_v52 = vld [vmem:[#allocation8 + $0x518] ss:$24 sps:$4 sm:$0xff]   ;;  %v6630_v53 = vpack.c.bf16 %v2157_v44, %v2157_v44  ;;  %v6020_v44 = vld [vmem:[#allocation8 + $0x788] ss:$24 sps:$4 sm:$0xff]  }
 0x2ac   :  { %4554 = vmatprep.subr.bf16.mxu0 %v5941_v54  ;;  %v5950_v54 = vld [vmem:[#allocation8 + $0x54c] ss:$24 sps:$4 sm:$0xff]  }
 0x2ae   :  { %4659 = vmatpush1.bf16.msra.mxu1 %v5846_v47  ;;  %v5945_v47 = vld [vmem:[#allocation8 + $0x630] ss:$24 sps:$4 sm:$0xff]  }
 0x2af   :  { %4660 = vmatprep.subr.bf16.mxu1 %v5854_v55  ;;  %v5948_v55 = vld [vmem:[#allocation8 + $0x548] ss:$24 sps:$4 sm:$0xff]  }
 0x2b2   :  { %4661 = vmatpush1.bf16.msra.mxu1 %v5852_v49  ;;  %v5953_v49 = vld [vmem:[#allocation8 + $0x664] ss:$24 sps:$4 sm:$0xff]  }
 0x2b3   :  { %4662 = vmatprep.subr.bf16.mxu1 %v5860_v56  ;;  %v5956_v56 = vld [vmem:[#allocation8 + $0x57c] ss:$24 sps:$4 sm:$0xff]  }
 0x2b6   :  { %4663 = vmatpush1.bf16.msra.mxu1 %v5858_v57  ;;  %v5951_v57 = vld [vmem:[#allocation8 + $0x660] ss:$24 sps:$4 sm:$0xff]  }
 0x2b7   :  { %4664 = vmatprep.subr.bf16.mxu1 %v5866_v58  ;;  %v5954_v58 = vld [vmem:[#allocation8 + $0x578] ss:$24 sps:$4 sm:$0xff]  }
 0x2ba   :  { %4665 = vmatpush1.bf16.msra.mxu1 %v5864_v59  ;;  %v5959_v59 = vld [vmem:[#allocation8 + $0x694] ss:$24 sps:$4 sm:$0xff]  }
 0x2bb   :  { %4666 = vmatprep.subr.bf16.mxu1 %v5872_v61  ;;  %v5962_v61 = vld [vmem:[#allocation8 + $0x5ac] ss:$24 sps:$4 sm:$0xff]  }
 0x2be   :  { %4667 = vmatpush1.bf16.msra.mxu1 %v5870_v25  ;;  %v5957_v25 = vld [vmem:[#allocation8 + $0x690] ss:$24 sps:$4 sm:$0xff]  }
 0x2bf   :  { %4677 = vmatprep.subr.bf16.mxu1 %v5878_v62  ;;  %v5960_v62 = vld [vmem:[#allocation8 + $0x5a8] ss:$24 sps:$4 sm:$0xff]  }
 0x2c1   :  { %4669 = vmatmul.mubr.bf16.vlgmr.msra.gmra.mrb[16].mxu1 %v6614_v45 }
 0x2c2   :  { %4678 = vmatpush1.bf16.msra.mxu1 %v5876_v0  ;;  %v5965_v0 = vld [vmem:[#allocation8 + $0x6c4] ss:$24 sps:$4 sm:$0xff]  }
 0x2c3   :  { %4679 = vmatprep.subr.bf16.mxu1 %v5884_v1  ;;  %v5968_v1 = vld [vmem:[#allocation8 + $0x5dc] ss:$24 sps:$4 sm:$0xff]  }
 0x2c6   :  { %4680 = vmatpush1.bf16.msra.mxu1 %v5882_v2  ;;  %v5963_v2 = vld [vmem:[#allocation8 + $0x6c0] ss:$24 sps:$4 sm:$0xff]  }
 0x2c7   :  { %4681 = vmatprep.subr.bf16.mxu1 %v5890_v3  ;;  %v5966_v3 = vld [vmem:[#allocation8 + $0x5d8] ss:$24 sps:$4 sm:$0xff]  }
 0x2ca   :  { %4682 = vmatpush1.bf16.msra.mxu1 %v5888_v5  ;;  %v5971_v5 = vld [vmem:[#allocation8 + $0x6f4] ss:$24 sps:$4 sm:$0xff]  }
 0x2cb   :  { %4683 = vmatprep.subr.bf16.mxu1 %v5896_v6  ;;  %v5974_v6 = vld [vmem:[#allocation8 + $0x60c] ss:$24 sps:$4 sm:$0xff]  }
 0x2ce   :  { %4684 = vmatpush1.bf16.msra.mxu1 %v5894_v7  ;;  %v5969_v7 = vld [vmem:[#allocation8 + $0x6f0] ss:$24 sps:$4 sm:$0xff]  }
 0x2cf   :  { %4685 = vmatprep.subr.bf16.mxu1 %v5902_v8  ;;  %v5972_v8 = vld [vmem:[#allocation8 + $0x608] ss:$24 sps:$4 sm:$0xff]  }
 0x2d2   :  { %4686 = vmatpush1.bf16.msra.mxu1 %v5900_v10  ;;  %v5980_v10 = vld [vmem:[#allocation8 + $0x63c] ss:$24 sps:$4 sm:$0xff]  }
 0x2d3   :  { %4687 = vmatprep.subr.bf16.mxu1 %v5908_v11  ;;  %v5975_v11 = vld [vmem:[#allocation8 + $0x720] ss:$24 sps:$4 sm:$0xff]  }
 0x2d4   :  { %v1933_v14 = vpop.f32.mrb[8].mxu1 }
 0x2d5   :  { %v2116_v15 = vmul.f32 1.442695, %v1933_v14  ;;  %v1935_v16 = vpop.f32.mrb[9].mxu1  ;;  %vm2106_vm8 = vcmp.gt.f32.partialorder %v1933_v14, 0.0 }
 0x2d6   :  { %v2118_v17 = vmul.f32 1.442695, %v1935_v16  ;;  %v1937_v18 = vpop.f32.mrb[10].mxu1  ;;  %4688 = vmatpush1.bf16.msra.mxu1 %v5906_v12  ;;  %vm2107_vm9 = vcmp.gt.f32.partialorder %v1935_v16, 0.0  ;;  %v5978_v12 = vld [vmem:[#allocation8 + $0x638] ss:$24 sps:$4 sm:$0xff]  }
 0x2d7   :  { %6352 = vpow2.f32 %v2116_v15  ;;  %v1938_v19 = vpop.f32.mrb[11].mxu1  ;;  %4689 = vmatprep.subr.bf16.mxu1 %v5914_v13  ;;  %v5983_v13 = vld [vmem:[#allocation8 + $0x754] ss:$24 sps:$4 sm:$0xff]   ;;  %v5981_v15 = vld [vmem:[#allocation8 + $0x750] ss:$24 sps:$4 sm:$0xff]  }
 0x2d8   :  { %6354 = vpow2.f32 %v2118_v17  ;;  %v5989_v17 = vld [vmem:[#allocation8 + $0x784] ss:$24 sps:$4 sm:$0xff]   ;;  %v2120_v19 = vmul.f32 1.442695, %v6608_v63 }
 0x2d9   :  { %v5992_v18 = vld [vmem:[#allocation8 + $0x69c] ss:$24 sps:$4 sm:$0xff]  }
 0x2da   :  { %4690 = vmatpush1.bf16.msra.mxu1 %v5912_v60  ;;  %v5987_v60 = vld [vmem:[#allocation8 + $0x780] ss:$24 sps:$4 sm:$0xff]   ;;  %6356 = vpow2.f32 %v2120_v19 }
 0x2db   :  { %4691 = vmatprep.subr.bf16.mxu1 %v5920_v20  ;;  %v5990_v20 = vld [vmem:[#allocation8 + $0x698] ss:$24 sps:$4 sm:$0xff]   ;;  %v6068_v19 = vld [vmem:[#allocation8 + $0x908] ss:$24 sps:$4 sm:$0xff]  }
 0x2de   :  { %4692 = vmatpush1.bf16.msra.mxu1 %v5918_v22  ;;  %v5998_v22 = vld [vmem:[#allocation8 + $0x6cc] ss:$24 sps:$4 sm:$0xff]  }
 0x2df   :  { %4693 = vmatprep.subr.bf16.mxu1 %v5926_v23  ;;  %v5993_v23 = vld [vmem:[#allocation8 + $0x7b0] ss:$24 sps:$4 sm:$0xff]  }
 0x2e1   :  { %v6353_v28 = vpop.eup %6352 }
 0x2e2   :  { %v6355_v30 = vpop.eup %6354  ;;  %v5294_v31 = vadd.f32 -1.0, %v6353_v28  ;;  %4694 = vmatpush1.bf16.msra.mxu1 %v5924_v26  ;;  %v6001_v26 = vld [vmem:[#allocation8 + $0x7e4] ss:$24 sps:$4 sm:$0xff]   ;;  %v5999_v28 = vld [vmem:[#allocation8 + $0x7e0] ss:$24 sps:$4 sm:$0xff]  }
 0x2e3   :  { %v5295_v33 = vadd.f32 -1.0, %v6355_v30  ;;  %4695 = vmatprep.subr.bf16.mxu1 %v5932_v27  ;;  %v6004_v27 = vld [vmem:[#allocation8 + $0x6fc] ss:$24 sps:$4 sm:$0xff]  }
 0x2e4   :  { %v2138_v35 = vmul.f32 1.6732632, %v5294_v31  ;;  %v6007_v30 = vld [vmem:[#allocation8 + $0x814] ss:$24 sps:$4 sm:$0xff]   ;;  %v6357_v36 = vpop.eup %6356 }
 0x2e5   :  { %v2139_v37 = vmul.f32 1.6732632, %v5295_v33  ;;  %v6010_v31 = vld [vmem:[#allocation8 + $0x72c] ss:$24 sps:$4 sm:$0xff]   ;;  %v6008_v33 = vld [vmem:[#allocation8 + $0x728] ss:$24 sps:$4 sm:$0xff]  }
 0x2e6   :  { %v2146_v38 = vsel %vm2106_vm8, %v1933_v14, %v2138_v35  ;;  %4696 = vmatpush1.bf16.msra.mxu1 %v5930_v32  ;;  %v5986_v14 = vld [vmem:[#allocation8 + $0x66c] ss:$24 sps:$4 sm:$0xff]   ;;  %v6005_v32 = vld [vmem:[#allocation8 + $0x810] ss:$24 sps:$4 sm:$0xff]   ;;  %v6016_v35 = vld [vmem:[#allocation8 + $0x75c] ss:$24 sps:$4 sm:$0xff]  }
 0x2e7   :  { %v2154_v40 = vmul.f32 1.050701, %v2146_v38  ;;  %v2147_v41 = vsel %vm2107_vm9, %v1935_v16, %v2139_v37  ;;  %4697 = vmatprep.subr.bf16.mxu1 %v5938_v34  ;;  %v5984_v16 = vld [vmem:[#allocation8 + $0x668] ss:$24 sps:$4 sm:$0xff]   ;;  %v6013_v34 = vld [vmem:[#allocation8 + $0x844] ss:$24 sps:$4 sm:$0xff]  }
 0x2e8   :  { %v2155_v46 = vmul.f32 1.050701, %v2147_v41  ;;  %v6011_v37 = vld [vmem:[#allocation8 + $0x840] ss:$24 sps:$4 sm:$0xff]   ;;  %v6022_v41 = vld [vmem:[#allocation8 + $0x78c] ss:$24 sps:$4 sm:$0xff]  }
 0x2e9   :  { %v6626_v51 = vpack.c.bf16 %v2154_v40, %v2154_v40  ;;  %v6014_v38 = vld [vmem:[#allocation8 + $0x758] ss:$24 sps:$4 sm:$0xff]   ;;  %v5296_v40 = vadd.f32 -1.0, %v6357_v36  ;;  %v6092_v36 = vld [vmem:[#allocation8 + $0x9c8] ss:$24 sps:$4 sm:$0xff]  }
 0x2ea   :  { %4698 = vmatpush1.bf16.msra.mxu1 %v5936_v39  ;;  %v6624_v48 = vpack.c.bf16 %v2155_v46, %v2155_v46  ;;  %v6019_v39 = vld [vmem:[#allocation8 + $0x874] ss:$24 sps:$4 sm:$0xff]   ;;  %v6025_v46 = vld [vmem:[#allocation8 + $0x8a4] ss:$24 sps:$4 sm:$0xff]  }
 0x2eb   :  { %4699 = vmatprep.subr.bf16.mxu1 %v5944_v43  ;;  %v6017_v43 = vld [vmem:[#allocation8 + $0x870] ss:$24 sps:$4 sm:$0xff]  }
 0x2ec   :  { %4545 = vmatprep.mubr.bf16.mxu0 %v6624_v48  ;;  %4709 = vmatprep.mubr.bf16.mxu1 %v6624_v48 }
 0x2ed   :  { %4546 = vmatmul.mubr.bf16.vlgmr.msra.gmra.mrb[8].mxu0 %v6626_v51 }
 0x2ee   :  { %4555 = vmatpush1.bf16.msra.mxu0 %v5939_v50  ;;  %4586 = vmatprep.mubr.bf16.mxu0 %v6630_v53  ;;  %v2140_v50 = vmul.f32 1.6732632, %v5296_v40  ;;  %v6098_v40 = vld [vmem:[#allocation8 + $0x9f8] ss:$24 sps:$4 sm:$0xff]  }
 0x2ef   :  { %4700 = vmatpush1.bf16.msra.mxu1 %v5942_v52  ;;  %4556 = vmatprep.subr.bf16.mxu0 %v5947_v4  ;;  %v6028_v52 = vld [vmem:[#allocation8 + $0x7bc] ss:$24 sps:$4 sm:$0xff]   ;;  %v6023_v4 = vld [vmem:[#allocation8 + $0x8a0] ss:$24 sps:$4 sm:$0xff]  }
 0x2f0   :  { %4701 = vmatprep.subr.bf16.mxu1 %v5950_v54  ;;  %v6026_v54 = vld [vmem:[#allocation8 + $0x7b8] ss:$24 sps:$4 sm:$0xff]  }
 0x2f2   :  { %4557 = vmatpush1.bf16.msra.mxu0 %v5945_v47  ;;  %v6031_v47 = vld [vmem:[#allocation8 + $0x8d4] ss:$24 sps:$4 sm:$0xff]  }
 0x2f3   :  { %4702 = vmatpush1.bf16.msra.mxu1 %v5948_v55  ;;  %4558 = vmatprep.subr.bf16.mxu0 %v5953_v49  ;;  %v2148_v55 = vsel %vm2108_vm10, %v6608_v63, %v2140_v50  ;;  %v6034_v49 = vld [vmem:[#allocation8 + $0x7ec] ss:$24 sps:$4 sm:$0xff]  }
 0x2f4   :  { %4703 = vmatprep.subr.bf16.mxu1 %v5956_v56  ;;  %v6029_v56 = vld [vmem:[#allocation8 + $0x8d0] ss:$24 sps:$4 sm:$0xff]   ;;  %v6046_v63 = vld [vmem:[#allocation8 + $0x84c] ss:$24 sps:$4 sm:$0xff]  }
 0x2f6   :  { %4559 = vmatpush1.bf16.msra.mxu0 %v5951_v57  ;;  %v2156_v57 = vmul.f32 1.050701, %v2148_v55  ;;  %v6104_v55 = vld [vmem:[#allocation8 + $0xa28] ss:$24 sps:$4 sm:$0xff]  }
 0x2f7   :  { %4704 = vmatpush1.bf16.msra.mxu1 %v5954_v58  ;;  %4560 = vmatprep.subr.bf16.mxu0 %v5959_v59  ;;  %v6032_v58 = vld [vmem:[#allocation8 + $0x7e8] ss:$24 sps:$4 sm:$0xff]   ;;  %v6037_v59 = vld [vmem:[#allocation8 + $0x904] ss:$24 sps:$4 sm:$0xff]  }
 0x2f8   :  { %4705 = vmatprep.subr.bf16.mxu1 %v5962_v61  ;;  %v6040_v61 = vld [vmem:[#allocation8 + $0x81c] ss:$24 sps:$4 sm:$0xff]  }
 0x2fa   :  { %4561 = vmatpush1.bf16.msra.mxu0 %v5957_v25  ;;  %v6035_v25 = vld [vmem:[#allocation8 + $0x900] ss:$24 sps:$4 sm:$0xff]  }
 0x2fb   :  { %4706 = vmatpush1.bf16.msra.mxu1 %v5960_v62  ;;  %4562 = vmatprep.subr.bf16.mxu0 %v5965_v0  ;;  %v6639_v62 = vpack.c.bf16 %v2156_v57, %v2156_v57  ;;  %v6038_v0 = vld [vmem:[#allocation8 + $0x818] ss:$24 sps:$4 sm:$0xff]  }
 0x2fc   :  { %4707 = vmatprep.subr.bf16.mxu1 %v5968_v1  ;;  %v6043_v1 = vld [vmem:[#allocation8 + $0x934] ss:$24 sps:$4 sm:$0xff]   ;;  %v6107_v57 = vld [vmem:[#allocation8 + $0xb40] ss:$24 sps:$4 sm:$0xff]  }
 0x2fe   :  { %4563 = vmatpush1.bf16.msra.mxu0 %v5963_v2  ;;  %v6041_v2 = vld [vmem:[#allocation8 + $0x930] ss:$24 sps:$4 sm:$0xff]  }
 0x2ff   :  { %4708 = vmatpush1.bf16.msra.mxu1 %v5966_v3  ;;  %4564 = vmatprep.subr.bf16.mxu0 %v5971_v5  ;;  %v6044_v3 = vld [vmem:[#allocation8 + $0x848] ss:$24 sps:$4 sm:$0xff]   ;;  %v6049_v5 = vld [vmem:[#allocation8 + $0x964] ss:$24 sps:$4 sm:$0xff]  }
 0x300   :  { %4718 = vmatprep.subr.bf16.mxu1 %v5974_v6  ;;  %v6052_v6 = vld [vmem:[#allocation8 + $0x87c] ss:$24 sps:$4 sm:$0xff]  }
 0x302   :  { %4565 = vmatpush1.bf16.msra.mxu0 %v5969_v7  ;;  %4710 = vmatmul.mubr.bf16.vlgmr.msra.gmra.mrb[16].mxu1 %v6626_v51  ;;  %v6047_v7 = vld [vmem:[#allocation8 + $0x960] ss:$24 sps:$4 sm:$0xff]  }
 0x303   :  { %4719 = vmatpush1.bf16.msra.mxu1 %v5972_v8  ;;  %4750 = vmatprep.mubr.bf16.mxu1 %v6630_v53  ;;  %v6050_v8 = vld [vmem:[#allocation8 + $0x878] ss:$24 sps:$4 sm:$0xff]  }
 0x304   :  { %4566 = vmatprep.subr.bf16.mxu0 %v5977_v9  ;;  %4720 = vmatprep.subr.bf16.mxu1 %v5980_v10  ;;  %v6055_v9 = vld [vmem:[#allocation8 + $0x994] ss:$24 sps:$4 sm:$0xff]  }
 0x305   :  { %v6058_v10 = vld [vmem:[#allocation8 + $0x8ac] ss:$24 sps:$4 sm:$0xff]  }
 0x306   :  { %4567 = vmatpush1.bf16.msra.mxu0 %v5975_v11  ;;  %v6053_v11 = vld [vmem:[#allocation8 + $0x990] ss:$24 sps:$4 sm:$0xff]  }
 0x307   :  { %4721 = vmatpush1.bf16.msra.mxu1 %v5978_v12  ;;  %4568 = vmatprep.subr.bf16.mxu0 %v5983_v13  ;;  %v6056_v12 = vld [vmem:[#allocation8 + $0x8a8] ss:$24 sps:$4 sm:$0xff]   ;;  %v6061_v13 = vld [vmem:[#allocation8 + $0x9c4] ss:$24 sps:$4 sm:$0xff]  }
 0x308   :  { %4722 = vmatprep.subr.bf16.mxu1 %v5986_v14  ;;  %v6064_v14 = vld [vmem:[#allocation8 + $0x8dc] ss:$24 sps:$4 sm:$0xff]  }
 0x30a   :  { %4569 = vmatpush1.bf16.msra.mxu0 %v5981_v15  ;;  %v6059_v15 = vld [vmem:[#allocation8 + $0x9c0] ss:$24 sps:$4 sm:$0xff]  }
 0x30b   :  { %4723 = vmatpush1.bf16.msra.mxu1 %v5984_v16  ;;  %4570 = vmatprep.subr.bf16.mxu0 %v5989_v17  ;;  %v6062_v16 = vld [vmem:[#allocation8 + $0x8d8] ss:$24 sps:$4 sm:$0xff]   ;;  %v6067_v17 = vld [vmem:[#allocation8 + $0x9f4] ss:$24 sps:$4 sm:$0xff]  }
 0x30c   :  { %4724 = vmatprep.subr.bf16.mxu1 %v5992_v18  ;;  %v6070_v18 = vld [vmem:[#allocation8 + $0x90c] ss:$24 sps:$4 sm:$0xff]  }
 0x30e   :  { %4571 = vmatpush1.bf16.msra.mxu0 %v5987_v60  ;;  %v6065_v60 = vld [vmem:[#allocation8 + $0x9f0] ss:$24 sps:$4 sm:$0xff]  }
 0x30f   :  { %4725 = vmatpush1.bf16.msra.mxu1 %v5990_v20  ;;  %4572 = vmatprep.subr.bf16.mxu0 %v5995_v21  ;;  %v6073_v20 = vld [vmem:[#allocation8 + $0xa24] ss:$24 sps:$4 sm:$0xff]  }
 0x310   :  { %4726 = vmatprep.subr.bf16.mxu1 %v5998_v22  ;;  %v6076_v21 = vld [vmem:[#allocation8 + $0x93c] ss:$24 sps:$4 sm:$0xff]   ;;  %v6071_v22 = vld [vmem:[#allocation8 + $0xa20] ss:$24 sps:$4 sm:$0xff]  }
 0x312   :  { %4573 = vmatpush1.bf16.msra.mxu0 %v5993_v23  ;;  %v6074_v23 = vld [vmem:[#allocation8 + $0x938] ss:$24 sps:$4 sm:$0xff]  }
 0x313   :  { %4727 = vmatpush1.bf16.msra.mxu1 %v5996_v24  ;;  %4574 = vmatprep.subr.bf16.mxu0 %v6001_v26  ;;  %v6079_v24 = vld [vmem:[#allocation8 + $0xa54] ss:$24 sps:$4 sm:$0xff]  }
 0x314   :  { %4728 = vmatprep.subr.bf16.mxu1 %v6004_v27  ;;  %v6082_v26 = vld [vmem:[#allocation8 + $0x96c] ss:$24 sps:$4 sm:$0xff]   ;;  %v6077_v27 = vld [vmem:[#allocation8 + $0xa50] ss:$24 sps:$4 sm:$0xff]  }
 0x316   :  { %4575 = vmatpush1.bf16.msra.mxu0 %v5999_v28  ;;  %v6080_v28 = vld [vmem:[#allocation8 + $0x968] ss:$24 sps:$4 sm:$0xff]  }
 0x317   :  { %4729 = vmatpush1.bf16.msra.mxu1 %v6002_v29  ;;  %4576 = vmatprep.subr.bf16.mxu0 %v6007_v30  ;;  %v6085_v29 = vld [vmem:[#allocation8 + $0xa84] ss:$24 sps:$4 sm:$0xff]  }
 0x318   :  { %4730 = vmatprep.subr.bf16.mxu1 %v6010_v31  ;;  %v6088_v30 = vld [vmem:[#allocation8 + $0x99c] ss:$24 sps:$4 sm:$0xff]   ;;  %v6083_v31 = vld [vmem:[#allocation8 + $0xa80] ss:$24 sps:$4 sm:$0xff]  }
 0x31a   :  { %4577 = vmatpush1.bf16.msra.mxu0 %v6005_v32  ;;  %v6086_v32 = vld [vmem:[#allocation8 + $0x998] ss:$24 sps:$4 sm:$0xff]  }
 0x31b   :  { %4731 = vmatpush1.bf16.msra.mxu1 %v6008_v33  ;;  %4578 = vmatprep.subr.bf16.mxu0 %v6013_v34  ;;  %v6091_v33 = vld [vmem:[#allocation8 + $0xab4] ss:$24 sps:$4 sm:$0xff]  }
 0x31c   :  { %4732 = vmatprep.subr.bf16.mxu1 %v6016_v35  ;;  %v6094_v34 = vld [vmem:[#allocation8 + $0x9cc] ss:$24 sps:$4 sm:$0xff]   ;;  %v6089_v35 = vld [vmem:[#allocation8 + $0xab0] ss:$24 sps:$4 sm:$0xff]  }
 0x31e   :  { %4579 = vmatpush1.bf16.msra.mxu0 %v6011_v37  ;;  %v6097_v37 = vld [vmem:[#allocation8 + $0xae4] ss:$24 sps:$4 sm:$0xff]  }
 0x31f   :  { %4733 = vmatpush1.bf16.msra.mxu1 %v6014_v38  ;;  %4580 = vmatprep.subr.bf16.mxu0 %v6019_v39  ;;  %v6100_v38 = vld [vmem:[#allocation8 + $0x9fc] ss:$24 sps:$4 sm:$0xff]   ;;  %v6095_v39 = vld [vmem:[#allocation8 + $0xae0] ss:$24 sps:$4 sm:$0xff]  }
 0x320   :  { %4734 = vmatprep.subr.bf16.mxu1 %v6022_v41  ;;  %v6103_v41 = vld [vmem:[#allocation8 + $0xb14] ss:$24 sps:$4 sm:$0xff]  }
 0x322   :  { %4581 = vmatpush1.bf16.msra.mxu0 %v6017_v43 }
 0x323   :  { %4735 = vmatpush1.bf16.msra.mxu1 %v6020_v44  ;;  %4582 = vmatprep.subr.bf16.mxu0 %v6025_v46  ;;  %v6106_v44 = vld [vmem:[#allocation8 + $0xa2c] ss:$24 sps:$4 sm:$0xff]  }
 0x324   :  { %4736 = vmatprep.subr.bf16.mxu1 %v6028_v52 }
 0x326   :  { %4583 = vmatpush1.bf16.msra.mxu0 %v6023_v4 }
 0x327   :  { %4737 = vmatpush1.bf16.msra.mxu1 %v6026_v54  ;;  %4584 = vmatprep.subr.bf16.mxu0 %v6031_v47  ;;  %v6101_v54 = vld [vmem:[#allocation8 + $0xb10] ss:$24 sps:$4 sm:$0xff]  }
 0x328   :  { %4738 = vmatprep.subr.bf16.mxu1 %v6034_v49  ;;  %v6109_v49 = vld [vmem:[#allocation8 + $0xb44] ss:$24 sps:$4 sm:$0xff]  }
 0x32a   :  { %4585 = vmatpush1.bf16.msra.mxu0 %v6029_v56  ;;  %v6112_v56 = vld [vmem:[#allocation8 + $0xa5c] ss:$24 sps:$4 sm:$0xff]  }
 0x32b   :  { %4739 = vmatpush1.bf16.msra.mxu1 %v6032_v58  ;;  %4595 = vmatprep.subr.bf16.mxu0 %v6037_v59  ;;  %v6110_v58 = vld [vmem:[#allocation8 + $0xa58] ss:$24 sps:$4 sm:$0xff]   ;;  %v6115_v59 = vld [vmem:[#allocation8 + $0xb74] ss:$24 sps:$4 sm:$0xff]  }
 0x32c   :  { %4740 = vmatprep.subr.bf16.mxu1 %v6040_v61  ;;  %v6118_v61 = vld [vmem:[#allocation8 + $0xa8c] ss:$24 sps:$4 sm:$0xff]  }
 0x32d   :  { %4587 = vmatmul.mubr.bf16.vlgmr.msra.gmra.mrb[8].mxu0 %v6639_v62 }
 0x32e   :  { %4596 = vmatpush1.bf16.msra.mxu0 %v6035_v25  ;;  %v6113_v25 = vld [vmem:[#allocation8 + $0xb70] ss:$24 sps:$4 sm:$0xff]  }
 0x32f   :  { %4741 = vmatpush1.bf16.msra.mxu1 %v6038_v0  ;;  %4597 = vmatprep.subr.bf16.mxu0 %v6043_v1  ;;  %v6116_v0 = vld [vmem:[#allocation8 + $0xa88] ss:$24 sps:$4 sm:$0xff]   ;;  %v6121_v1 = vld [vmem:[#allocation8 + $0xba4] ss:$24 sps:$4 sm:$0xff]  }
 0x330   :  { %4742 = vmatprep.subr.bf16.mxu1 %v6046_v63  ;;  %v6124_v63 = vld [vmem:[#allocation8 + $0xabc] ss:$24 sps:$4 sm:$0xff]  }
 0x332   :  { %4598 = vmatpush1.bf16.msra.mxu0 %v6041_v2 }
 0x333   :  { %4743 = vmatpush1.bf16.msra.mxu1 %v6044_v3  ;;  %4599 = vmatprep.subr.bf16.mxu0 %v6049_v5 }
 0x334   :  { %4744 = vmatprep.subr.bf16.mxu1 %v6052_v6  ;;  %v6119_v6 = vld [vmem:[#allocation8 + $0xba0] ss:$24 sps:$4 sm:$0xff]  }
 0x336   :  { %4600 = vmatpush1.bf16.msra.mxu0 %v6047_v7 }
 0x337   :  { %4745 = vmatpush1.bf16.msra.mxu1 %v6050_v8  ;;  %4601 = vmatprep.subr.bf16.mxu0 %v6055_v9  ;;  %v6122_v8 = vld [vmem:[#allocation8 + $0xab8] ss:$24 sps:$4 sm:$0xff]   ;;  %v6127_v9 = vld [vmem:[#allocation8 + $0xbd4] ss:$24 sps:$4 sm:$0xff]  }
 0x338   :  { %4746 = vmatprep.subr.bf16.mxu1 %v6058_v10 }
 0x33a   :  { %4602 = vmatpush1.bf16.msra.mxu0 %v6053_v11  ;;  %v6130_v11 = vld [vmem:[#allocation8 + $0xaec] ss:$24 sps:$4 sm:$0xff]  }
 0x33b   :  { %4747 = vmatpush1.bf16.msra.mxu1 %v6056_v12  ;;  %4603 = vmatprep.subr.bf16.mxu0 %v6061_v13 }
 0x33c   :  { %4748 = vmatprep.subr.bf16.mxu1 %v6064_v14  ;;  %v6125_v14 = vld [vmem:[#allocation8 + $0xbd0] ss:$24 sps:$4 sm:$0xff]  }
 0x33e   :  { %4604 = vmatpush1.bf16.msra.mxu0 %v6059_v15 }
 0x33f   :  { %4749 = vmatpush1.bf16.msra.mxu1 %v6062_v16  ;;  %4605 = vmatprep.subr.bf16.mxu0 %v6067_v17  ;;  %v6128_v17 = vld [vmem:[#allocation8 + $0xae8] ss:$24 sps:$4 sm:$0xff]  }
 0x340   :  { %4759 = vmatprep.subr.bf16.mxu1 %v6070_v18  ;;  %v6133_v18 = vld [vmem:[#allocation8 + $0x14] ss:$24 sps:$4 sm:$0xff]  }
 0x342   :  { %4606 = vmatpush1.bf16.msra.mxu0 %v6065_v60  ;;  %4751 = vmatmul.mubr.bf16.vlgmr.msra.gmra.mrb[16].mxu1 %v6639_v62 }
 0x343   :  { %4760 = vmatpush1.bf16.msra.mxu1 %v6068_v19  ;;  %4607 = vmatprep.subr.bf16.mxu0 %v6073_v20  ;;  %v6136_v19 = vld [vmem:[#allocation8 + $0xb1c] ss:$24 sps:$4 sm:$0xff]  }
 0x344   :  { %4761 = vmatprep.subr.bf16.mxu1 %v6076_v21  ;;  %v6131_v21 = vld [vmem:[#allocation8 + $0x10] ss:$24 sps:$4 sm:$0xff]  }
 0x346   :  { %4608 = vmatpush1.bf16.msra.mxu0 %v6071_v22 }
 0x347   :  { %4762 = vmatpush1.bf16.msra.mxu1 %v6074_v23  ;;  %4609 = vmatprep.subr.bf16.mxu0 %v6079_v24  ;;  %v6134_v23 = vld [vmem:[#allocation8 + $0xb18] ss:$24 sps:$4 sm:$0xff]   ;;  %v6139_v24 = vld [vmem:[#allocation8 + $0x44] ss:$24 sps:$4 sm:$0xff]  }
 0x348   :  { %4763 = vmatprep.subr.bf16.mxu1 %v6082_v26  ;;  %v6142_v26 = vld [vmem:[#allocation8 + $0xb4c] ss:$24 sps:$4 sm:$0xff]  }
 0x34a   :  { %4610 = vmatpush1.bf16.msra.mxu0 %v6077_v27  ;;  %v6137_v27 = vld [vmem:[#allocation8 + $0x40] ss:$24 sps:$4 sm:$0xff]  }
 0x34b   :  { %4764 = vmatpush1.bf16.msra.mxu1 %v6080_v28  ;;  %4611 = vmatprep.subr.bf16.mxu0 %v6085_v29  ;;  %v6140_v28 = vld [vmem:[#allocation8 + $0xb48] ss:$24 sps:$4 sm:$0xff]   ;;  %v6145_v29 = vld [vmem:[#allocation8 + $0x74] ss:$24 sps:$4 sm:$0xff]  }
 0x34c   :  { %4765 = vmatprep.subr.bf16.mxu1 %v6088_v30  ;;  %v6148_v30 = vld [vmem:[#allocation8 + $0xb7c] ss:$24 sps:$4 sm:$0xff]  }
 0x34e   :  { %4612 = vmatpush1.bf16.msra.mxu0 %v6083_v31  ;;  %v6143_v31 = vld [vmem:[#allocation8 + $0x70] ss:$24 sps:$4 sm:$0xff]  }
 0x34f   :  { %4766 = vmatpush1.bf16.msra.mxu1 %v6086_v32  ;;  %4613 = vmatprep.subr.bf16.mxu0 %v6091_v33  ;;  %v6146_v32 = vld [vmem:[#allocation8 + $0xb78] ss:$24 sps:$4 sm:$0xff]   ;;  %v6151_v33 = vld [vmem:[#allocation8 + $0xa4] ss:$24 sps:$4 sm:$0xff]  }
 0x350   :  { %4767 = vmatprep.subr.bf16.mxu1 %v6094_v34  ;;  %v6154_v34 = vld [vmem:[#allocation8 + $0xbac] ss:$24 sps:$4 sm:$0xff]  }
 0x352   :  { %4614 = vmatpush1.bf16.msra.mxu0 %v6089_v35  ;;  %v6149_v35 = vld [vmem:[#allocation8 + $0xa0] ss:$24 sps:$4 sm:$0xff]  }
 0x353   :  { %4768 = vmatpush1.bf16.msra.mxu1 %v6092_v36  ;;  %4615 = vmatprep.subr.bf16.mxu0 %v6097_v37  ;;  %v6157_v36 = vld [vmem:[#allocation8 + $0xd4] ss:$24 sps:$4 sm:$0xff]  }
 0x354   :  { %v2097_v43 = vpop.f32.mrb[12].mxu1  ;;  %4769 = vmatprep.subr.bf16.mxu1 %v6100_v38  ;;  %v6160_v37 = vld [vmem:[#allocation8 + $0xbdc] ss:$24 sps:$4 sm:$0xff]   ;;  %v6155_v38 = vld [vmem:[#allocation8 + $0xd0] ss:$24 sps:$4 sm:$0xff]  }
 0x355   :  { %v2124_v46 = vmul.f32 1.442695, %v2097_v43  ;;  %v2099_v50 = vpop.f32.mrb[13].mxu1  ;;  %vm2110_vm11 = vcmp.gt.f32.partialorder %v2097_v43, 0.0 }
 0x356   :  { %v2126_v52 = vmul.f32 1.442695, %v2099_v50  ;;  %4616 = vmatpush1.bf16.msra.mxu0 %v6095_v39  ;;  %v2101_v4 = vpop.f32.mrb[14].mxu1  ;;  %vm2111_vm12 = vcmp.gt.f32.partialorder %v2099_v50, 0.0  ;;  %v6158_v39 = vld [vmem:[#allocation8 + $0xbd8] ss:$24 sps:$4 sm:$0xff]  }
 0x357   :  { %6358 = vpow2.f32 %v2124_v46  ;;  %4770 = vmatpush1.bf16.msra.mxu1 %v6098_v40  ;;  %v2102_v47 = vpop.f32.mrb[15].mxu1  ;;  %4617 = vmatprep.subr.bf16.mxu0 %v6103_v41  ;;  %v6163_v40 = vld [vmem:[#allocation8 + $0x104] ss:$24 sps:$4 sm:$0xff]   ;;  %v6161_v41 = vld [vmem:[#allocation8 + $0x100] ss:$24 sps:$4 sm:$0xff]  }
 0x358   :  { %6360 = vpow2.f32 %v2126_v52  ;;  %4771 = vmatprep.subr.bf16.mxu1 %v6106_v44  ;;  %v6164_v44 = vld [vmem:[#allocation8 + $0x130] ss:$24 sps:$4 sm:$0xff]   ;;  %v6169_v46 = vld [vmem:[#allocation8 + $0x164] ss:$24 sps:$4 sm:$0xff]   ;;  %v6172_v52 = vld [vmem:[#allocation8 + $0x194] ss:$24 sps:$4 sm:$0xff]  }
 0x359   :  { %v6170_v4 = vld [vmem:[#allocation8 + $0x190] ss:$24 sps:$4 sm:$0xff]   ;;  %v6173_v47 = vld [vmem:[#allocation8 + $0x1c0] ss:$24 sps:$4 sm:$0xff]  }
 0x35a   :  { %4618 = vmatpush1.bf16.msra.mxu0 %v6101_v54  ;;  %v6175_v54 = vld [vmem:[#allocation8 + $0x1c4] ss:$24 sps:$4 sm:$0xff]  }
 0x35b   :  { %4772 = vmatpush1.bf16.msra.mxu1 %v6104_v55  ;;  %4619 = vmatprep.subr.bf16.mxu0 %v6109_v49  ;;  %v6178_v55 = vld [vmem:[#allocation8 + $0x1f4] ss:$24 sps:$4 sm:$0xff]   ;;  %v6176_v49 = vld [vmem:[#allocation8 + $0x1f0] ss:$24 sps:$4 sm:$0xff]  }
 0x35c   :  { %4773 = vmatprep.subr.bf16.mxu1 %v6112_v56  ;;  %v6181_v56 = vld [vmem:[#allocation8 + $0x224] ss:$24 sps:$4 sm:$0xff]  }
 0x35e   :  { %4620 = vmatpush1.bf16.msra.mxu0 %v6107_v57  ;;  %v6179_v57 = vld [vmem:[#allocation8 + $0x220] ss:$24 sps:$4 sm:$0xff]  }
 0x35f   :  { %4774 = vmatpush1.bf16.msra.mxu1 %v6110_v58  ;;  %4621 = vmatprep.subr.bf16.mxu0 %v6115_v59  ;;  %v6184_v58 = vld [vmem:[#allocation8 + $0x254] ss:$24 sps:$4 sm:$0xff]   ;;  %v6182_v59 = vld [vmem:[#allocation8 + $0x250] ss:$24 sps:$4 sm:$0xff]  }
 0x360   :  { %4775 = vmatprep.subr.bf16.mxu1 %v6118_v61  ;;  %v6187_v61 = vld [vmem:[#allocation8 + $0x284] ss:$24 sps:$4 sm:$0xff]  }
 0x361   :  { %v6359_v2 = vpop.eup %6358 }
 0x362   :  { %v6361_v3 = vpop.eup %6360  ;;  %v5298_v5 = vadd.f32 -1.0, %v6359_v2  ;;  %4622 = vmatpush1.bf16.msra.mxu0 %v6113_v25  ;;  %v6185_v25 = vld [vmem:[#allocation8 + $0x280] ss:$24 sps:$4 sm:$0xff]  }
 0x363   :  { %v5299_v7 = vadd.f32 -1.0, %v6361_v3  ;;  %4776 = vmatpush1.bf16.msra.mxu1 %v6116_v0  ;;  %4623 = vmatprep.subr.bf16.mxu0 %v6121_v1  ;;  %v6190_v0 = vld [vmem:[#allocation8 + $0x2b4] ss:$24 sps:$4 sm:$0xff]   ;;  %v6188_v1 = vld [vmem:[#allocation8 + $0x2b0] ss:$24 sps:$4 sm:$0xff]  }
 0x364   :  { %v2142_v10 = vmul.f32 1.6732632, %v5298_v5  ;;  %4777 = vmatprep.subr.bf16.mxu1 %v6124_v63  ;;  %v6193_v63 = vld [vmem:[#allocation8 + $0x2e4] ss:$24 sps:$4 sm:$0xff]   ;;  %v6191_v2 = vld [vmem:[#allocation8 + $0x2e0] ss:$24 sps:$4 sm:$0xff]  }
 0x365   :  { %v2143_v12 = vmul.f32 1.6732632, %v5299_v7  ;;  %v6196_v3 = vld [vmem:[#allocation8 + $0x314] ss:$24 sps:$4 sm:$0xff]   ;;  %v6194_v5 = vld [vmem:[#allocation8 + $0x310] ss:$24 sps:$4 sm:$0xff]  }
 0x366   :  { %v2150_v13 = vsel %vm2110_vm11, %v2097_v43, %v2142_v10  ;;  %4624 = vmatpush1.bf16.msra.mxu0 %v6119_v6  ;;  %v6166_v43 = vld [vmem:[#allocation8 + $0x134] ss:$24 sps:$4 sm:$0xff]   ;;  %v6199_v6 = vld [vmem:[#allocation8 + $0x344] ss:$24 sps:$4 sm:$0xff]   ;;  %v6197_v7 = vld [vmem:[#allocation8 + $0x340] ss:$24 sps:$4 sm:$0xff]  }
 0x367   :  { %v2158_v15 = vmul.f32 1.050701, %v2150_v13  ;;  %v2151_v16 = vsel %vm2111_vm12, %v2099_v50, %v2143_v12  ;;  %4778 = vmatpush1.bf16.msra.mxu1 %v6122_v8  ;;  %4625 = vmatprep.subr.bf16.mxu0 %v6127_v9  ;;  %v6167_v50 = vld [vmem:[#allocation8 + $0x160] ss:$24 sps:$4 sm:$0xff]   ;;  %v6202_v8 = vld [vmem:[#allocation8 + $0x374] ss:$24 sps:$4 sm:$0xff]  }
 0x368   :  { %v2159_v60 = vmul.f32 1.050701, %v2151_v16  ;;  %4779 = vmatprep.subr.bf16.mxu1 %v6130_v11  ;;  %v6200_v9 = vld [vmem:[#allocation8 + $0x370] ss:$24 sps:$4 sm:$0xff]   ;;  %v6205_v10 = vld [vmem:[#allocation8 + $0x3a4] ss:$24 sps:$4 sm:$0xff]  }
 0x369   :  { %v6645_v22 = vpack.c.bf16 %v2158_v15, %v2158_v15  ;;  %v6203_v11 = vld [vmem:[#allocation8 + $0x3a0] ss:$24 sps:$4 sm:$0xff]   ;;  %v6208_v12 = vld [vmem:[#allocation8 + $0x3d4] ss:$24 sps:$4 sm:$0xff]   ;;  %v6206_v13 = vld [vmem:[#allocation8 + $0x3d0] ss:$24 sps:$4 sm:$0xff]  }
 0x36a   :  { %4626 = vmatpush1.bf16.msra.mxu0 %v6125_v14  ;;  %v6643_v20 = vpack.c.bf16 %v2159_v60, %v2159_v60  ;;  %v6211_v14 = vld [vmem:[#allocation8 + $0x404] ss:$24 sps:$4 sm:$0xff]   ;;  %v6214_v15 = vld [vmem:[#allocation8 + $0x434] ss:$24 sps:$4 sm:$0xff]   ;;  %v6218_v60 = vld [vmem:[#allocation8 + $0x490] ss:$24 sps:$4 sm:$0xff]  }
 0x36b   :  { %4780 = vmatpush1.bf16.msra.mxu1 %v6128_v17  ;;  %4800 = vmatprep.subr.bf16.mxu0 %v6133_v18  ;;  %v6217_v16 = vld [vmem:[#allocation8 + $0x464] ss:$24 sps:$4 sm:$0xff]   ;;  %v6215_v17 = vld [vmem:[#allocation8 + $0x460] ss:$24 sps:$4 sm:$0xff]   ;;  %v6220_v18 = vld [vmem:[#allocation8 + $0x494] ss:$24 sps:$4 sm:$0xff]  }
 0x36c   :  { %4627 = vmatprep.mubr.bf16.mxu0 %v6643_v20  ;;  %4791 = vmatprep.mubr.bf16.mxu1 %v6643_v20 }
 0x36d   :  { %4628 = vmatmul.mubr.bf16.vlgmr.msra.gmra.mrb[8].mxu0 %v6645_v22  ;;  %4781 = vmatprep.subr.bf16.mxu1 %v6136_v19  ;;  %v6223_v19 = vld [vmem:[#allocation8 + $0x4c4] ss:$24 sps:$4 sm:$0xff]  }
 0x36e   :  { %4801 = vmatpush1.bf16.msra.mxu0 %v6131_v21  ;;  %4832 = vmatprep.mubr.bf16.mxu0 %v6612_v42  ;;  %v6152_v42 = vld [vmem:[#allocation8 + $0xba8] ss:$24 sps:$4 sm:$0xff]  }
 0x36f   :  { %4782 = vmatpush1.bf16.msra.mxu1 %v6134_v23  ;;  %4802 = vmatprep.subr.bf16.mxu0 %v6139_v24  ;;  %v6221_v21 = vld [vmem:[#allocation8 + $0x4c0] ss:$24 sps:$4 sm:$0xff]   ;;  %v6226_v23 = vld [vmem:[#allocation8 + $0x4f4] ss:$24 sps:$4 sm:$0xff]   ;;  %v6224_v24 = vld [vmem:[#allocation8 + $0x4f0] ss:$24 sps:$4 sm:$0xff]  }
 0x370   :  { %4783 = vmatprep.subr.bf16.mxu1 %v6142_v26  ;;  %v6229_v26 = vld [vmem:[#allocation8 + $0x524] ss:$24 sps:$4 sm:$0xff]  }
 0x372   :  { %4803 = vmatpush1.bf16.msra.mxu0 %v6137_v27  ;;  %v6227_v27 = vld [vmem:[#allocation8 + $0x520] ss:$24 sps:$4 sm:$0xff]  }
 0x373   :  { %4784 = vmatpush1.bf16.msra.mxu1 %v6140_v28  ;;  %4804 = vmatprep.subr.bf16.mxu0 %v6145_v29  ;;  %v6232_v28 = vld [vmem:[#allocation8 + $0x554] ss:$24 sps:$4 sm:$0xff]   ;;  %v6230_v29 = vld [vmem:[#allocation8 + $0x550] ss:$24 sps:$4 sm:$0xff]  }
 0x374   :  { %4785 = vmatprep.subr.bf16.mxu1 %v6148_v30  ;;  %v6235_v30 = vld [vmem:[#allocation8 + $0x584] ss:$24 sps:$4 sm:$0xff]  }
 0x376   :  { %4805 = vmatpush1.bf16.msra.mxu0 %v6143_v31  ;;  %v6233_v31 = vld [vmem:[#allocation8 + $0x580] ss:$24 sps:$4 sm:$0xff]  }
 0x377   :  { %4786 = vmatpush1.bf16.msra.mxu1 %v6146_v32  ;;  %4806 = vmatprep.subr.bf16.mxu0 %v6151_v33  ;;  %v6238_v32 = vld [vmem:[#allocation8 + $0x5b4] ss:$24 sps:$4 sm:$0xff]   ;;  %v6236_v33 = vld [vmem:[#allocation8 + $0x5b0] ss:$24 sps:$4 sm:$0xff]  }
 0x378   :  { %4787 = vmatprep.subr.bf16.mxu1 %v6154_v34  ;;  %v6241_v34 = vld [vmem:[#allocation8 + $0x5e4] ss:$24 sps:$4 sm:$0xff]  }
 0x37a   :  { %4807 = vmatpush1.bf16.msra.mxu0 %v6149_v35  ;;  %v6239_v35 = vld [vmem:[#allocation8 + $0x5e0] ss:$24 sps:$4 sm:$0xff]  }
 0x37b   :  { %4788 = vmatpush1.bf16.msra.mxu1 %v6152_v42  ;;  %4808 = vmatprep.subr.bf16.mxu0 %v6157_v36  ;;  %v6244_v42 = vld [vmem:[#allocation8 + $0x614] ss:$24 sps:$4 sm:$0xff]   ;;  %v6242_v36 = vld [vmem:[#allocation8 + $0x610] ss:$24 sps:$4 sm:$0xff]  }
 0x37c   :  { %4789 = vmatprep.subr.bf16.mxu1 %v6160_v37  ;;  %v6247_v37 = vld [vmem:[#allocation8 + $0x644] ss:$24 sps:$4 sm:$0xff]  }
 0x37e   :  { %4809 = vmatpush1.bf16.msra.mxu0 %v6155_v38  ;;  %v6245_v38 = vld [vmem:[#allocation8 + $0x640] ss:$24 sps:$4 sm:$0xff]  }
 0x37f   :  { %4790 = vmatpush1.bf16.msra.mxu1 %v6158_v39  ;;  %4810 = vmatprep.subr.bf16.mxu0 %v6163_v40  ;;  %v6250_v39 = vld [vmem:[#allocation8 + $0x674] ss:$24 sps:$4 sm:$0xff]   ;;  %v6248_v40 = vld [vmem:[#allocation8 + $0x670] ss:$24 sps:$4 sm:$0xff]  }
 0x382   :  { %4792 = vmatmul.mubr.bf16.vlgmr.msra.gmra.mrb[16].mxu1 %v6645_v22  ;;  %4811 = vmatpush1.bf16.msra.mxu0 %v6161_v41  ;;  %v6253_v41 = vld [vmem:[#allocation8 + $0x6a4] ss:$24 sps:$4 sm:$0xff]  }
 0x383   :  { %4812 = vmatprep.subr.bf16.mxu0 %v6166_v43  ;;  %v6251_v43 = vld [vmem:[#allocation8 + $0x6a0] ss:$24 sps:$4 sm:$0xff]  }
 0x386   :  { %4813 = vmatpush1.bf16.msra.mxu0 %v6164_v44  ;;  %v6256_v44 = vld [vmem:[#allocation8 + $0x6d4] ss:$24 sps:$4 sm:$0xff]  }
 0x387   :  { %4814 = vmatprep.subr.bf16.mxu0 %v6169_v46  ;;  %v6254_v46 = vld [vmem:[#allocation8 + $0x6d0] ss:$24 sps:$4 sm:$0xff]  }
 0x38a   :  { %4815 = vmatpush1.bf16.msra.mxu0 %v6167_v50  ;;  %v6259_v50 = vld [vmem:[#allocation8 + $0x704] ss:$24 sps:$4 sm:$0xff]  }
 0x38b   :  { %4816 = vmatprep.subr.bf16.mxu0 %v6172_v52  ;;  %v6262_v52 = vld [vmem:[#allocation8 + $0x734] ss:$24 sps:$4 sm:$0xff]  }
 0x38e   :  { %4817 = vmatpush1.bf16.msra.mxu0 %v6170_v4  ;;  %v6265_v4 = vld [vmem:[#allocation8 + $0x764] ss:$24 sps:$4 sm:$0xff]  }
 0x38f   :  { %4818 = vmatprep.subr.bf16.mxu0 %v6175_v54  ;;  %v6263_v54 = vld [vmem:[#allocation8 + $0x760] ss:$24 sps:$4 sm:$0xff]  }
 0x392   :  { %4819 = vmatpush1.bf16.msra.mxu0 %v6173_v47  ;;  %v6268_v47 = vld [vmem:[#allocation8 + $0x794] ss:$24 sps:$4 sm:$0xff]  }
 0x393   :  { %4820 = vmatprep.subr.bf16.mxu0 %v6178_v55  ;;  %v6266_v55 = vld [vmem:[#allocation8 + $0x790] ss:$24 sps:$4 sm:$0xff]  }
 0x396   :  { %4821 = vmatpush1.bf16.msra.mxu0 %v6176_v49  ;;  %v6271_v49 = vld [vmem:[#allocation8 + $0x7c4] ss:$24 sps:$4 sm:$0xff]  }
 0x397   :  { %4822 = vmatprep.subr.bf16.mxu0 %v6181_v56  ;;  %v6269_v56 = vld [vmem:[#allocation8 + $0x7c0] ss:$24 sps:$4 sm:$0xff]  }
 0x39a   :  { %4823 = vmatpush1.bf16.msra.mxu0 %v6179_v57  ;;  %v6274_v57 = vld [vmem:[#allocation8 + $0x7f4] ss:$24 sps:$4 sm:$0xff]  }
 0x39b   :  { %4824 = vmatprep.subr.bf16.mxu0 %v6184_v58  ;;  %v6272_v58 = vld [vmem:[#allocation8 + $0x7f0] ss:$24 sps:$4 sm:$0xff]  }
 0x39e   :  { %4825 = vmatpush1.bf16.msra.mxu0 %v6182_v59  ;;  %v6277_v59 = vld [vmem:[#allocation8 + $0x824] ss:$24 sps:$4 sm:$0xff]  }
 0x39f   :  { %4826 = vmatprep.subr.bf16.mxu0 %v6187_v61  ;;  %v6275_v61 = vld [vmem:[#allocation8 + $0x820] ss:$24 sps:$4 sm:$0xff]  }
 0x3a2   :  { %4827 = vmatpush1.bf16.msra.mxu0 %v6185_v25  ;;  %v6280_v25 = vld [vmem:[#allocation8 + $0x854] ss:$24 sps:$4 sm:$0xff]  }
 0x3a3   :  { %4828 = vmatprep.subr.bf16.mxu0 %v6190_v0  ;;  %v6278_v0 = vld [vmem:[#allocation8 + $0x850] ss:$24 sps:$4 sm:$0xff]  }
 0x3a6   :  { %4829 = vmatpush1.bf16.msra.mxu0 %v6188_v1  ;;  %v6283_v1 = vld [vmem:[#allocation8 + $0x884] ss:$24 sps:$4 sm:$0xff]  }
 0x3a7   :  { %4830 = vmatprep.subr.bf16.mxu0 %v6193_v63  ;;  %v6281_v63 = vld [vmem:[#allocation8 + $0x880] ss:$24 sps:$4 sm:$0xff]  }
 0x3aa   :  { %4831 = vmatpush1.bf16.msra.mxu0 %v6191_v2  ;;  %v6286_v2 = vld [vmem:[#allocation8 + $0x8b4] ss:$24 sps:$4 sm:$0xff]  }
 0x3ab   :  { %4841 = vmatprep.subr.bf16.mxu0 %v6196_v3  ;;  %v6284_v3 = vld [vmem:[#allocation8 + $0x8b0] ss:$24 sps:$4 sm:$0xff]  }
 0x3ad   :  { %4833 = vmatmul.mubr.bf16.vlgmr.msra.gmra.mrb[12].mxu0 %v6614_v45  ;;  %v6209_v45 = vld [vmem:[#allocation8 + $0x400] ss:$24 sps:$4 sm:$0xff]  }
 0x3ae   :  { %4842 = vmatpush1.bf16.msra.mxu0 %v6194_v5  ;;  %4873 = vmatprep.mubr.bf16.mxu0 %v6624_v48  ;;  %v6212_v48 = vld [vmem:[#allocation8 + $0x430] ss:$24 sps:$4 sm:$0xff]   ;;  %v6289_v5 = vld [vmem:[#allocation8 + $0x8e4] ss:$24 sps:$4 sm:$0xff]  }
 0x3af   :  { %4843 = vmatprep.subr.bf16.mxu0 %v6199_v6  ;;  %v6287_v6 = vld [vmem:[#allocation8 + $0x8e0] ss:$24 sps:$4 sm:$0xff]  }
 0x3b2   :  { %4844 = vmatpush1.bf16.msra.mxu0 %v6197_v7  ;;  %v6292_v7 = vld [vmem:[#allocation8 + $0x914] ss:$24 sps:$4 sm:$0xff]  }
 0x3b3   :  { %4845 = vmatprep.subr.bf16.mxu0 %v6202_v8  ;;  %v6290_v8 = vld [vmem:[#allocation8 + $0x910] ss:$24 sps:$4 sm:$0xff]  }
 0x3b6   :  { %4846 = vmatpush1.bf16.msra.mxu0 %v6200_v9  ;;  %v6295_v9 = vld [vmem:[#allocation8 + $0x944] ss:$24 sps:$4 sm:$0xff]  }
 0x3b7   :  { %4847 = vmatprep.subr.bf16.mxu0 %v6205_v10  ;;  %v6293_v10 = vld [vmem:[#allocation8 + $0x940] ss:$24 sps:$4 sm:$0xff]  }
 0x3ba   :  { %4848 = vmatpush1.bf16.msra.mxu0 %v6203_v11  ;;  %v6298_v11 = vld [vmem:[#allocation8 + $0x974] ss:$24 sps:$4 sm:$0xff]  }
 0x3bb   :  { %4849 = vmatprep.subr.bf16.mxu0 %v6208_v12  ;;  %v6296_v12 = vld [vmem:[#allocation8 + $0x970] ss:$24 sps:$4 sm:$0xff]  }
 0x3be   :  { %4850 = vmatpush1.bf16.msra.mxu0 %v6206_v13  ;;  %v6301_v13 = vld [vmem:[#allocation8 + $0x9a4] ss:$24 sps:$4 sm:$0xff]  }
 0x3bf   :  { %4851 = vmatprep.subr.bf16.mxu0 %v6211_v14  ;;  %v6299_v14 = vld [vmem:[#allocation8 + $0x9a0] ss:$24 sps:$4 sm:$0xff]  }
 0x3c2   :  { %4852 = vmatpush1.bf16.msra.mxu0 %v6209_v45  ;;  %v6304_v45 = vld [vmem:[#allocation8 + $0x9d4] ss:$24 sps:$4 sm:$0xff]  }
 0x3c3   :  { %4853 = vmatprep.subr.bf16.mxu0 %v6214_v15  ;;  %v6302_v15 = vld [vmem:[#allocation8 + $0x9d0] ss:$24 sps:$4 sm:$0xff]  }
 0x3c6   :  { %4854 = vmatpush1.bf16.msra.mxu0 %v6212_v48  ;;  %v6307_v48 = vld [vmem:[#allocation8 + $0xa04] ss:$24 sps:$4 sm:$0xff]  }
 0x3c7   :  { %4855 = vmatprep.subr.bf16.mxu0 %v6217_v16  ;;  %v6310_v16 = vld [vmem:[#allocation8 + $0xa34] ss:$24 sps:$4 sm:$0xff]  }
 0x3ca   :  { %4856 = vmatpush1.bf16.msra.mxu0 %v6215_v17 }
 0x3cb   :  { %4857 = vmatprep.subr.bf16.mxu0 %v6220_v18 }
 0x3ce   :  { %4858 = vmatpush1.bf16.msra.mxu0 %v6218_v60  ;;  %v6308_v60 = vld [vmem:[#allocation8 + $0xa30] ss:$24 sps:$4 sm:$0xff]  }
 0x3cf   :  { %4859 = vmatprep.subr.bf16.mxu0 %v6223_v19 }
 0x3d2   :  { %4860 = vmatpush1.bf16.msra.mxu0 %v6221_v21  ;;  %v6313_v21 = vld [vmem:[#allocation8 + $0xa64] ss:$24 sps:$4 sm:$0xff]  }
 0x3d3   :  { %4861 = vmatprep.subr.bf16.mxu0 %v6226_v23  ;;  %v6311_v23 = vld [vmem:[#allocation8 + $0xa60] ss:$24 sps:$4 sm:$0xff]  }
 0x3d6   :  { %4862 = vmatpush1.bf16.msra.mxu0 %v6224_v24  ;;  %v6316_v24 = vld [vmem:[#allocation8 + $0xa94] ss:$24 sps:$4 sm:$0xff]  }
 0x3d7   :  { %4863 = vmatprep.subr.bf16.mxu0 %v6229_v26  ;;  %v6314_v26 = vld [vmem:[#allocation8 + $0xa90] ss:$24 sps:$4 sm:$0xff]  }
 0x3da   :  { %4864 = vmatpush1.bf16.msra.mxu0 %v6227_v27 }
 0x3db   :  { %4865 = vmatprep.subr.bf16.mxu0 %v6232_v28  ;;  %v6319_v28 = vld [vmem:[#allocation8 + $0xac4] ss:$24 sps:$4 sm:$0xff]  }
 0x3de   :  { %4866 = vmatpush1.bf16.msra.mxu0 %v6230_v29 }
 0x3df   :  { %4867 = vmatprep.subr.bf16.mxu0 %v6235_v30 }
 0x3e2   :  { %4868 = vmatpush1.bf16.msra.mxu0 %v6233_v31  ;;  %v6317_v31 = vld [vmem:[#allocation8 + $0xac0] ss:$24 sps:$4 sm:$0xff]  }
 0x3e3   :  { %4869 = vmatprep.subr.bf16.mxu0 %v6238_v32  ;;  %v6322_v32 = vld [vmem:[#allocation8 + $0xaf4] ss:$24 sps:$4 sm:$0xff]  }
 0x3e6   :  { %4870 = vmatpush1.bf16.msra.mxu0 %v6236_v33  ;;  %v6320_v33 = vld [vmem:[#allocation8 + $0xaf0] ss:$24 sps:$4 sm:$0xff]  }
 0x3e7   :  { %4871 = vmatprep.subr.bf16.mxu0 %v6241_v34  ;;  %v6325_v34 = vld [vmem:[#allocation8 + $0xb24] ss:$24 sps:$4 sm:$0xff]  }
 0x3ea   :  { %4872 = vmatpush1.bf16.msra.mxu0 %v6239_v35 }
 0x3eb   :  { %4882 = vmatprep.subr.bf16.mxu0 %v6244_v42 }
 0x3ed   :  { %4874 = vmatmul.mubr.bf16.vlgmr.msra.gmra.mrb[12].mxu0 %v6626_v51  ;;  %v6257_v51 = vld [vmem:[#allocation8 + $0x700] ss:$24 sps:$4 sm:$0xff]  }
 0x3ee   :  { %4883 = vmatpush1.bf16.msra.mxu0 %v6242_v36  ;;  %4914 = vmatprep.mubr.bf16.mxu0 %v6630_v53  ;;  %v6260_v53 = vld [vmem:[#allocation8 + $0x730] ss:$24 sps:$4 sm:$0xff]   ;;  %v6323_v36 = vld [vmem:[#allocation8 + $0xb20] ss:$24 sps:$4 sm:$0xff]  }
 0x3ef   :  { %4884 = vmatprep.subr.bf16.mxu0 %v6247_v37 }
 0x3f2   :  { %4885 = vmatpush1.bf16.msra.mxu0 %v6245_v38  ;;  %v6328_v38 = vld [vmem:[#allocation8 + $0xb54] ss:$24 sps:$4 sm:$0xff]  }
 0x3f3   :  { %4886 = vmatprep.subr.bf16.mxu0 %v6250_v39 }
 0x3f6   :  { %4887 = vmatpush1.bf16.msra.mxu0 %v6248_v40  ;;  %v6503_v40 = vmov 1983009808  }
 0x3f7   :  { %4888 = vmatprep.subr.bf16.mxu0 %v6253_v41  ;;  %v4979_v41 = vunpack.c.l.s4 %v6503_v40 }
 0x3fa   :  { %4889 = vmatpush1.bf16.msra.mxu0 %v6251_v43  ;;  %v4981_v43 = vlaneseq }
 0x3fb   :  { %4890 = vmatprep.subr.bf16.mxu0 %v6256_v44  ;;  %v6326_v44 = vld [vmem:[#allocation8 + $0xb50] ss:$24 sps:$4 sm:$0xff]  }
 0x3fe   :  { %4891 = vmatpush1.bf16.msra.mxu0 %v6254_v46  ;;  %v6331_v46 = vld [vmem:[#allocation8 + $0xb84] ss:$24 sps:$4 sm:$0xff]  }
 0x3ff   :  { %4892 = vmatprep.subr.bf16.mxu0 %v6259_v50  ;;  %v4980_v50 = vunpack.c.0.s8 %v4979_v41 }
 0x402   :  { %4893 = vmatpush1.bf16.msra.mxu0 %v6257_v51  ;;  %v4982_v51 = vshrl.u32 %v4981_v43, 7 }
 0x403   :  { %4894 = vmatprep.subr.bf16.mxu0 %v6262_v52  ;;  %v6329_v52 = vld [vmem:[#allocation8 + $0xb80] ss:$24 sps:$4 sm:$0xff]  }
 0x406   :  { %4895 = vmatpush1.bf16.msra.mxu0 %v6260_v53  ;;  %v6334_v53 = vld [vmem:[#allocation8 + $0xbb4] ss:$24 sps:$4 sm:$0xff]  }
 0x407   :  { %4896 = vmatprep.subr.bf16.mxu0 %v6265_v4 }
 0x40a   :  { %4897 = vmatpush1.bf16.msra.mxu0 %v6263_v54  ;;  %v4983_v54 = vsub.s32 %v4980_v50, %v4982_v51 }
 0x40b   :  { %4898 = vmatprep.subr.bf16.mxu0 %v6268_v47 }
 0x40e   :  { %4899 = vmatpush1.bf16.msra.mxu0 %v6266_v55  ;;  %v6332_v55 = vld [vmem:[#allocation8 + $0xbb0] ss:$24 sps:$4 sm:$0xff]  }
 0x40f   :  { %4900 = vmatprep.subr.bf16.mxu0 %v6271_v49 }
 0x412   :  { %4901 = vmatpush1.bf16.msra.mxu0 %v6269_v56  ;;  %v6337_v56 = vld [vmem:[#allocation8 + $0xbe4] ss:$24 sps:$4 sm:$0xff]  }
 0x413   :  { %4902 = vmatprep.subr.bf16.mxu0 %v6274_v57 }
 0x416   :  { %4903 = vmatpush1.bf16.msra.mxu0 %v6272_v58 }
 0x417   :  { %4904 = vmatprep.subr.bf16.mxu0 %v6277_v59  ;;  %v6335_v59 = vld [vmem:[#allocation8 + $0xbe0] ss:$24 sps:$4 sm:$0xff]  }
 0x41a   :  { %4905 = vmatpush1.bf16.msra.mxu0 %v6275_v61 }
 0x41b   :  { %4906 = vmatprep.subr.bf16.mxu0 %v6280_v25 }
 0x41e   :  { %4907 = vmatpush1.bf16.msra.mxu0 %v6278_v0 }
 0x41f   :  { %4908 = vmatprep.subr.bf16.mxu0 %v6283_v1 }
 0x422   :  { %4909 = vmatpush1.bf16.msra.mxu0 %v6281_v63 }
 0x423   :  { %4910 = vmatprep.subr.bf16.mxu0 %v6286_v2 }
 0x426   :  { %4911 = vmatpush1.bf16.msra.mxu0 %v6284_v3 }
 0x427   :  { %4912 = vmatprep.subr.bf16.mxu0 %v6289_v5 }
 0x42a   :  { %4913 = vmatpush1.bf16.msra.mxu0 %v6287_v6 }
 0x42b   :  { %4923 = vmatprep.subr.bf16.mxu0 %v6292_v7 }
 0x42d   :  { %4915 = vmatmul.mubr.bf16.vlgmr.msra.gmra.mrb[12].mxu0 %v6639_v62  ;;  %v6305_v62 = vld [vmem:[#allocation8 + $0xa00] ss:$24 sps:$4 sm:$0xff]  }
 0x42e   :  { %4924 = vmatpush1.bf16.msra.mxu0 %v6290_v8  ;;  %4955 = vmatprep.mubr.bf16.mxu0 %v6643_v20 }
 0x42f   :  { %4925 = vmatprep.subr.bf16.mxu0 %v6295_v9 }
 0x432   :  { %4926 = vmatpush1.bf16.msra.mxu0 %v6293_v10 }
 0x433   :  { %4927 = vmatprep.subr.bf16.mxu0 %v6298_v11 }
 0x436   :  { %4928 = vmatpush1.bf16.msra.mxu0 %v6296_v12 }
 0x437   :  { %4929 = vmatprep.subr.bf16.mxu0 %v6301_v13 }
 0x43a   :  { %4930 = vmatpush1.bf16.msra.mxu0 %v6299_v14 }
 0x43b   :  { %4931 = vmatprep.subr.bf16.mxu0 %v6304_v45 }
 0x43e   :  { %4932 = vmatpush1.bf16.msra.mxu0 %v6302_v15 }
 0x43f   :  { %4933 = vmatprep.subr.bf16.mxu0 %v6307_v48 }
 0x440   :  { %v4629_v20 = vpop.f32.mrb[8].mxu0 }
 0x441   :  { %6362 = vtanh.f32 %v4629_v20  ;;  %v4631_v17 = vpop.f32.mrb[9].mxu0 }
 0x442   :  { %6364 = vtanh.f32 %v4631_v17  ;;  %4934 = vmatpush1.bf16.msra.mxu0 %v6305_v62  ;;  %v4633_v18 = vpop.f32.mrb[10].mxu0 }
 0x443   :  { %v4634_v19 = vpop.f32.mrb[11].mxu0  ;;  %4935 = vmatprep.subr.bf16.mxu0 %v6310_v16 }
 0x446   :  { %4936 = vmatpush1.bf16.msra.mxu0 %v6308_v60 }
 0x447   :  { %4937 = vmatprep.subr.bf16.mxu0 %v6313_v21 }
 0x44a   :  { %4938 = vmatpush1.bf16.msra.mxu0 %v6311_v23 }
 0x44b   :  { %v6363_v27 = vpop.eup %6362  ;;  %4939 = vmatprep.subr.bf16.mxu0 %v6316_v24 }
 0x44c   :  { %v6365_v29 = vpop.eup %6364 }
 0x44d   :  { %v4976_v30 = vcombine.low %v6363_v27, %v6365_v29 }
 0x44e   :  { %4940 = vmatpush1.bf16.msra.mxu0 %v6314_v26 }
 0x44f   :  { %4941 = vmatprep.subr.bf16.mxu0 %v6319_v28  ;;  %v4984_v57 = vrot.slane %v4976_v30, %v4983_v54 }
 0x452   :  { %4942 = vmatpush1.bf16.msra.mxu0 %v6317_v31 }
 0x453   :  { %4943 = vmatprep.subr.bf16.mxu0 %v6322_v32 }
 0x455   :  { %v4793_v35 = vpop.f32.mrb[16].mxu1 }
 0x456   :  { %6366 = vtanh.f32 %v4793_v35  ;;  %v4795_v42 = vpop.f32.mrb[17].mxu1  ;;  %4944 = vmatpush1.bf16.msra.mxu0 %v6320_v33 }
 0x457   :  { %6368 = vtanh.f32 %v4795_v42  ;;  %v4797_v37 = vpop.f32.mrb[18].mxu1  ;;  %4945 = vmatprep.subr.bf16.mxu0 %v6325_v34 }
 0x458   :  { %v4798_v39 = vpop.f32.mrb[19].mxu1 }
 0x45a   :  { %4946 = vmatpush1.bf16.msra.mxu0 %v6323_v36 }
 0x45b   :  { %4947 = vmatprep.subr.bf16.mxu0 %v6328_v38 }
 0x45e   :  { %4948 = vmatpush1.bf16.msra.mxu0 %v6326_v44 }
 0x45f   :  { %4949 = vmatprep.subr.bf16.mxu0 %v6331_v46 }
 0x460   :  { %v6367_v4 = vpop.eup %6366 }
 0x461   :  { %v6369_v47 = vpop.eup %6368 }
 0x462   :  { %4950 = vmatpush1.bf16.msra.mxu0 %v6329_v52  ;;  %v4977_v49 = vcombine.low %v6367_v4, %v6369_v47 }
 0x463   :  { %4951 = vmatprep.subr.bf16.mxu0 %v6334_v53 }
 0x464   :  { %v4991_v58 = vrot.slane %v4977_v49, %v4983_v54 }
 0x466   :  { %4952 = vmatpush1.bf16.msra.mxu0 %v6332_v55  ;;  %v4992_v61 = vcombine.low %v4984_v57, %v4991_v58 }
 0x467   :  { %4953 = vmatprep.subr.bf16.mxu0 %v6337_v56 }
 0x468   :  { %5003 = vst [vmem:[#allocation10] sm:$0xff] %v4992_v61 }
 0x46a   :  { %4954 = vmatpush1.bf16.msra.mxu0 %v6335_v59 }
 0x46d   :  { %4956 = vmatmul.mubr.bf16.vlgmr.msra.gmra.mrb[12].mxu0 %v6645_v22 }
 0x540   :  { %v4957_v25 = vpop.f32.mrb[12].mxu0 }
 0x541   :  { %6370 = vtanh.f32 %v4957_v25  ;;  %v4959_v0 = vpop.f32.mrb[13].mxu0 }
 0x542   :  { %6372 = vtanh.f32 %v4959_v0  ;;  %v4961_v1 = vpop.f32.mrb[14].mxu0 }
 0x543   :  { %v4962_v63 = vpop.f32.mrb[15].mxu0 }
 0x54b   :  { %v6371_v2 = vpop.eup %6370 }
 0x54c   :  { %v6373_v3 = vpop.eup %6372 }
 0x54d   :  { %v4993_v5 = vcombine.low %v6371_v2, %v6373_v3 }
 0x54f   :  { %5684 = vst.sshfl [vmem:[#allocation10 + $0x8] sm:$0x33 pattern:$0x76325410] %v4993_v5 }
 0x550   :  { %6473 = shalt.err (!%p6470_p8)
}
 0x551   :  { %s6474_s17 = scalar_lea.hbm %s6675_s4, 192 }
 0x552   :  { %p6475_p9 = scmp.ne.s32.totalorder %s6675_s4, %s6474_s17  ;;  %p6478_p10 = scmp.lt.u32.totalorder %s6474_s17, %s6675_s4 }
 0x554   :  { %p6480_p11 = pnand %p6478_p10, %p6475_p9 }
 0x556   :  { %6483 = shalt.err (!%p6480_p11)
}
 0x557   :  { %5014 = dma.vmem_to_hbm [thread:$0]  %s5012_s1, 192, %s6675_s4, [#allocation4]  }
 0x558   :  { %6490 = dma.done.wait [#allocation4], 192  }
 0x559   :  { %6491 = vsyncadd [#allocation4], 4294967104 }
 0x55a   :  { %5018 = vsyncpa [#allocation3], 1 }
 0x55b   :  { %5019 = vsyncpa [#allocation6], 1 }
 0x55c   :  { %5020 = vsyncpa [#allocation9], 1 }
 0x55d   :  { %5021 = vsyncpa [#allocation4], 1 }

</bundles_post_ra>
